<compile_context>
chip_gen: v5e
topology: v5e:2x2
jax: 0.10.0
libtpu: 0.0.40
codegen_flags: <defaults>
</compile_context>

<pallas_src>
import jax
import jax.numpy as jnp
from jax.experimental import pallas as pl
from jax.experimental.pallas import tpu as pltpu

EPS = 1e-5  # nn.BatchNorm2d default eps


# ---------------------------------------------------------------------------
# In-kernel helpers
# ---------------------------------------------------------------------------
def _im2col_into(patch_ref, xpad, H, W, C):
    """Write the 3x3 im2col patch matrix of xpad (N,H+2,W+2,C) into patch_ref
    of shape (M, 9*C), column order (dy, dx, ci) matching w.reshape(9*C, C)."""
    N = xpad.shape[0]
    M = N * H * W
    for dy in range(3):
        for dx in range(3):
            t = dy * 3 + dx
            patch_ref[:, t * C:(t + 1) * C] = (
                xpad[:, dy:dy + H, dx:dx + W, :].reshape(M, C))


def _bn(y, gamma_row, beta_row):
    """Training-mode BatchNorm on flattened (M, C), one-pass batch stats."""
    m = y.shape[0]
    inv_m = 1.0 / m
    mean = jnp.sum(y, axis=0, keepdims=True) * inv_m
    ex2 = jnp.sum(y * y, axis=0, keepdims=True) * inv_m
    var = jnp.maximum(ex2 - mean * mean, 0.0)          # biased variance
    scale = jax.lax.rsqrt(var + EPS) * gamma_row
    return (y - mean) * scale + beta_row


# ---------------------------------------------------------------------------
# Fused ResBlock kernel: pad -> conv1 -> bn1 -> relu -> pad -> conv2 -> bn2
#                        -> +residual -> relu, all inside one invocation.
# ---------------------------------------------------------------------------
def resblock_kernel(x_ref, w1_ref, g1_ref, be1_ref, w2_ref, g2_ref, be2_ref,
                    out_ref, xpad_sc, ypad_sc, patch_sc):
    N, H, W, C = x_ref.shape
    M = N * H * W

    x = x_ref[...]                                       # (N, H, W, C)

    # -- SAME padding of the input, entirely in VMEM ------------------------
    xpad_sc[...] = jnp.zeros_like(xpad_sc)
    xpad_sc[:, 1:H + 1, 1:W + 1, :] = x

    # -- conv1 as a single K=9C im2col matmul -> BN1 -> ReLU -----------------
    _im2col_into(patch_sc, xpad_sc[...], H, W, C)
    y1 = jnp.dot(patch_sc[...], w1_ref[...],
                 preferred_element_type=jnp.float32)     # (M, C)
    y1 = jnp.maximum(_bn(y1, g1_ref[...], be1_ref[...]), 0.0)

    # -- pad intermediate; it never leaves VMEM ------------------------------
    ypad_sc[...] = jnp.zeros_like(ypad_sc)
    ypad_sc[:, 1:H + 1, 1:W + 1, :] = y1.reshape(N, H, W, C)

    # -- conv2 -> BN2 -> residual add -> ReLU --------------------------------
    _im2col_into(patch_sc, ypad_sc[...], H, W, C)        # reuse patch scratch
    y2 = jnp.dot(patch_sc[...], w2_ref[...],
                 preferred_element_type=jnp.float32)     # (M, C)
    y2 = _bn(y2, g2_ref[...], be2_ref[...]) + x.reshape(M, C)
    out_ref[...] = jnp.maximum(y2, 0.0).reshape(N, H, W, C)


# ---------------------------------------------------------------------------
# Wrapper
# ---------------------------------------------------------------------------
def _full_spec(shape):
    # whole-array block (everything fits comfortably in VMEM at this size;
    # total scratch+I/O here is well under the default scoped VMEM limit on
    # v5e/v6e/v7x — at larger N*H*W, tile M and carry partial BN sums).
    return pl.BlockSpec(shape, lambda i, _s=shape: (0,) * len(_s))


def res_block_forward(x_nchw, params):
    """x_nchw: (N, C, H, W) float32 — mirrors the PyTorch NCHW input."""
    w1, b1, g1, be1, w2, b2, g2, be2 = params
    del b1, b2   # conv bias cancels exactly under batch-statistics BatchNorm
    N, C, H, W = x_nchw.shape
    M = N * H * W
    x = jnp.transpose(x_nchw, (0, 2, 3, 1)).astype(jnp.float32)      # NHWC
    # HWIO (3,3,Cin,Cout) -> (9*Cin, Cout), row order (dy, dx, ci) matches
    # the in-kernel im2col column order.
    w1c = w1.reshape(9 * C, C)
    w2c = w2.reshape(9 * C, C)

    out = pl.pallas_call(
        resblock_kernel,
        out_shape=jax.ShapeDtypeStruct((N, H, W, C), jnp.float32),
        grid=(1,),
        in_specs=[_full_spec((N, H, W, C)),
                  _full_spec((9 * C, C)), _full_spec((1, C)), _full_spec((1, C)),
                  _full_spec((9 * C, C)), _full_spec((1, C)), _full_spec((1, C))],
        out_specs=_full_spec((N, H, W, C)),
        scratch_shapes=[pltpu.VMEM((N, H + 2, W + 2, C), jnp.float32),  # xpad
                        pltpu.VMEM((N, H + 2, W + 2, C), jnp.float32),  # y1pad
                        pltpu.VMEM((M, 9 * C), jnp.float32)],           # im2col
        compiler_params=pltpu.CompilerParams(
            dimension_semantics=("arbitrary",)),
    )(x, w1c, g1, be1, w2c, g2, be2)

    return jnp.transpose(out, (0, 3, 1, 2))              # back to NCHW


# ---------------------------------------------------------------------------
# Pure-JAX reference (PyTorch semantics, incl. conv bias) for sanity checking
# ---------------------------------------------------------------------------
def res_block_reference(x_nchw, params):
    w1, b1, g1, be1, w2, b2, g2, be2 = params
    x = jnp.transpose(x_nchw, (0, 2, 3, 1)).astype(jnp.float32)

    def conv(a, w, b):
        y = jax.lax.conv_general_dilated(
            a, w, window_strides=(1, 1), padding="SAME",
            dimension_numbers=("NHWC", "HWIO", "NHWC"),
            precision=jax.lax.Precision.HIGHEST)
        return y + b.reshape(1, 1, 1, -1)

    def bn(a, g, be):
        mean = jnp.mean(a, axis=(0, 1, 2), keepdims=True)
        var = jnp.mean((a - mean) ** 2, axis=(0, 1, 2), keepdims=True)
        return ((a - mean) * jax.lax.rsqrt(var + EPS)
                * g.reshape(1, 1, 1, -1) + be.reshape(1, 1, 1, -1))

    y = jax.nn.relu(bn(conv(x, w1, b1), g1, be1))
    y = bn(conv(y, w2, b2), g2, be2) + x
    y = jax.nn.relu(y)
    return jnp.transpose(y, (0, 3, 1, 2))


# ---------------------------------------------------------------------------
def init_params(key, num_hidden):
    C = num_hidden
    ks = jax.random.split(key, 8)
    scale = 1.0 / jnp.sqrt(9.0 * C)
    w1 = scale * jax.random.normal(ks[0], (3, 3, C, C), jnp.float32)   # HWIO
    b1 = scale * jax.random.normal(ks[1], (1, C), jnp.float32)
    g1 = 1.0 + 0.1 * jax.random.normal(ks[2], (1, C), jnp.float32)
    be1 = 0.1 * jax.random.normal(ks[3], (1, C), jnp.float32)
    w2 = scale * jax.random.normal(ks[4], (3, 3, C, C), jnp.float32)
    b2 = scale * jax.random.normal(ks[5], (1, C), jnp.float32)
    g2 = 1.0 + 0.1 * jax.random.normal(ks[6], (1, C), jnp.float32)
    be2 = 0.1 * jax.random.normal(ks[7], (1, C), jnp.float32)
    return (w1, b1, g1, be1, w2, b2, g2, be2)


# TODO(synk): PyTorch BatchNorm training mode also updates running_mean/var
# buffers; that side effect is not modeled (forward output is unaffected).

if __name__ == "__main__":
    N, num_hidden, H, W = 2, 32, 8, 8
    key = jax.random.PRNGKey(0)
    kx, kp = jax.random.split(key)
    x = jax.random.normal(kx, (N, num_hidden, H, W), jnp.float32)   # NCHW
    params = init_params(kp, num_hidden)

    out = jax.block_until_ready(res_block_forward(x, params))
    ref = jax.block_until_ready(res_block_reference(x, params))

    if not jnp.allclose(out, ref, atol=2e-3, rtol=2e-3):
        max_err = float(jnp.max(jnp.abs(out - ref)))
        raise AssertionError(f"Pallas ResBlock mismatch, max abs err = {max_err}")

    print("KERNEL_OK")
</pallas_src>

<mosaic_0001>
module attributes {stable_mosaic.version = 11 : i64} {
  func.func @resblock_kernel(%arg0: i32, %arg1: memref<2x8x8x32xf32, #tpu.memory_space<vmem>>, %arg2: memref<288x32xf32, #tpu.memory_space<vmem>>, %arg3: memref<1x32xf32, #tpu.memory_space<vmem>>, %arg4: memref<1x32xf32, #tpu.memory_space<vmem>>, %arg5: memref<288x32xf32, #tpu.memory_space<vmem>>, %arg6: memref<1x32xf32, #tpu.memory_space<vmem>>, %arg7: memref<1x32xf32, #tpu.memory_space<vmem>>, %arg8: memref<2x8x8x32xf32, #tpu.memory_space<vmem>>, %arg9: memref<2x10x10x32xf32, #tpu.memory_space<vmem>>, %arg10: memref<2x10x10x32xf32, #tpu.memory_space<vmem>>, %arg11: memref<128x288xf32, #tpu.memory_space<vmem>>) attributes {dimension_semantics = [#tpu.dimension_semantics<arbitrary>], iteration_bounds = array<i64: 1>, scalar_prefetch = 0 : i64, scratch_operands = 3 : i64, tpu.core_type = #tpu.core_type<tc>, window_params = [{pipeline_mode = #tpu.pipeline_mode<synchronous>, transform_indices = @transform_0, window_bounds = array<i64: 2, 8, 8, 32>}, {pipeline_mode = #tpu.pipeline_mode<synchronous>, transform_indices = @transform_1, window_bounds = array<i64: 288, 32>}, {pipeline_mode = #tpu.pipeline_mode<synchronous>, transform_indices = @transform_2, window_bounds = array<i64: 1, 32>}, {pipeline_mode = #tpu.pipeline_mode<synchronous>, transform_indices = @transform_3, window_bounds = array<i64: 1, 32>}, {pipeline_mode = #tpu.pipeline_mode<synchronous>, transform_indices = @transform_4, window_bounds = array<i64: 288, 32>}, {pipeline_mode = #tpu.pipeline_mode<synchronous>, transform_indices = @transform_5, window_bounds = array<i64: 1, 32>}, {pipeline_mode = #tpu.pipeline_mode<synchronous>, transform_indices = @transform_6, window_bounds = array<i64: 1, 32>}, {pipeline_mode = #tpu.pipeline_mode<synchronous>, transform_indices = @transform_7, window_bounds = array<i64: 2, 8, 8, 32>}]} {
    %c0 = arith.constant 0 : index
    %c0_0 = arith.constant 0 : index
    %c0_1 = arith.constant 0 : index
    %c0_2 = arith.constant 0 : index
    %0 = vector.load %arg1[%c0, %c0_0, %c0_1, %c0_2] : memref<2x8x8x32xf32, #tpu.memory_space<vmem>>, vector<2x8x8x32xf32>
    %cst = arith.constant 0.000000e+00 : f32
    %1 = vector.broadcast %cst : f32 to vector<2x10x10x32xf32>
    %c0_3 = arith.constant 0 : index
    %c0_4 = arith.constant 0 : index
    %c0_5 = arith.constant 0 : index
    %c0_6 = arith.constant 0 : index
    %2 = vector.load %arg9[%c0_3, %c0_4, %c0_5, %c0_6] : memref<2x10x10x32xf32, #tpu.memory_space<vmem>>, vector<2x10x10x32xf32>
    tpu.vector_store %arg9[%c0_3, %c0_4, %c0_5, %c0_6], %1 {strides = array<i32>} : memref<2x10x10x32xf32, #tpu.memory_space<vmem>>, vector<2x10x10x32xf32>,
    %c0_7 = arith.constant 0 : index
    %c1 = arith.constant 1 : index
    %c1_8 = arith.constant 1 : index
    %c0_9 = arith.constant 0 : index
    %3 = vector.load %arg9[%c0_7, %c1, %c1_8, %c0_9] : memref<2x10x10x32xf32, #tpu.memory_space<vmem>>, vector<2x8x8x32xf32>
    tpu.vector_store %arg9[%c0_7, %c1, %c1_8, %c0_9], %0 {strides = array<i32>} : memref<2x10x10x32xf32, #tpu.memory_space<vmem>>, vector<2x8x8x32xf32>,
    %c0_10 = arith.constant 0 : index
    %c0_11 = arith.constant 0 : index
    %c0_12 = arith.constant 0 : index
    %c0_13 = arith.constant 0 : index
    %4 = vector.load %arg9[%c0_10, %c0_11, %c0_12, %c0_13] : memref<2x10x10x32xf32, #tpu.memory_space<vmem>>, vector<2x10x10x32xf32>
    %5 = vector.extract_strided_slice %4 {offsets = [0, 0, 0, 0], sizes = [2, 8, 8, 32], strides = [1, 1, 1, 1]} : vector<2x10x10x32xf32> to vector<2x8x8x32xf32>
    %6 = vector.shape_cast %5 : vector<2x8x8x32xf32> to vector<128x32xf32>
    %c0_14 = arith.constant 0 : index
    %c0_15 = arith.constant 0 : index
    %7 = vector.load %arg11[%c0_14, %c0_15] : memref<128x288xf32, #tpu.memory_space<vmem>>, vector<128x32xf32>
    tpu.vector_store %arg11[%c0_14, %c0_15], %6 {strides = array<i32>} : memref<128x288xf32, #tpu.memory_space<vmem>>, vector<128x32xf32>,
    %8 = vector.extract_strided_slice %4 {offsets = [0, 0, 1, 0], sizes = [2, 8, 8, 32], strides = [1, 1, 1, 1]} : vector<2x10x10x32xf32> to vector<2x8x8x32xf32>
    %9 = vector.shape_cast %8 : vector<2x8x8x32xf32> to vector<128x32xf32>
    %c0_16 = arith.constant 0 : index
    %c32 = arith.constant 32 : index
    %10 = vector.load %arg11[%c0_16, %c32] : memref<128x288xf32, #tpu.memory_space<vmem>>, vector<128x32xf32>
    tpu.vector_store %arg11[%c0_16, %c32], %9 {strides = array<i32>} : memref<128x288xf32, #tpu.memory_space<vmem>>, vector<128x32xf32>,
    %11 = vector.extract_strided_slice %4 {offsets = [0, 0, 2, 0], sizes = [2, 8, 8, 32], strides = [1, 1, 1, 1]} : vector<2x10x10x32xf32> to vector<2x8x8x32xf32>
    %12 = vector.shape_cast %11 : vector<2x8x8x32xf32> to vector<128x32xf32>
    %c0_17 = arith.constant 0 : index
    %c64 = arith.constant 64 : index
    %13 = vector.load %arg11[%c0_17, %c64] : memref<128x288xf32, #tpu.memory_space<vmem>>, vector<128x32xf32>
    tpu.vector_store %arg11[%c0_17, %c64], %12 {strides = array<i32>} : memref<128x288xf32, #tpu.memory_space<vmem>>, vector<128x32xf32>,
    %14 = vector.extract_strided_slice %4 {offsets = [0, 1, 0, 0], sizes = [2, 8, 8, 32], strides = [1, 1, 1, 1]} : vector<2x10x10x32xf32> to vector<2x8x8x32xf32>
    %15 = vector.shape_cast %14 : vector<2x8x8x32xf32> to vector<128x32xf32>
    %c0_18 = arith.constant 0 : index
    %c96 = arith.constant 96 : index
    %16 = vector.load %arg11[%c0_18, %c96] : memref<128x288xf32, #tpu.memory_space<vmem>>, vector<128x32xf32>
    tpu.vector_store %arg11[%c0_18, %c96], %15 {strides = array<i32>} : memref<128x288xf32, #tpu.memory_space<vmem>>, vector<128x32xf32>,
    %17 = vector.extract_strided_slice %4 {offsets = [0, 1, 1, 0], sizes = [2, 8, 8, 32], strides = [1, 1, 1, 1]} : vector<2x10x10x32xf32> to vector<2x8x8x32xf32>
    %18 = vector.shape_cast %17 : vector<2x8x8x32xf32> to vector<128x32xf32>
    %c0_19 = arith.constant 0 : index
    %c128 = arith.constant 128 : index
    %19 = vector.load %arg11[%c0_19, %c128] : memref<128x288xf32, #tpu.memory_space<vmem>>, vector<128x32xf32>
    tpu.vector_store %arg11[%c0_19, %c128], %18 {strides = array<i32>} : memref<128x288xf32, #tpu.memory_space<vmem>>, vector<128x32xf32>,
    %20 = vector.extract_strided_slice %4 {offsets = [0, 1, 2, 0], sizes = [2, 8, 8, 32], strides = [1, 1, 1, 1]} : vector<2x10x10x32xf32> to vector<2x8x8x32xf32>
    %21 = vector.shape_cast %20 : vector<2x8x8x32xf32> to vector<128x32xf32>
    %c0_20 = arith.constant 0 : index
    %c160 = arith.constant 160 : index
    %22 = vector.load %arg11[%c0_20, %c160] : memref<128x288xf32, #tpu.memory_space<vmem>>, vector<128x32xf32>
    tpu.vector_store %arg11[%c0_20, %c160], %21 {strides = array<i32>} : memref<128x288xf32, #tpu.memory_space<vmem>>, vector<128x32xf32>,
    %23 = vector.extract_strided_slice %4 {offsets = [0, 2, 0, 0], sizes = [2, 8, 8, 32], strides = [1, 1, 1, 1]} : vector<2x10x10x32xf32> to vector<2x8x8x32xf32>
    %24 = vector.shape_cast %23 : vector<2x8x8x32xf32> to vector<128x32xf32>
    %c0_21 = arith.constant 0 : index
    %c192 = arith.constant 192 : index
    %25 = vector.load %arg11[%c0_21, %c192] : memref<128x288xf32, #tpu.memory_space<vmem>>, vector<128x32xf32>
    tpu.vector_store %arg11[%c0_21, %c192], %24 {strides = array<i32>} : memref<128x288xf32, #tpu.memory_space<vmem>>, vector<128x32xf32>,
    %26 = vector.extract_strided_slice %4 {offsets = [0, 2, 1, 0], sizes = [2, 8, 8, 32], strides = [1, 1, 1, 1]} : vector<2x10x10x32xf32> to vector<2x8x8x32xf32>
    %27 = vector.shape_cast %26 : vector<2x8x8x32xf32> to vector<128x32xf32>
    %c0_22 = arith.constant 0 : index
    %c224 = arith.constant 224 : index
    %28 = vector.load %arg11[%c0_22, %c224] : memref<128x288xf32, #tpu.memory_space<vmem>>, vector<128x32xf32>
    tpu.vector_store %arg11[%c0_22, %c224], %27 {strides = array<i32>} : memref<128x288xf32, #tpu.memory_space<vmem>>, vector<128x32xf32>,
    %29 = vector.extract_strided_slice %4 {offsets = [0, 2, 2, 0], sizes = [2, 8, 8, 32], strides = [1, 1, 1, 1]} : vector<2x10x10x32xf32> to vector<2x8x8x32xf32>
    %30 = vector.shape_cast %29 : vector<2x8x8x32xf32> to vector<128x32xf32>
    %c0_23 = arith.constant 0 : index
    %c256 = arith.constant 256 : index
    %31 = vector.load %arg11[%c0_23, %c256] : memref<128x288xf32, #tpu.memory_space<vmem>>, vector<128x32xf32>
    tpu.vector_store %arg11[%c0_23, %c256], %30 {strides = array<i32>} : memref<128x288xf32, #tpu.memory_space<vmem>>, vector<128x32xf32>,
    %c0_24 = arith.constant 0 : index
    %c0_25 = arith.constant 0 : index
    %32 = vector.load %arg11[%c0_24, %c0_25] : memref<128x288xf32, #tpu.memory_space<vmem>>, vector<128x288xf32>
    %c0_26 = arith.constant 0 : index
    %c0_27 = arith.constant 0 : index
    %33 = vector.load %arg2[%c0_26, %c0_27] : memref<288x32xf32, #tpu.memory_space<vmem>>, vector<288x32xf32>
    %cst_28 = arith.constant dense<0.000000e+00> : vector<128x32xf32>
    %34 = tpu.matmul %32, %33, %cst_28 {dimension_numbers = #tpu.dot_dimension_numbers<[1], [0], [0], [1], [0, 0, 1, 1], [], []>} : vector<128x288xf32>, vector<288x32xf32>, vector<128x32xf32> -> vector<128x32xf32>
    %c0_29 = arith.constant 0 : index
    %c0_30 = arith.constant 0 : index
    %35 = vector.load %arg3[%c0_29, %c0_30] : memref<1x32xf32, #tpu.memory_space<vmem>>, vector<1x32xf32>
    %c0_31 = arith.constant 0 : index
    %c0_32 = arith.constant 0 : index
    %36 = vector.load %arg4[%c0_31, %c0_32] : memref<1x32xf32, #tpu.memory_space<vmem>>, vector<1x32xf32>
    %cst_33 = arith.constant dense<0.000000e+00> : vector<32xf32>
    %37 = vector.multi_reduction <add>, %34, %cst_33 [0] : vector<128x32xf32> to vector<32xf32>
    %38 = vector.shape_cast %37 : vector<32xf32> to vector<1x32xf32>
    %cst_34 = arith.constant 7.812500e-03 : f32
    %39 = vector.broadcast %cst_34 : f32 to vector<1x32xf32>
    %40 = arith.mulf %38, %39 : vector<1x32xf32>
    %41 = arith.mulf %34, %34 : vector<128x32xf32>
    %cst_35 = arith.constant dense<0.000000e+00> : vector<32xf32>
    %42 = vector.multi_reduction <add>, %41, %cst_35 [0] : vector<128x32xf32> to vector<32xf32>
    %43 = vector.shape_cast %42 : vector<32xf32> to vector<1x32xf32>
    %cst_36 = arith.constant 7.812500e-03 : f32
    %44 = vector.broadcast %cst_36 : f32 to vector<1x32xf32>
    %45 = arith.mulf %43, %44 : vector<1x32xf32>
    %46 = arith.mulf %40, %40 : vector<1x32xf32>
    %47 = arith.subf %45, %46 : vector<1x32xf32>
    %cst_37 = arith.constant 0.000000e+00 : f32
    %48 = vector.broadcast %cst_37 : f32 to vector<1x32xf32>
    %49 = arith.maximumf %47, %48 : vector<1x32xf32>
    %cst_38 = arith.constant 9.99999974E-6 : f32
    %50 = vector.broadcast %cst_38 : f32 to vector<1x32xf32>
    %51 = arith.addf %49, %50 : vector<1x32xf32>
    %52 = math.rsqrt %51 : vector<1x32xf32>
    %53 = arith.mulf %52, %35 : vector<1x32xf32>
    %54 = vector.broadcast %40 : vector<1x32xf32> to vector<128x32xf32>
    %55 = arith.subf %34, %54 : vector<128x32xf32>
    %56 = vector.broadcast %53 : vector<1x32xf32> to vector<128x32xf32>
    %57 = arith.mulf %55, %56 : vector<128x32xf32>
    %58 = vector.broadcast %36 : vector<1x32xf32> to vector<128x32xf32>
    %59 = arith.addf %57, %58 : vector<128x32xf32>
    %cst_39 = arith.constant 0.000000e+00 : f32
    %60 = vector.broadcast %cst_39 : f32 to vector<128x32xf32>
    %61 = arith.maximumf %59, %60 : vector<128x32xf32>
    %cst_40 = arith.constant 0.000000e+00 : f32
    %62 = vector.broadcast %cst_40 : f32 to vector<2x10x10x32xf32>
    %c0_41 = arith.constant 0 : index
    %c0_42 = arith.constant 0 : index
    %c0_43 = arith.constant 0 : index
    %c0_44 = arith.constant 0 : index
    %63 = vector.load %arg10[%c0_41, %c0_42, %c0_43, %c0_44] : memref<2x10x10x32xf32, #tpu.memory_space<vmem>>, vector<2x10x10x32xf32>
    tpu.vector_store %arg10[%c0_41, %c0_42, %c0_43, %c0_44], %62 {strides = array<i32>} : memref<2x10x10x32xf32, #tpu.memory_space<vmem>>, vector<2x10x10x32xf32>,
    %64 = vector.shape_cast %61 : vector<128x32xf32> to vector<2x8x8x32xf32>
    %c0_45 = arith.constant 0 : index
    %c1_46 = arith.constant 1 : index
    %c1_47 = arith.constant 1 : index
    %c0_48 = arith.constant 0 : index
    %65 = vector.load %arg10[%c0_45, %c1_46, %c1_47, %c0_48] : memref<2x10x10x32xf32, #tpu.memory_space<vmem>>, vector<2x8x8x32xf32>
    tpu.vector_store %arg10[%c0_45, %c1_46, %c1_47, %c0_48], %64 {strides = array<i32>} : memref<2x10x10x32xf32, #tpu.memory_space<vmem>>, vector<2x8x8x32xf32>,
    %c0_49 = arith.constant 0 : index
    %c0_50 = arith.constant 0 : index
    %c0_51 = arith.constant 0 : index
    %c0_52 = arith.constant 0 : index
    %66 = vector.load %arg10[%c0_49, %c0_50, %c0_51, %c0_52] : memref<2x10x10x32xf32, #tpu.memory_space<vmem>>, vector<2x10x10x32xf32>
    %67 = vector.extract_strided_slice %66 {offsets = [0, 0, 0, 0], sizes = [2, 8, 8, 32], strides = [1, 1, 1, 1]} : vector<2x10x10x32xf32> to vector<2x8x8x32xf32>
    %68 = vector.shape_cast %67 : vector<2x8x8x32xf32> to vector<128x32xf32>
    %c0_53 = arith.constant 0 : index
    %c0_54 = arith.constant 0 : index
    %69 = vector.load %arg11[%c0_53, %c0_54] : memref<128x288xf32, #tpu.memory_space<vmem>>, vector<128x32xf32>
    tpu.vector_store %arg11[%c0_53, %c0_54], %68 {strides = array<i32>} : memref<128x288xf32, #tpu.memory_space<vmem>>, vector<128x32xf32>,
    %70 = vector.extract_strided_slice %66 {offsets = [0, 0, 1, 0], sizes = [2, 8, 8, 32], strides = [1, 1, 1, 1]} : vector<2x10x10x32xf32> to vector<2x8x8x32xf32>
    %71 = vector.shape_cast %70 : vector<2x8x8x32xf32> to vector<128x32xf32>
    %c0_55 = arith.constant 0 : index
    %c32_56 = arith.constant 32 : index
    %72 = vector.load %arg11[%c0_55, %c32_56] : memref<128x288xf32, #tpu.memory_space<vmem>>, vector<128x32xf32>
    tpu.vector_store %arg11[%c0_55, %c32_56], %71 {strides = array<i32>} : memref<128x288xf32, #tpu.memory_space<vmem>>, vector<128x32xf32>,
    %73 = vector.extract_strided_slice %66 {offsets = [0, 0, 2, 0], sizes = [2, 8, 8, 32], strides = [1, 1, 1, 1]} : vector<2x10x10x32xf32> to vector<2x8x8x32xf32>
    %74 = vector.shape_cast %73 : vector<2x8x8x32xf32> to vector<128x32xf32>
    %c0_57 = arith.constant 0 : index
    %c64_58 = arith.constant 64 : index
    %75 = vector.load %arg11[%c0_57, %c64_58] : memref<128x288xf32, #tpu.memory_space<vmem>>, vector<128x32xf32>
    tpu.vector_store %arg11[%c0_57, %c64_58], %74 {strides = array<i32>} : memref<128x288xf32, #tpu.memory_space<vmem>>, vector<128x32xf32>,
    %76 = vector.extract_strided_slice %66 {offsets = [0, 1, 0, 0], sizes = [2, 8, 8, 32], strides = [1, 1, 1, 1]} : vector<2x10x10x32xf32> to vector<2x8x8x32xf32>
    %77 = vector.shape_cast %76 : vector<2x8x8x32xf32> to vector<128x32xf32>
    %c0_59 = arith.constant 0 : index
    %c96_60 = arith.constant 96 : index
    %78 = vector.load %arg11[%c0_59, %c96_60] : memref<128x288xf32, #tpu.memory_space<vmem>>, vector<128x32xf32>
    tpu.vector_store %arg11[%c0_59, %c96_60], %77 {strides = array<i32>} : memref<128x288xf32, #tpu.memory_space<vmem>>, vector<128x32xf32>,
    %79 = vector.extract_strided_slice %66 {offsets = [0, 1, 1, 0], sizes = [2, 8, 8, 32], strides = [1, 1, 1, 1]} : vector<2x10x10x32xf32> to vector<2x8x8x32xf32>
    %80 = vector.shape_cast %79 : vector<2x8x8x32xf32> to vector<128x32xf32>
    %c0_61 = arith.constant 0 : index
    %c128_62 = arith.constant 128 : index
    %81 = vector.load %arg11[%c0_61, %c128_62] : memref<128x288xf32, #tpu.memory_space<vmem>>, vector<128x32xf32>
    tpu.vector_store %arg11[%c0_61, %c128_62], %80 {strides = array<i32>} : memref<128x288xf32, #tpu.memory_space<vmem>>, vector<128x32xf32>,
    %82 = vector.extract_strided_slice %66 {offsets = [0, 1, 2, 0], sizes = [2, 8, 8, 32], strides = [1, 1, 1, 1]} : vector<2x10x10x32xf32> to vector<2x8x8x32xf32>
    %83 = vector.shape_cast %82 : vector<2x8x8x32xf32> to vector<128x32xf32>
    %c0_63 = arith.constant 0 : index
    %c160_64 = arith.constant 160 : index
    %84 = vector.load %arg11[%c0_63, %c160_64] : memref<128x288xf32, #tpu.memory_space<vmem>>, vector<128x32xf32>
    tpu.vector_store %arg11[%c0_63, %c160_64], %83 {strides = array<i32>} : memref<128x288xf32, #tpu.memory_space<vmem>>, vector<128x32xf32>,
    %85 = vector.extract_strided_slice %66 {offsets = [0, 2, 0, 0], sizes = [2, 8, 8, 32], strides = [1, 1, 1, 1]} : vector<2x10x10x32xf32> to vector<2x8x8x32xf32>
    %86 = vector.shape_cast %85 : vector<2x8x8x32xf32> to vector<128x32xf32>
    %c0_65 = arith.constant 0 : index
    %c192_66 = arith.constant 192 : index
    %87 = vector.load %arg11[%c0_65, %c192_66] : memref<128x288xf32, #tpu.memory_space<vmem>>, vector<128x32xf32>
    tpu.vector_store %arg11[%c0_65, %c192_66], %86 {strides = array<i32>} : memref<128x288xf32, #tpu.memory_space<vmem>>, vector<128x32xf32>,
    %88 = vector.extract_strided_slice %66 {offsets = [0, 2, 1, 0], sizes = [2, 8, 8, 32], strides = [1, 1, 1, 1]} : vector<2x10x10x32xf32> to vector<2x8x8x32xf32>
    %89 = vector.shape_cast %88 : vector<2x8x8x32xf32> to vector<128x32xf32>
    %c0_67 = arith.constant 0 : index
    %c224_68 = arith.constant 224 : index
    %90 = vector.load %arg11[%c0_67, %c224_68] : memref<128x288xf32, #tpu.memory_space<vmem>>, vector<128x32xf32>
    tpu.vector_store %arg11[%c0_67, %c224_68], %89 {strides = array<i32>} : memref<128x288xf32, #tpu.memory_space<vmem>>, vector<128x32xf32>,
    %91 = vector.extract_strided_slice %66 {offsets = [0, 2, 2, 0], sizes = [2, 8, 8, 32], strides = [1, 1, 1, 1]} : vector<2x10x10x32xf32> to vector<2x8x8x32xf32>
    %92 = vector.shape_cast %91 : vector<2x8x8x32xf32> to vector<128x32xf32>
    %c0_69 = arith.constant 0 : index
    %c256_70 = arith.constant 256 : index
    %93 = vector.load %arg11[%c0_69, %c256_70] : memref<128x288xf32, #tpu.memory_space<vmem>>, vector<128x32xf32>
    tpu.vector_store %arg11[%c0_69, %c256_70], %92 {strides = array<i32>} : memref<128x288xf32, #tpu.memory_space<vmem>>, vector<128x32xf32>,
    %c0_71 = arith.constant 0 : index
    %c0_72 = arith.constant 0 : index
    %94 = vector.load %arg11[%c0_71, %c0_72] : memref<128x288xf32, #tpu.memory_space<vmem>>, vector<128x288xf32>
    %c0_73 = arith.constant 0 : index
    %c0_74 = arith.constant 0 : index
    %95 = vector.load %arg5[%c0_73, %c0_74] : memref<288x32xf32, #tpu.memory_space<vmem>>, vector<288x32xf32>
    %cst_75 = arith.constant dense<0.000000e+00> : vector<128x32xf32>
    %96 = tpu.matmul %94, %95, %cst_75 {dimension_numbers = #tpu.dot_dimension_numbers<[1], [0], [0], [1], [0, 0, 1, 1], [], []>} : vector<128x288xf32>, vector<288x32xf32>, vector<128x32xf32> -> vector<128x32xf32>
    %c0_76 = arith.constant 0 : index
    %c0_77 = arith.constant 0 : index
    %97 = vector.load %arg6[%c0_76, %c0_77] : memref<1x32xf32, #tpu.memory_space<vmem>>, vector<1x32xf32>
    %c0_78 = arith.constant 0 : index
    %c0_79 = arith.constant 0 : index
    %98 = vector.load %arg7[%c0_78, %c0_79] : memref<1x32xf32, #tpu.memory_space<vmem>>, vector<1x32xf32>
    %cst_80 = arith.constant dense<0.000000e+00> : vector<32xf32>
    %99 = vector.multi_reduction <add>, %96, %cst_80 [0] : vector<128x32xf32> to vector<32xf32>
    %100 = vector.shape_cast %99 : vector<32xf32> to vector<1x32xf32>
    %cst_81 = arith.constant 7.812500e-03 : f32
    %101 = vector.broadcast %cst_81 : f32 to vector<1x32xf32>
    %102 = arith.mulf %100, %101 : vector<1x32xf32>
    %103 = arith.mulf %96, %96 : vector<128x32xf32>
    %cst_82 = arith.constant dense<0.000000e+00> : vector<32xf32>
    %104 = vector.multi_reduction <add>, %103, %cst_82 [0] : vector<128x32xf32> to vector<32xf32>
    %105 = vector.shape_cast %104 : vector<32xf32> to vector<1x32xf32>
    %cst_83 = arith.constant 7.812500e-03 : f32
    %106 = vector.broadcast %cst_83 : f32 to vector<1x32xf32>
    %107 = arith.mulf %105, %106 : vector<1x32xf32>
    %108 = arith.mulf %102, %102 : vector<1x32xf32>
    %109 = arith.subf %107, %108 : vector<1x32xf32>
    %cst_84 = arith.constant 0.000000e+00 : f32
    %110 = vector.broadcast %cst_84 : f32 to vector<1x32xf32>
    %111 = arith.maximumf %109, %110 : vector<1x32xf32>
    %cst_85 = arith.constant 9.99999974E-6 : f32
    %112 = vector.broadcast %cst_85 : f32 to vector<1x32xf32>
    %113 = arith.addf %111, %112 : vector<1x32xf32>
    %114 = math.rsqrt %113 : vector<1x32xf32>
    %115 = arith.mulf %114, %97 : vector<1x32xf32>
    %116 = vector.broadcast %102 : vector<1x32xf32> to vector<128x32xf32>
    %117 = arith.subf %96, %116 : vector<128x32xf32>
    %118 = vector.broadcast %115 : vector<1x32xf32> to vector<128x32xf32>
    %119 = arith.mulf %117, %118 : vector<128x32xf32>
    %120 = vector.broadcast %98 : vector<1x32xf32> to vector<128x32xf32>
    %121 = arith.addf %119, %120 : vector<128x32xf32>
    %122 = vector.shape_cast %0 : vector<2x8x8x32xf32> to vector<128x32xf32>
    %123 = arith.addf %121, %122 : vector<128x32xf32>
    %cst_86 = arith.constant 0.000000e+00 : f32
    %124 = vector.broadcast %cst_86 : f32 to vector<128x32xf32>
    %125 = arith.maximumf %123, %124 : vector<128x32xf32>
    %126 = vector.shape_cast %125 : vector<128x32xf32> to vector<2x8x8x32xf32>
    %c0_87 = arith.constant 0 : index
    %c0_88 = arith.constant 0 : index
    %c0_89 = arith.constant 0 : index
    %c0_90 = arith.constant 0 : index
    %127 = vector.load %arg8[%c0_87, %c0_88, %c0_89, %c0_90] : memref<2x8x8x32xf32, #tpu.memory_space<vmem>>, vector<2x8x8x32xf32>
    tpu.vector_store %arg8[%c0_87, %c0_88, %c0_89, %c0_90], %126 {strides = array<i32>} : memref<2x8x8x32xf32, #tpu.memory_space<vmem>>, vector<2x8x8x32xf32>,
    return
  }
  func.func @transform_0(%arg0: i32) -> (i32, i32, i32, i32) {
    %c0_i32 = arith.constant 0 : i32
    %c0_i32_0 = arith.constant 0 : i32
    %c0_i32_1 = arith.constant 0 : i32
    %c0_i32_2 = arith.constant 0 : i32
    %c0_i32_3 = arith.constant 0 : i32
    return %c0_i32, %c0_i32_0, %c0_i32_1, %c0_i32_2 : i32, i32, i32, i32
  }
  func.func @transform_1(%arg0: i32) -> (i32, i32) {
    %c0_i32 = arith.constant 0 : i32
    %c0_i32_0 = arith.constant 0 : i32
    %c0_i32_1 = arith.constant 0 : i32
    return %c0_i32, %c0_i32_0 : i32, i32
  }
  func.func @transform_2(%arg0: i32) -> (i32, i32) {
    %c0_i32 = arith.constant 0 : i32
    %c0_i32_0 = arith.constant 0 : i32
    %c0_i32_1 = arith.constant 0 : i32
    return %c0_i32, %c0_i32_0 : i32, i32
  }
  func.func @transform_3(%arg0: i32) -> (i32, i32) {
    %c0_i32 = arith.constant 0 : i32
    %c0_i32_0 = arith.constant 0 : i32
    %c0_i32_1 = arith.constant 0 : i32
    return %c0_i32, %c0_i32_0 : i32, i32
  }
  func.func @transform_4(%arg0: i32) -> (i32, i32) {
    %c0_i32 = arith.constant 0 : i32
    %c0_i32_0 = arith.constant 0 : i32
    %c0_i32_1 = arith.constant 0 : i32
    return %c0_i32, %c0_i32_0 : i32, i32
  }
  func.func @transform_5(%arg0: i32) -> (i32, i32) {
    %c0_i32 = arith.constant 0 : i32
    %c0_i32_0 = arith.constant 0 : i32
    %c0_i32_1 = arith.constant 0 : i32
    return %c0_i32, %c0_i32_0 : i32, i32
  }
  func.func @transform_6(%arg0: i32) -> (i32, i32) {
    %c0_i32 = arith.constant 0 : i32
    %c0_i32_0 = arith.constant 0 : i32
    %c0_i32_1 = arith.constant 0 : i32
    return %c0_i32, %c0_i32_0 : i32, i32
  }
  func.func @transform_7(%arg0: i32) -> (i32, i32, i32, i32) {
    %c0_i32 = arith.constant 0 : i32
    %c0_i32_0 = arith.constant 0 : i32
    %c0_i32_1 = arith.constant 0 : i32
    %c0_i32_2 = arith.constant 0 : i32
    %c0_i32_3 = arith.constant 0 : i32
    return %c0_i32, %c0_i32_0, %c0_i32_1, %c0_i32_2 : i32, i32, i32, i32
  }
}

</mosaic_0001>

<bundles_post_ra>
// kernel: tpu_custom_call.1
= control target key start
LH: loop header
LB: loop body
LE: loop exit
PB: predicated region body
PF: predicated region fallthrough
CT: control target
= control target key end

     0   :  { %vm43_vm0 = vcmask 261120   ;;  %vm45_vm1 = vcmask 254976   ;;  %v2645_v1 = vmov 0.0   ;;  %s4886_s0 = inlined_call_operand.vmem [shape: f32[2,8,8,32], index: 0, kind: input, shape index: {}]   ;;  %s4887_s1 = inlined_call_operand.vmem [shape: f32[288,32], index: 1, kind: input, shape index: {}]   ;;  %s4888_s2 = inlined_call_operand.vmem [shape: f32[1,32], index: 2, kind: input, shape index: {}]   ;;  %s4889_s3 = inlined_call_operand.vmem [shape: f32[1,32], index: 3, kind: input, shape index: {}]   ;;  %s4890_s4 = inlined_call_operand.vmem [shape: f32[288,32], index: 4, kind: input, shape index: {}]   ;;  %s4891_s5 = inlined_call_operand.vmem [shape: f32[1,32], index: 5, kind: input, shape index: {}]   ;;  %s4892_s6 = inlined_call_operand.vmem [shape: f32[1,32], index: 6, kind: input, shape index: {}]   ;;  %s4893_s7 = inlined_call_operand.hbm [shape: f32[2,8,8,32], index: 7, kind: output, shape index: {}]  }
   0x1   :  { %v2695_v0 = vld [vmem:[%s4886_s0 + $0x40] sm:$0xff]  ;;  %67 = vst.msk [vmem:[#allocation2 + $0xb0] sm:$0xff] %vm43_vm0, %v2645_v1 }
   0x2   :  { %4904 = vst [vmem:[#allocation8_spill] sm:$0xff] %v2695_v0 }
   0x3   :  { %68 = vst.msk [vmem:[#allocation2 + $0xb8] sm:$0x3] %vm45_vm1, %v2645_v1 }
   0x4   :  { %12 = vsyncpa [#allocation6], 0  ;;  %94 = vst.msk [vmem:[#allocation2 + $0xb1] sm:$0xff] %vm43_vm0, %v2695_v0  ;;  %s2646_s26 = smov 96   ;;  %vm190_vm2 = vcmask 1046528   ;;  %s2647_s27 = smov 32  }
   0x5   :  { %44 = vst.msk [vmem:[#allocation2] sm:$0xff] %vm43_vm0, %v2645_v1  ;;  %vm304_vm3 = vcmask 1045504   ;;  %s2648_s28 = smov 64   ;;  %v2885_v15 = vld [vmem:[%s4886_s0 + $0x48] sm:$0xff]  ;;  %v2892_v16 = vld [vmem:[%s4886_s0 + $0x50] sm:$0xff]  ;;  %v2899_v17 = vld [vmem:[%s4886_s0 + $0x58] sm:$0xff] }
   0x6   :  { %46 = vst.msk [vmem:[#allocation2 + $0x8] sm:$0x3] %vm45_vm1, %v2645_v1  ;;  %v2906_v18 = vld [vmem:[%s4886_s0 + $0x60] sm:$0xff]  ;;  %v2913_v19 = vld [vmem:[%s4886_s0 + $0x68] sm:$0xff]  ;;  %v3014_v62 = vld [vmem:[%s4886_s0 + $0x70] sm:$0xff]  ;;  %vm287_vm4 = vcmask 523520  }
   0x7   :  { %47 = vst.msk [vmem:[#allocation2 + $0x10] sm:$0xff] %vm43_vm0, %v2645_v1  ;;  %vm401_vm5 = vcmask 785920   ;;  %vm468_vm6 = vcmask 1048320   ;;  %s2538_s10 = sshll.u32 %s4893_s7, 4  ;;  %s2650_s11 = smov 128   ;;  %s2539_s10 = int_to_ptr.hbm [resolvable:$true] %s2538_s10 }
   0x8   :  { %48 = vst.msk [vmem:[#allocation2 + $0x18] sm:$0x3] %vm45_vm1, %v2645_v1  ;;  %s2651_s12 = smov 8  }
   0x9   :  { %49 = vst.msk [vmem:[#allocation2 + $0x20] sm:$0xff] %vm43_vm0, %v2645_v1 }
   0xa   :  { %50 = vst.msk [vmem:[#allocation2 + $0x28] sm:$0x3] %vm45_vm1, %v2645_v1 }
   0xb   :  { %v2715_v2 = vld [vmem:[#allocation2 + $0xb0] sm:$0xff]  ;;  %51 = vst.msk [vmem:[#allocation2 + $0x30] sm:$0xff] %vm43_vm0, %v2645_v1  ;;  %v2719_v3 = vld [vmem:[#allocation2 + $0xb8] sm:$0x3] }
   0xc   :  { %436 = vrot.lane.b32.xlu1 %v2715_v2, %s2646_s26  ;;  %52 = vst.msk [vmem:[#allocation2 + $0x38] sm:$0x3] %vm45_vm1, %v2645_v1  ;;  %v218_v4 = vrot.slane %v2715_v2, 1  ;;  %v219_v5 = vrot.slane %v2719_v3, 1  ;;  %v332_v22 = vrot.slane %v2715_v2, 2  ;;  %v333_v23 = vrot.slane %v2719_v3, 2 }
   0xd   :  { %53 = vst.msk [vmem:[#allocation2 + $0x40] sm:$0xff] %vm43_vm0, %v2645_v1  ;;  %v3044_v3 = vld [vmem:[%s4886_s0 + $0x10] sm:$0xff] }
   0xe   :  { %54 = vst.msk [vmem:[#allocation2 + $0x48] sm:$0x3] %vm45_vm1, %v2645_v1  ;;  %v2738_v6 = vsel %vm190_vm2, %v218_v4, %v219_v5  ;;  %v2971_v48 = vsel %vm304_vm3, %v332_v22, %v333_v23 }
   0xf   :  { %55 = vst.msk [vmem:[#allocation2 + $0x50] sm:$0xff] %vm43_vm0, %v2645_v1 }
  0x10   :  { %56 = vst.msk [vmem:[#allocation2 + $0x58] sm:$0x3] %vm45_vm1, %v2645_v1 }
  0x11   :  { %57 = vst.msk [vmem:[#allocation2 + $0x60] sm:$0xff] %vm43_vm0, %v2645_v1 }
  0x12   :  { %58 = vst.msk [vmem:[#allocation2 + $0x68] sm:$0x3] %vm45_vm1, %v2645_v1 }
  0x13   :  { %59 = vst.msk [vmem:[#allocation2 + $0x70] sm:$0xff] %vm43_vm0, %v2645_v1 }
  0x14   :  { %60 = vst.msk [vmem:[#allocation2 + $0x78] sm:$0x3] %vm45_vm1, %v2645_v1  ;;  %257 = vrot.lane.b32.xlu1 %v2738_v6, %s2647_s27 }
  0x15   :  { %61 = vst.msk [vmem:[#allocation2 + $0x80] sm:$0xff] %vm43_vm0, %v2645_v1 }
  0x16   :  { %62 = vst.msk [vmem:[#allocation2 + $0x88] sm:$0x3] %vm45_vm1, %v2645_v1 }
  0x17   :  { %63 = vst.msk [vmem:[#allocation2 + $0x90] sm:$0xff] %vm43_vm0, %v2645_v1 }
  0x18   :  { %64 = vst.msk [vmem:[#allocation2 + $0x98] sm:$0x3] %vm45_vm1, %v2645_v1 }
  0x19   :  { %65 = vst.msk [vmem:[#allocation2 + $0xa0] sm:$0xff] %vm43_vm0, %v2645_v1 }
  0x1a   :  { %66 = vst.msk [vmem:[#allocation2 + $0xa8] sm:$0x3] %vm45_vm1, %v2645_v1 }
  0x1b   :  { %69 = vst.msk [vmem:[#allocation2 + $0xc0] sm:$0xff] %vm43_vm0, %v2645_v1 }
  0x1c   :  { %70 = vst.msk [vmem:[#allocation2 + $0xc8] sm:$0x3] %vm45_vm1, %v2645_v1 }
  0x1d   :  { %71 = vst.msk [vmem:[#allocation2 + $0xd0] sm:$0xff] %vm43_vm0, %v2645_v1 }
  0x1e   :  { %72 = vst.msk [vmem:[#allocation2 + $0xd8] sm:$0x3] %vm45_vm1, %v2645_v1 }
  0x1f   :  { %73 = vst.msk [vmem:[#allocation2 + $0xe0] sm:$0xff] %vm43_vm0, %v2645_v1 }
  0x20   :  { %74 = vst.msk [vmem:[#allocation2 + $0xe8] sm:$0x3] %vm45_vm1, %v2645_v1  ;;  %v2772_v7 = vld [vmem:[#allocation2 + $0xa0] sm:$0xff] }
  0x21   :  { %75 = vst.msk [vmem:[#allocation2 + $0xf0] sm:$0xff] %vm43_vm0, %v2645_v1  ;;  %v123_v8 = vld [vmem:[#allocation2 + $0xa8] sm:$0x3]  ;;  %v215_v9 = vrot.slane %v2772_v7, 1  ;;  %v329_v12 = vrot.slane %v2772_v7, 2 }
  0x22   :  { %76 = vst.msk [vmem:[#allocation2 + $0xf8] sm:$0x3] %vm45_vm1, %v2645_v1  ;;  %v216_v10 = vrot.slane %v123_v8, 1  ;;  %v330_v13 = vrot.slane %v123_v8, 2 }
  0x23   :  { %77 = vst.msk [vmem:[#allocation2 + $0x100] sm:$0xff] %vm43_vm0, %v2645_v1 }
  0x24   :  { %78 = vst.msk [vmem:[#allocation2 + $0x108] sm:$0x3] %vm45_vm1, %v2645_v1  ;;  %v217_v11 = vsel %vm190_vm2, %v215_v9, %v216_v10  ;;  %v331_v14 = vsel %vm304_vm3, %v329_v12, %v330_v13 }
  0x25   :  { %79 = vst.msk [vmem:[#allocation2 + $0x110] sm:$0xff] %vm43_vm0, %v2645_v1  ;;  %255 = vrot.lane.b32.xlu0 %v217_v11, %s2647_s27 }
  0x26   :  { %80 = vst.msk [vmem:[#allocation2 + $0x118] sm:$0x3] %vm45_vm1, %v2645_v1 }
  0x27   :  { %81 = vst.msk [vmem:[#allocation2 + $0x120] sm:$0xff] %vm43_vm0, %v2645_v1 }
  0x28   :  { %82 = vst.msk [vmem:[#allocation2 + $0x128] sm:$0x3] %vm45_vm1, %v2645_v1 }
  0x29   :  { %83 = vst.msk [vmem:[#allocation2 + $0x130] sm:$0xff] %vm43_vm0, %v2645_v1 }
  0x2a   :  { %84 = vst.msk [vmem:[#allocation2 + $0x138] sm:$0x3] %vm45_vm1, %v2645_v1 }
  0x2b   :  { %151 = vst.msk [vmem:[#allocation4 + $0xd8] sm:$0xff] %vm43_vm0, %v2715_v2  ;;  %v3031_v2 = vld [vmem:[%s4886_s0] sm:$0xff] }
  0x2c   :  { %1275 = vst.msk [vmem:[#allocation3] sm:$0xff] %vm43_vm0, %v2645_v1 }
  0x2d   :  { %1276 = vst.msk [vmem:[#allocation3 + $0x8] sm:$0x3] %vm45_vm1, %v2645_v1  ;;  %369 = vrot.lane.b32.xlu0 %v331_v14, %s2648_s28 }
  0x2e   :  { %1277 = vst.msk [vmem:[#allocation3 + $0x10] sm:$0xff] %vm43_vm0, %v2645_v1 }
  0x2f   :  { %1278 = vst.msk [vmem:[#allocation3 + $0x18] sm:$0x3] %vm45_vm1, %v2645_v1 }
  0x30   :  { %1279 = vst.msk [vmem:[#allocation3 + $0x20] sm:$0xff] %vm43_vm0, %v2645_v1 }
  0x31   :  { %1280 = vst.msk [vmem:[#allocation3 + $0x28] sm:$0x3] %vm45_vm1, %v2645_v1 }
  0x32   :  { %1281 = vst.msk [vmem:[#allocation3 + $0x30] sm:$0xff] %vm43_vm0, %v2645_v1 }
  0x33   :  { %1282 = vst.msk [vmem:[#allocation3 + $0x38] sm:$0x3] %vm45_vm1, %v2645_v1 }
  0x34   :  { %1283 = vst.msk [vmem:[#allocation3 + $0x40] sm:$0xff] %vm43_vm0, %v2645_v1 }
  0x35   :  { %1284 = vst.msk [vmem:[#allocation3 + $0x48] sm:$0x3] %vm45_vm1, %v2645_v1 }
  0x36   :  { %1285 = vst.msk [vmem:[#allocation3 + $0x50] sm:$0xff] %vm43_vm0, %v2645_v1 }
  0x37   :  { %1286 = vst.msk [vmem:[#allocation3 + $0x58] sm:$0x3] %vm45_vm1, %v2645_v1 }
  0x38   :  { %1287 = vst.msk [vmem:[#allocation3 + $0x60] sm:$0xff] %vm43_vm0, %v2645_v1 }
  0x39   :  { %1288 = vst.msk [vmem:[#allocation3 + $0x68] sm:$0x3] %vm45_vm1, %v2645_v1 }
  0x3a   :  { %1289 = vst.msk [vmem:[#allocation3 + $0x70] sm:$0xff] %vm43_vm0, %v2645_v1 }
  0x3b   :  { %1290 = vst.msk [vmem:[#allocation3 + $0x78] sm:$0x3] %vm45_vm1, %v2645_v1 }
  0x3c   :  { %1291 = vst.msk [vmem:[#allocation3 + $0x80] sm:$0xff] %vm43_vm0, %v2645_v1 }
  0x3d   :  { %1292 = vst.msk [vmem:[#allocation3 + $0x88] sm:$0x3] %vm45_vm1, %v2645_v1 }
  0x3e   :  { %1293 = vst.msk [vmem:[#allocation3 + $0x90] sm:$0xff] %vm43_vm0, %v2645_v1 }
  0x3f   :  { %1294 = vst.msk [vmem:[#allocation3 + $0x98] sm:$0x3] %vm45_vm1, %v2645_v1 }
  0x40   :  { %1295 = vst.msk [vmem:[#allocation3 + $0xa0] sm:$0xff] %vm43_vm0, %v2645_v1 }
  0x41   :  { %1296 = vst.msk [vmem:[#allocation3 + $0xa8] sm:$0x3] %vm45_vm1, %v2645_v1 }
  0x42   :  { %1297 = vst.msk [vmem:[#allocation3 + $0xb0] sm:$0xff] %vm43_vm0, %v2645_v1 }
  0x43   :  { %1298 = vst.msk [vmem:[#allocation3 + $0xb8] sm:$0x3] %vm45_vm1, %v2645_v1 }
  0x44   :  { %1299 = vst.msk [vmem:[#allocation3 + $0xc0] sm:$0xff] %vm43_vm0, %v2645_v1 }
  0x45   :  { %1300 = vst.msk [vmem:[#allocation3 + $0xc8] sm:$0x3] %vm45_vm1, %v2645_v1 }
  0x46   :  { %1301 = vst.msk [vmem:[#allocation3 + $0xd0] sm:$0xff] %vm43_vm0, %v2645_v1 }
  0x47   :  { %1302 = vst.msk [vmem:[#allocation3 + $0xd8] sm:$0x3] %vm45_vm1, %v2645_v1 }
  0x48   :  { %1303 = vst.msk [vmem:[#allocation3 + $0xe0] sm:$0xff] %vm43_vm0, %v2645_v1 }
  0x49   :  { %1304 = vst.msk [vmem:[#allocation3 + $0xe8] sm:$0x3] %vm45_vm1, %v2645_v1 }
  0x4a   :  { %1305 = vst.msk [vmem:[#allocation3 + $0xf0] sm:$0xff] %vm43_vm0, %v2645_v1 }
  0x4b   :  { %1306 = vst.msk [vmem:[#allocation3 + $0xf8] sm:$0x3] %vm45_vm1, %v2645_v1 }
  0x4c   :  { %1307 = vst.msk [vmem:[#allocation3 + $0x100] sm:$0xff] %vm43_vm0, %v2645_v1 }
  0x4d   :  { %1308 = vst.msk [vmem:[#allocation3 + $0x108] sm:$0x3] %vm45_vm1, %v2645_v1 }
  0x4e   :  { %1309 = vst.msk [vmem:[#allocation3 + $0x110] sm:$0xff] %vm43_vm0, %v2645_v1 }
  0x4f   :  { %1310 = vst.msk [vmem:[#allocation3 + $0x118] sm:$0x3] %vm45_vm1, %v2645_v1 }
  0x50   :  { %1311 = vst.msk [vmem:[#allocation3 + $0x120] sm:$0xff] %vm43_vm0, %v2645_v1 }
  0x51   :  { %1312 = vst.msk [vmem:[#allocation3 + $0x128] sm:$0x3] %vm45_vm1, %v2645_v1 }
  0x52   :  { %1313 = vst.msk [vmem:[#allocation3 + $0x130] sm:$0xff] %vm43_vm0, %v2645_v1 }
  0x53   :  { %1314 = vst.msk [vmem:[#allocation3 + $0x138] sm:$0x3] %vm45_vm1, %v2645_v1  ;;  %v3024_v1 = vld [vmem:[%s4886_s0 + $0x8] sm:$0xff] }
  0x54   :  { %4905 = vst [vmem:[#allocation9_spill] sm:$0xff] %v2885_v15 }
  0x55   :  { %150 = vst.msk [vmem:[#allocation4 + $0xc0] sm:$0xff] %vm43_vm0, %v2772_v7 }
  0x56   :  { %4906 = vst [vmem:[#allocation10_spill] sm:$0xff] %v2892_v16 }
  0x57   :  { %517 = vst.msk [vmem:[#allocation4 + $0xc8] sm:$0xff] %vm43_vm0, %v2738_v6 }
  0x58   :  { %4907 = vst [vmem:[#allocation11_spill] sm:$0xff] %v2899_v17 }
  0x59   :  { %95 = vst.msk [vmem:[#allocation2 + $0xc1] sm:$0xff] %vm43_vm0, %v2885_v15  ;;  %v823_v15 = vld [vmem:[%s4887_s1 + $0x20] sm:$0xff] }
  0x5a   :  { %4908 = vst [vmem:[#allocation12_spill] sm:$0xff] %v2906_v18 }
  0x5b   :  { %96 = vst.msk [vmem:[#allocation2 + $0xd1] sm:$0xff] %vm43_vm0, %v2892_v16 }
  0x5c   :  { %4909 = vst [vmem:[#allocation13_spill] sm:$0xff] %v2913_v19 }
  0x5d   :  { %97 = vst.msk [vmem:[#allocation2 + $0xe1] sm:$0xff] %vm43_vm0, %v2899_v17 }
  0x5e   :  { %98 = vst.msk [vmem:[#allocation2 + $0xf1] sm:$0xff] %vm43_vm0, %v2906_v18  ;;  %v827_v18 = vld [vmem:[%s4887_s1 + $0x40] sm:$0xff] }
  0x5f   :  { %99 = vst.msk [vmem:[#allocation2 + $0x101] sm:$0xff] %vm43_vm0, %v2913_v19 }
  0x60   :  { %v2921_v20 = vld [vmem:[#allocation2 + $0xc0] sm:$0xff]  ;;  %v127_v21 = vld [vmem:[#allocation2 + $0xc8] sm:$0x3]  ;;  %4910 = vst [vmem:[#allocation14_spill] sm:$0xff] %v3014_v62 }
  0x61   :  { %v335_v24 = vrot.slane %v2921_v20, 2  ;;  %v336_v25 = vrot.slane %v127_v21, 2  ;;  %152 = vst.msk [vmem:[#allocation4 + $0xf0] sm:$0xff] %vm43_vm0, %v2921_v20  ;;  %v221_v26 = vrot.slane %v2921_v20, 1  ;;  %v222_v27 = vrot.slane %v127_v21, 1  ;;  %438 = vrot.lane.b32.xlu2 %v2921_v20, %s2646_s26 }
  0x62   :  { %v2929_v28 = vld [vmem:[#allocation2 + $0xd0] sm:$0xff]  ;;  %v129_v29 = vld [vmem:[#allocation2 + $0xd8] sm:$0x3]  ;;  %100 = vst.msk [vmem:[#allocation2 + $0x111] sm:$0xff] %vm43_vm0, %v3014_v62 }
  0x63   :  { %v338_v30 = vrot.slane %v2929_v28, 2  ;;  %153 = vst.msk [vmem:[#allocation4 + $0x108] sm:$0xff] %vm43_vm0, %v2929_v28  ;;  %v224_v31 = vrot.slane %v2929_v28, 1  ;;  %v2940_v33 = vsel %vm304_vm3, %v335_v24, %v336_v25  ;;  %v2943_v34 = vsel %vm190_vm2, %v221_v26, %v222_v27  ;;  %v3088_v24 = vld [vmem:[%s4886_s0 + $0x18] sm:$0xff] }
  0x64   :  { %v2937_v32 = vld [vmem:[#allocation2 + $0xe0] sm:$0xff]  ;;  %v339_v35 = vrot.slane %v129_v29, 2  ;;  %v225_v36 = vrot.slane %v129_v29, 1  ;;  %v131_v37 = vld [vmem:[#allocation2 + $0xe8] sm:$0x3]  ;;  %763 = vst.msk [vmem:[#allocation4 + $0xd0] sm:$0xff] %vm43_vm0, %v2940_v33  ;;  %373 = vrot.lane.b32.xlu1 %v2940_v33, %s2648_s28  ;;  %259 = vrot.lane.b32.xlu0 %v2943_v34, %s2647_s27 }
  0x65   :  { %154 = vst.msk [vmem:[#allocation4 + $0x120] sm:$0xff] %vm43_vm0, %v2937_v32  ;;  %v2947_v38 = vld [vmem:[#allocation2 + $0xf0] sm:$0xff]  ;;  %v341_v39 = vrot.slane %v2937_v32, 2  ;;  %v342_v40 = vrot.slane %v131_v37, 2  ;;  %v227_v41 = vrot.slane %v2937_v32, 1  ;;  %v228_v42 = vrot.slane %v131_v37, 1 }
  0x66   :  { %518 = vst.msk [vmem:[#allocation4 + $0xe0] sm:$0xff] %vm43_vm0, %v2943_v34  ;;  %v2960_v43 = vsel %vm304_vm3, %v338_v30, %v339_v35  ;;  %v133_v44 = vld [vmem:[#allocation2 + $0xf8] sm:$0x3]  ;;  %v344_v45 = vrot.slane %v2947_v38, 2  ;;  %v2963_v46 = vld [vmem:[#allocation2 + $0x100] sm:$0xff]  ;;  %v2968_v47 = vsel %vm190_vm2, %v224_v31, %v225_v36  ;;  %v230_v52 = vrot.slane %v2947_v38, 1 }
  0x67   :  { %764 = vst.msk [vmem:[#allocation4 + $0xe8] sm:$0xff] %vm43_vm0, %v2960_v43  ;;  %v345_v49 = vrot.slane %v133_v44, 2  ;;  %v135_v50 = vld [vmem:[#allocation2 + $0x108] sm:$0x3]  ;;  %v2976_v51 = vsel %vm304_vm3, %v341_v39, %v342_v40  ;;  %v231_v53 = vrot.slane %v133_v44, 1  ;;  %v2982_v54 = vsel %vm190_vm2, %v227_v41, %v228_v42  ;;  %v3100_v26 = vld [vmem:[%s4886_s0 + $0x78] sm:$0xff] }
  0x68   :  { %519 = vst.msk [vmem:[#allocation4 + $0xf8] sm:$0xff] %vm43_vm0, %v2968_v47  ;;  %v347_v55 = vrot.slane %v2963_v46, 2  ;;  %v348_v56 = vrot.slane %v135_v50, 2  ;;  %v233_v58 = vrot.slane %v2963_v46, 1  ;;  %v234_v59 = vrot.slane %v135_v50, 1  ;;  %v3112_v31 = vld [vmem:[%s4886_s0 + $0x20] sm:$0xff] }
  0x69   :  { %765 = vst.msk [vmem:[#allocation4 + $0x100] sm:$0xff] %vm43_vm0, %v2976_v51  ;;  %371 = vrot.lane.b32.xlu2 %v2971_v48, %s2648_s28  ;;  %v2990_v57 = vsel %vm304_vm3, %v344_v45, %v345_v49  ;;  %v2998_v60 = vsel %vm190_vm2, %v230_v52, %v231_v53  ;;  %v3052_v4 = vld [vmem:[#allocation2 + $0x110] sm:$0xff]  ;;  %v137_v5 = vld [vmem:[#allocation2 + $0x118] sm:$0x3]  ;;  %v3139_v44 = vld [vmem:[%s4886_s0 + $0x28] sm:$0xff] }
  0x6a   :  { %520 = vst.msk [vmem:[#allocation4 + $0x110] sm:$0xff] %vm43_vm0, %v2982_v54  ;;  %v3007_v61 = vsel %vm304_vm3, %v347_v55, %v348_v56  ;;  %v3019_v63 = vsel %vm190_vm2, %v233_v58, %v234_v59  ;;  %v350_v6 = vrot.slane %v3052_v4, 2  ;;  %v351_v7 = vrot.slane %v137_v5, 2  ;;  %v3270_v62 = vld [vmem:[%s4886_s0 + $0x38] sm:$0xff] }
  0x6b   :  { %766 = vst.msk [vmem:[#allocation4 + $0x118] sm:$0xff] %vm43_vm0, %v2990_v57  ;;  %v236_v8 = vrot.slane %v3052_v4, 1  ;;  %v237_v9 = vrot.slane %v137_v5, 1 }
  0x6c   :  { %155 = vst.msk [vmem:[#allocation4 + $0x138] sm:$0xff] %vm43_vm0, %v2947_v38  ;;  %375 = vrot.lane.b32.xlu1 %v2960_v43, %s2648_s28  ;;  %261 = vrot.lane.b32.xlu0 %v2968_v47, %s2647_s27  ;;  %v3067_v12 = vsel %vm304_vm3, %v350_v6, %v351_v7  ;;  %v3174_v6 = vld [vmem:[%s4886_s0 + $0x30] sm:$0xff] }
  0x6d   :  { %521 = vst.msk [vmem:[#allocation4 + $0x128] sm:$0xff] %vm43_vm0, %v2998_v60  ;;  %v3074_v14 = vsel %vm190_vm2, %v236_v8, %v237_v9 }
  0x6e   :  { %767 = vst.msk [vmem:[#allocation4 + $0x130] sm:$0xff] %vm43_vm0, %v3007_v61 }
  0x6f   :  { %156 = vst.msk [vmem:[#allocation4 + $0x150] sm:$0xff] %vm43_vm0, %v2963_v46 }
  0x70   :  { %522 = vst.msk [vmem:[#allocation4 + $0x140] sm:$0xff] %vm43_vm0, %v3019_v63 }
  0x71   :  { %440 = vrot.lane.b32.xlu2 %v2929_v28, %s2646_s26  ;;  %87 = vst.msk [vmem:[#allocation2 + $0x21] sm:$0xff] %vm43_vm0, %v3024_v1 }
  0x72   :  { %86 = vst.msk [vmem:[#allocation2 + $0x11] sm:$0xff] %vm43_vm0, %v3031_v2 }
  0x73   :  { %88 = vst.msk [vmem:[#allocation2 + $0x31] sm:$0xff] %vm43_vm0, %v3044_v3 }
  0x74   :  { %377 = vrot.lane.b32.xlu1 %v2976_v51, %s2648_s28  ;;  %263 = vrot.lane.b32.xlu0 %v2982_v54, %s2647_s27  ;;  %157 = vst.msk [vmem:[#allocation4 + $0x168] sm:$0xff] %vm43_vm0, %v3052_v4 }
  0x75   :  { %768 = vst.msk [vmem:[#allocation4 + $0x148] sm:$0xff] %vm43_vm0, %v3067_v12 }
  0x76   :  { %523 = vst.msk [vmem:[#allocation4 + $0x158] sm:$0xff] %vm43_vm0, %v3074_v14 }
  0x77   :  { %89 = vst.msk [vmem:[#allocation2 + $0x41] sm:$0xff] %vm43_vm0, %v3088_v24 }
  0x78   :  { %v3058_v10 = vld [vmem:[#allocation2 + $0x20] sm:$0xff]  ;;  %v107_v13 = vld [vmem:[#allocation2 + $0x28] sm:$0x3]  ;;  %101 = vst.msk [vmem:[#allocation2 + $0x121] sm:$0xff] %vm43_vm0, %v3100_v26 }
  0x79   :  { %442 = vrot.lane.b32.xlu2 %v2937_v32, %s2646_s26  ;;  %144 = vst.msk [vmem:[#allocation4 + $0x30] sm:$0xff] %vm43_vm0, %v3058_v10  ;;  %v3064_v11 = vld [vmem:[#allocation2 + $0x10] sm:$0xff]  ;;  %v311_v21 = vrot.slane %v3058_v10, 2  ;;  %v312_v22 = vrot.slane %v107_v13, 2  ;;  %v3131_v37 = vld [vmem:[#allocation2 + $0x18] sm:$0x3] }
  0x7a   :  { %143 = vst.msk [vmem:[#allocation4 + $0x18] sm:$0xff] %vm43_vm0, %v3064_v11  ;;  %v3083_v23 = vld [vmem:[#allocation2 + $0x30] sm:$0xff]  ;;  %v109_v27 = vld [vmem:[#allocation2 + $0x38] sm:$0x3]  ;;  %v197_v45 = vrot.slane %v3058_v10, 1  ;;  %v198_v49 = vrot.slane %v107_v13, 1 }
  0x7b   :  { %145 = vst.msk [vmem:[#allocation4 + $0x48] sm:$0xff] %vm43_vm0, %v3083_v23  ;;  %v3093_v25 = vsel %vm304_vm3, %v311_v21, %v312_v22  ;;  %v314_v29 = vrot.slane %v3083_v23, 2  ;;  %v315_v30 = vrot.slane %v109_v27, 2  ;;  %v308_v50 = vrot.slane %v3064_v11, 2  ;;  %v834_v13 = vld [vmem:[%s4887_s1 + $0x78] sm:$0xff] }
  0x7c   :  { %379 = vrot.lane.b32.xlu1 %v2990_v57, %s2648_s28  ;;  %265 = vrot.lane.b32.xlu0 %v2998_v60, %s2647_s27  ;;  %755 = vst.msk [vmem:[#allocation4 + $0x10] sm:$0xff] %vm43_vm0, %v3093_v25  ;;  %v309_v52 = vrot.slane %v3131_v37, 2  ;;  %v3158_v55 = vsel %vm190_vm2, %v197_v45, %v198_v49  ;;  %v200_v8 = vrot.slane %v3083_v23, 1  ;;  %v201_v9 = vrot.slane %v109_v27, 1  ;;  %v833_v45 = vld [vmem:[%s4887_s1 + $0x70] sm:$0xff]  ;;  %v832_v49 = vld [vmem:[%s4887_s1 + $0x68] sm:$0xff] }
  0x7d   :  { %90 = vst.msk [vmem:[#allocation2 + $0x51] sm:$0xff] %vm43_vm0, %v3112_v31  ;;  %v3121_v35 = vsel %vm304_vm3, %v314_v29, %v315_v30  ;;  %2582 = vmatpush.msra.mxu1 %v834_v13  ;;  %903 = vmatpush.msra.mxu0 %v834_v13  ;;  %v831_v13 = vld [vmem:[%s4887_s1 + $0x60] sm:$0xff] }
  0x7e   :  { %v3123_v36 = vld [vmem:[#allocation2 + $0x40] sm:$0xff]  ;;  %756 = vst.msk [vmem:[#allocation4 + $0x28] sm:$0xff] %vm43_vm0, %v3121_v35  ;;  %v111_v39 = vld [vmem:[#allocation2 + $0x48] sm:$0x3]  ;;  %v3163_v56 = vsel %vm304_vm3, %v308_v50, %v309_v52  ;;  %v3198_v27 = vsel %vm190_vm2, %v200_v8, %v201_v9 }
  0x7f   :  { %146 = vst.msk [vmem:[#allocation4 + $0x60] sm:$0xff] %vm43_vm0, %v3123_v36  ;;  %v317_v41 = vrot.slane %v3123_v36, 2  ;;  %v318_v42 = vrot.slane %v111_v39, 2  ;;  %v3193_v22 = vld [vmem:[#allocation2 + $0x120] sm:$0xff]  ;;  %v203_v50 = vrot.slane %v3123_v36, 1  ;;  %v204_v52 = vrot.slane %v111_v39, 1  ;;  %2583 = vmatpush.msra.mxu1 %v833_v45  ;;  %904 = vmatpush.msra.mxu0 %v833_v45 }
  0x80   :  { %4911 = vst [vmem:[#allocation15_spill] sm:$0xff] %v3139_v44  ;;  %v3250_v45 = vld [vmem:[#allocation2] sm:$0xff] }
  0x81   :  { %444 = vrot.lane.b32.xlu2 %v2947_v38, %s2646_s26  ;;  %v3151_v53 = vsel %vm304_vm3, %v317_v41, %v318_v42  ;;  %91 = vst.msk [vmem:[#allocation2 + $0x61] sm:$0xff] %vm43_vm0, %v3139_v44  ;;  %v3232_v9 = vsel %vm190_vm2, %v203_v50, %v204_v52  ;;  %2584 = vmatpush.msra.mxu1 %v832_v49  ;;  %v437_v50 = vpop.permute.xlu1 %436  ;;  %v828_v52 = vld [vmem:[%s4887_s1 + $0x48] sm:$0xff] }
  0x82   :  { %757 = vst.msk [vmem:[#allocation4 + $0x40] sm:$0xff] %vm43_vm0, %v3151_v53  ;;  %905 = vmatpush.msra.mxu0 %v832_v49  ;;  %v829_v49 = vld [vmem:[%s4887_s1 + $0x50] sm:$0xff] }
  0x83   :  { %510 = vst.msk [vmem:[#allocation4 + $0x20] sm:$0xff] %vm43_vm0, %v3158_v55  ;;  %2585 = vmatpush.msra.mxu1 %v831_v13 }
  0x84   :  { %381 = vrot.lane.b32.xlu1 %v3007_v61, %s2648_s28  ;;  %267 = vrot.lane.b32.xlu0 %v3019_v63, %s2647_s27  ;;  %v3133_v40 = vld [vmem:[#allocation2 + $0x50] sm:$0xff]  ;;  %v3167_v58 = vld [vmem:[#allocation2 + $0x58] sm:$0x3]  ;;  %4912 = vst [vmem:[#allocation16_spill] sm:$0xff] %v3174_v6 }
  0x85   :  { %147 = vst.msk [vmem:[#allocation4 + $0x78] sm:$0xff] %vm43_vm0, %v3133_v40  ;;  %v320_v59 = vrot.slane %v3133_v40, 2  ;;  %v321_v5 = vrot.slane %v3167_v58, 2  ;;  %906 = vmatpush.msra.mxu0 %v831_v13  ;;  %v207_v13 = vrot.slane %v3167_v58, 1  ;;  %v826_v58 = vld [vmem:[%s4887_s1 + $0x38] sm:$0xff] }
  0x86   :  { %92 = vst.msk [vmem:[#allocation2 + $0x71] sm:$0xff] %vm43_vm0, %v3174_v6 }
  0x87   :  { %v3191_v21 = vsel %vm304_vm3, %v320_v59, %v321_v5  ;;  %511 = vst.msk [vmem:[#allocation4 + $0x38] sm:$0xff] %vm43_vm0, %v3198_v27 }
  0x88   :  { %v3180_v7 = vld [vmem:[#allocation2 + $0x60] sm:$0xff]  ;;  %758 = vst.msk [vmem:[#allocation4 + $0x58] sm:$0xff] %vm43_vm0, %v3191_v21  ;;  %v3204_v29 = vld [vmem:[#allocation2 + $0x68] sm:$0x3] }
  0x89   :  { %446 = vrot.lane.b32.xlu2 %v2963_v46, %s2646_s26  ;;  %148 = vst.msk [vmem:[#allocation4 + $0x90] sm:$0xff] %vm43_vm0, %v3180_v7  ;;  %v323_v41 = vrot.slane %v3180_v7, 2  ;;  %v324_v42 = vrot.slane %v3204_v29, 2 }
  0x8a   :  { %512 = vst.msk [vmem:[#allocation4 + $0x50] sm:$0xff] %vm43_vm0, %v3232_v9 }
  0x8b   :  { %v3225_v5 = vsel %vm304_vm3, %v323_v41, %v324_v42  ;;  %v830_v41 = vld [vmem:[%s4887_s1 + $0x58] sm:$0xff]  ;;  %142 = vst.msk [vmem:[#allocation4] sm:$0xff] %vm43_vm0, %v3250_v45 }
  0x8c   :  { %383 = vrot.lane.b32.xlu1 %v3067_v12, %s2648_s28  ;;  %269 = vrot.lane.b32.xlu0 %v3074_v14, %s2647_s27  ;;  %759 = vst.msk [vmem:[#allocation4 + $0x70] sm:$0xff] %vm43_vm0, %v3225_v5 }
  0x8d   :  { %v3206_v30 = vld [vmem:[#allocation2 + $0x70] sm:$0xff]  ;;  %v3227_v8 = vld [vmem:[#allocation2 + $0x78] sm:$0x3]  ;;  %2586 = vmatpush.msra.mxu1 %v830_v41  ;;  %4913 = vst [vmem:[#allocation17_spill] sm:$0xff] %v3270_v62  ;;  %907 = vmatpush.msra.mxu0 %v830_v41 }
  0x8e   :  { %149 = vst.msk [vmem:[#allocation4 + $0xa8] sm:$0xff] %vm43_vm0, %v3206_v30  ;;  %v326_v59 = vrot.slane %v3206_v30, 2  ;;  %v327_v39 = vrot.slane %v3227_v8, 2  ;;  %v825_v41 = vld [vmem:[%s4887_s1 + $0x30] sm:$0xff] }
  0x8f   :  { %2587 = vmatpush.msra.mxu1 %v829_v49  ;;  %93 = vst.msk [vmem:[#allocation2 + $0x81] sm:$0xff] %vm43_vm0, %v3270_v62  ;;  %908 = vmatpush.msra.mxu0 %v829_v49  ;;  %v258_v49 = vpop.permute.xlu1 %257 }
  0x90   :  { %v3244_v42 = vsel %vm304_vm3, %v326_v59, %v327_v39  ;;  %v206_v59 = vrot.slane %v3133_v40, 1  ;;  %297 = vst.msk [vmem:[#allocation4 + $0xd8] sm:$0xff] %vm287_vm4, %v258_v49 }
  0x91   :  { %448 = vrot.lane.b32.xlu2 %v3052_v4, %s2646_s26  ;;  %760 = vst.msk [vmem:[#allocation4 + $0x88] sm:$0xff] %vm43_vm0, %v3244_v42  ;;  %2588 = vmatpush.msra.mxu1 %v828_v52 }
  0x92   :  { %v3273_v19 = vsel %vm190_vm2, %v206_v59, %v207_v13  ;;  %909 = vmatpush.msra.mxu0 %v828_v52  ;;  %v824_v59 = vld [vmem:[%s4887_s1 + $0x28] sm:$0xff]  ;;  %v209_v13 = vrot.slane %v3180_v7, 1  ;;  %v210_v52 = vrot.slane %v3204_v29, 1 }
  0x93   :  { %513 = vst.msk [vmem:[#allocation4 + $0x68] sm:$0xff] %vm43_vm0, %v3273_v19  ;;  %2589 = vmatpush.msra.mxu1 %v827_v18 }
  0x94   :  { %597 = vrot.lane.b32.xlu1 %v3058_v10, %s2648_s28  ;;  %531 = vrot.lane.b32.xlu0 %v3163_v56, %s2647_s27  ;;  %v3303_v16 = vsel %vm190_vm2, %v209_v13, %v210_v52  ;;  %v194_v52 = vrot.slane %v3064_v11, 1 }
  0x95   :  { %2590 = vmatpush.msra.mxu1 %v826_v58  ;;  %910 = vmatpush.msra.mxu0 %v827_v18  ;;  %514 = vst.msk [vmem:[#allocation4 + $0x80] sm:$0xff] %vm43_vm0, %v3303_v16  ;;  %v822_v18 = vld [vmem:[%s4887_s1 + $0x18] sm:$0xff] }
  0x96   :  { %v3300_v17 = vld [vmem:[#allocation2 + $0x80] sm:$0xff]  ;;  %v119_v0 = vld [vmem:[#allocation2 + $0x88] sm:$0x3] }
  0x97   :  { %v256_v39 = vpop.permute.xlu0 %255  ;;  %2591 = vmatpush.msra.mxu1 %v825_v41  ;;  %v525_v29 = vrot.slane %v3300_v17, 2  ;;  %v526_v49 = vrot.slane %v119_v0, 2  ;;  %911 = vmatpush.msra.mxu0 %v826_v58  ;;  %v195_v58 = vrot.slane %v3131_v37, 1  ;;  %v820_v37 = vld [vmem:[%s4887_s1 + $0x8] sm:$0xff]  ;;  %v488_v62 = vrot.slane %v119_v0, 1 }
  0x98   :  { %296 = vst.msk [vmem:[#allocation4 + $0xc0] sm:$0xff] %vm287_vm4, %v256_v39 }
  0x99   :  { %450 = vrot.lane.b32.xlu2 %v3193_v22, %s2646_s26  ;;  %2592 = vmatpush.msra.mxu1 %v824_v59  ;;  %v527_v13 = vsel %vm304_vm3, %v525_v29, %v526_v49  ;;  %v213_v29 = vrot.slane %v3227_v8, 1  ;;  %v819_v8 = vld [vmem:[%s4887_s1] sm:$0xff] }
  0x9a   :  { %761 = vst.msk [vmem:[#allocation4 + $0xa0] sm:$0xff] %vm43_vm0, %v527_v13  ;;  %912 = vmatpush.msra.mxu0 %v825_v41  ;;  %v196_v41 = vsel %vm190_vm2, %v194_v52, %v195_v58  ;;  %v103_v52 = vld [vmem:[#allocation2 + $0x8] sm:$0x3] }
  0x9b   :  { %2593 = vmatpush.msra.mxu1 %v823_v15  ;;  %509 = vst.msk [vmem:[#allocation4 + $0x8] sm:$0xff] %vm43_vm0, %v196_v41 }
  0x9c   :  { %599 = vrot.lane.b32.xlu1 %v3083_v23, %s2648_s28  ;;  %533 = vrot.lane.b32.xlu0 %v3093_v25, %s2647_s27 }
  0x9d   :  { %2594 = vmatpush.msra.mxu1 %v822_v18  ;;  %913 = vmatpush.msra.mxu0 %v824_v59 }
  0x9f   :  { %v370_v39 = vpop.permute.xlu0 %369  ;;  %914 = vmatpush.msra.mxu0 %v823_v15  ;;  %v191_v15 = vrot.slane %v3250_v45, 1 }
  0xa0   :  { %410 = vst.msk [vmem:[#allocation4 + $0xc0] sm:$0xff] %vm401_vm5, %v370_v39  ;;  %v212_v39 = vrot.slane %v3206_v30, 1 }
  0xa1   :  { %669 = vrot.lane.b32.xlu2 %v3158_v55, %s2646_s26  ;;  %477 = vst.msk [vmem:[#allocation4 + $0xc0] sm:$0xff] %vm468_vm6, %v437_v50  ;;  %v821_v50 = vld [vmem:[%s4887_s1 + $0x10] sm:$0xff]  ;;  %915 = vmatpush.msra.mxu0 %v822_v18  ;;  %v487_v18 = vrot.slane %v3300_v17, 1 }
  0xa2   :  { %2595 = vmatpush.msra.mxu1 %v821_v50  ;;  %v3337_v49 = vsel %vm190_vm2, %v212_v39, %v213_v29  ;;  %v192_v39 = vrot.slane %v103_v52, 1 }
  0xa3   :  { %515 = vst.msk [vmem:[#allocation4 + $0x98] sm:$0xff] %vm43_vm0, %v3337_v49  ;;  %916 = vmatpush.msra.mxu0 %v821_v50  ;;  %v489_v50 = vsel %vm190_vm2, %v487_v18, %v488_v62  ;;  %v120_v62 = vld [vmem:[#allocation2 + $0x90] sm:$0xff] }
  0xa4   :  { %601 = vrot.lane.b32.xlu1 %v3123_v36, %s2648_s28  ;;  %535 = vrot.lane.b32.xlu0 %v3121_v35, %s2647_s27  ;;  %v193_v29 = vsel %vm190_vm2, %v191_v15, %v192_v39  ;;  %516 = vst.msk [vmem:[#allocation4 + $0xb0] sm:$0xff] %vm43_vm0, %v489_v50 }
  0xa5   :  { %2596 = vmatpush.msra.mxu1 %v820_v37  ;;  %917 = vmatpush.msra.mxu0 %v820_v37  ;;  %v305_v37 = vrot.slane %v3250_v45, 2  ;;  %v733_v45 = vrot.slane %v120_v62, 2 }
  0xa7   :  { %2597 = vmatpush.msra.mxu1 %v819_v8  ;;  %918 = vmatpush.msra.mxu0 %v819_v8  ;;  %v306_v8 = vrot.slane %v103_v52, 2  ;;  %v121_v52 = vld [vmem:[#allocation2 + $0x98] sm:$0x3] }
  0xa8   :  { %v795_v59 = vld [vmem:[#allocation4 + $0xc0] sm:$0xff] }
  0xa9   :  { %671 = vrot.lane.b32.xlu2 %v3198_v27, %s2646_s26  ;;  %943 = vmatmul.f32.vlgmr.msra.gmra.mxu1 %v795_v59 }
  0xac   :  { %603 = vrot.lane.b32.xlu1 %v3133_v40, %s2648_s28  ;;  %537 = vrot.lane.b32.xlu0 %v3151_v53, %s2647_s27 }
  0xb1   :  { %673 = vrot.lane.b32.xlu2 %v3232_v9, %s2646_s26 }
  0xb4   :  { %605 = vrot.lane.b32.xlu1 %v3180_v7, %s2648_s28  ;;  %539 = vrot.lane.b32.xlu0 %v3191_v21, %s2647_s27 }
  0xb9   :  { %675 = vrot.lane.b32.xlu2 %v3273_v19, %s2646_s26 }
  0xbb   :  { %v439_v58 = vpop.permute.xlu2 %438 }
  0xbc   :  { %607 = vrot.lane.b32.xlu1 %v3206_v30, %s2648_s28  ;;  %541 = vrot.lane.b32.xlu0 %v3225_v5, %s2647_s27 }
  0xc1   :  { %677 = vrot.lane.b32.xlu2 %v3303_v16, %s2646_s26 }
  0xc3   :  { %v372_v59 = vpop.permute.xlu2 %371 }
  0xc4   :  { %543 = vrot.lane.b32.xlu1 %v3244_v42, %s2647_s27  ;;  %239 = vrot.lane.b32.xlu0 %v193_v29, %s2647_s27  ;;  %411 = vst.msk [vmem:[#allocation4 + $0xd8] sm:$0xff] %vm401_vm5, %v372_v59 }
  0xc5   :  { %478 = vst.msk [vmem:[#allocation4 + $0xd8] sm:$0xff] %vm468_vm6, %v439_v58  ;;  %v307_v58 = vsel %vm304_vm3, %v305_v37, %v306_v8  ;;  %v849_v37 = vld [vmem:[%s4887_s1 + $0xf0] sm:$0xff] }
  0xc9   :  { %679 = vrot.lane.b32.xlu2 %v3337_v49, %s2646_s26 }
  0xcb   :  { %v441_v15 = vpop.permute.xlu2 %440 }
  0xcc   :  { %420 = vrot.lane.b32.xlu1 %v3064_v11, %s2646_s26  ;;  %609 = vrot.lane.b32.xlu0 %v3300_v17, %s2648_s28  ;;  %v798_v0 = vld [vmem:[#allocation4 + $0xd8] sm:$0xff]  ;;  %v734_v11 = vrot.slane %v121_v52, 2 }
  0xcd   :  { %946 = vmatmul.f32.gmra.mxu1 %v798_v0 }
  0xce   :  { %v735_v18 = vsel %vm304_vm3, %v733_v45, %v734_v11  ;;  %v664_v45 = vrot.slane %v121_v52, 1  ;;  %v844_v11 = vld [vmem:[%s4887_s1 + $0xc8] sm:$0xff] }
  0xcf   :  { %762 = vst.msk [vmem:[#allocation4 + $0xb8] sm:$0xff] %vm43_vm0, %v735_v18 }
  0xd1   :  { %353 = vrot.lane.b32.xlu2 %v307_v58, %s2648_s28  ;;  %v663_v58 = vrot.slane %v120_v62, 1 }
  0xd3   :  { %v443_v39 = vpop.permute.xlu2 %442  ;;  %v665_v52 = vsel %vm190_vm2, %v663_v58, %v664_v45  ;;  %v836_v45 = vld [vmem:[%s4887_s1 + $0x88] sm:$0xff] }
  0xd4   :  { %545 = vrot.lane.b32.xlu1 %v527_v13, %s2647_s27  ;;  %241 = vrot.lane.b32.xlu0 %v196_v41, %s2647_s27  ;;  %v850_v13 = vld [vmem:[%s4887_s1 + $0xf8] sm:$0xff] }
  0xd5   :  { %968 = vmatpush.msrb.mxu1 %v850_v13  ;;  %v842_v13 = vld [vmem:[%s4887_s1 + $0xb8] sm:$0xff] }
  0xd6   :  { %v374_v29 = vpop.permute.xlu1 %373  ;;  %v260_v59 = vpop.permute.xlu0 %259 }
  0xd7   :  { %298 = vst.msk [vmem:[#allocation4 + $0xf0] sm:$0xff] %vm287_vm4, %v260_v59  ;;  %969 = vmatpush.msrb.mxu1 %v849_v37 }
  0xd8   :  { %412 = vst.msk [vmem:[#allocation4 + $0xf0] sm:$0xff] %vm401_vm5, %v374_v29  ;;  %v846_v29 = vld [vmem:[%s4887_s1 + $0xd8] sm:$0xff] }
  0xd9   :  { %479 = vst.msk [vmem:[#allocation4 + $0xf0] sm:$0xff] %vm468_vm6, %v441_v15  ;;  %681 = vrot.lane.b32.xlu2 %v489_v50, %s2646_s26  ;;  %v848_v15 = vld [vmem:[%s4887_s1 + $0xe8] sm:$0xff] }
  0xda   :  { %970 = vmatpush.msrb.mxu1 %v848_v15  ;;  %v839_v15 = vld [vmem:[%s4887_s1 + $0xa0] sm:$0xff] }
  0xdb   :  { %v445_v41 = vpop.permute.xlu2 %444 }
  0xdc   :  { %422 = vrot.lane.b32.xlu1 %v3058_v10, %s2646_s26  ;;  %611 = vrot.lane.b32.xlu0 %v120_v62, %s2648_s28  ;;  %v847_v10 = vld [vmem:[%s4887_s1 + $0xe0] sm:$0xff] }
  0xdd   :  { %971 = vmatpush.msrb.mxu1 %v847_v10 }
  0xde   :  { %v376_v8 = vpop.permute.xlu1 %375  ;;  %v262_v50 = vpop.permute.xlu0 %261 }
  0xdf   :  { %299 = vst.msk [vmem:[#allocation4 + $0x108] sm:$0xff] %vm287_vm4, %v262_v50  ;;  %972 = vmatpush.msrb.mxu1 %v846_v29 }
  0xe0   :  { %413 = vst.msk [vmem:[#allocation4 + $0x108] sm:$0xff] %vm401_vm5, %v376_v8  ;;  %v801_v0 = vld [vmem:[#allocation4 + $0xf0] sm:$0xff] }
  0xe1   :  { %480 = vst.msk [vmem:[#allocation4 + $0x108] sm:$0xff] %vm468_vm6, %v443_v39  ;;  %949 = vmatmul.f32.gmra.mxu1 %v801_v0  ;;  %355 = vrot.lane.b32.xlu2 %v3163_v56, %s2648_s28  ;;  %v845_v39 = vld [vmem:[%s4887_s1 + $0xd0] sm:$0xff] }
  0xe2   :  { %973 = vmatpush.msrb.mxu1 %v845_v39  ;;  %v841_v8 = vld [vmem:[%s4887_s1 + $0xb0] sm:$0xff] }
  0xe3   :  { %v447_v59 = vpop.permute.xlu2 %446  ;;  %v853_v39 = vld [vmem:[%s4887_s1 + $0x110] sm:$0xff] }
  0xe4   :  { %547 = vrot.lane.b32.xlu1 %v2971_v48, %s2647_s27  ;;  %243 = vrot.lane.b32.xlu0 %v3158_v55, %s2647_s27  ;;  %v843_v55 = vld [vmem:[%s4887_s1 + $0xc0] sm:$0xff] }
  0xe5   :  { %974 = vmatpush.msrb.mxu1 %v844_v11 }
  0xe6   :  { %v378_v56 = vpop.permute.xlu1 %377  ;;  %v264_v62 = vpop.permute.xlu0 %263 }
  0xe7   :  { %300 = vst.msk [vmem:[#allocation4 + $0x120] sm:$0xff] %vm287_vm4, %v264_v62  ;;  %975 = vmatpush.msrb.mxu1 %v843_v55 }
  0xe8   :  { %414 = vst.msk [vmem:[#allocation4 + $0x120] sm:$0xff] %vm401_vm5, %v378_v56  ;;  %v804_v48 = vld [vmem:[#allocation4 + $0x108] sm:$0xff] }
  0xe9   :  { %481 = vst.msk [vmem:[#allocation4 + $0x120] sm:$0xff] %vm468_vm6, %v445_v41  ;;  %952 = vmatmul.f32.gmra.mxu1 %v804_v48  ;;  %683 = vrot.lane.b32.xlu2 %v665_v52, %s2646_s26  ;;  %v852_v56 = vld [vmem:[%s4887_s1 + $0x108] sm:$0xff]  ;;  %v851_v52 = vld [vmem:[%s4887_s1 + $0x100] sm:$0xff] }
  0xea   :  { %976 = vmatpush.msrb.mxu1 %v842_v13 }
  0xeb   :  { %v449_v18 = vpop.permute.xlu2 %448 }
  0xec   :  { %424 = vrot.lane.b32.xlu1 %v3083_v23, %s2646_s26  ;;  %613 = vrot.lane.b32.xlu0 %v2921_v20, %s2648_s28  ;;  %v840_v20 = vld [vmem:[%s4887_s1 + $0xa8] sm:$0xff] }
  0xed   :  { %977 = vmatpush.msrb.mxu1 %v841_v8 }
  0xee   :  { %v380_v41 = vpop.permute.xlu1 %379  ;;  %v266_v37 = vpop.permute.xlu0 %265 }
  0xef   :  { %301 = vst.msk [vmem:[#allocation4 + $0x138] sm:$0xff] %vm287_vm4, %v266_v37  ;;  %978 = vmatpush.msrb.mxu1 %v840_v20 }
  0xf0   :  { %415 = vst.msk [vmem:[#allocation4 + $0x138] sm:$0xff] %vm401_vm5, %v380_v41  ;;  %v807_v23 = vld [vmem:[#allocation4 + $0x120] sm:$0xff] }
  0xf1   :  { %482 = vst.msk [vmem:[#allocation4 + $0x138] sm:$0xff] %vm468_vm6, %v447_v59  ;;  %955 = vmatmul.f32.gmra.mxu1 %v807_v23  ;;  %357 = vrot.lane.b32.xlu2 %v3093_v25, %s2648_s28  ;;  %v838_v25 = vld [vmem:[%s4887_s1 + $0x98] sm:$0xff] }
  0xf2   :  { %979 = vmatpush.msrb.mxu1 %v839_v15 }
  0xf3   :  { %v451_v50 = vpop.permute.xlu2 %450 }
  0xf4   :  { %549 = vrot.lane.b32.xlu1 %v2940_v33, %s2647_s27  ;;  %245 = vrot.lane.b32.xlu0 %v3198_v27, %s2647_s27  ;;  %v837_v27 = vld [vmem:[%s4887_s1 + $0x90] sm:$0xff] }
  0xf5   :  { %980 = vmatpush.msrb.mxu1 %v838_v25 }
  0xf6   :  { %v382_v0 = vpop.permute.xlu1 %381  ;;  %v268_v10 = vpop.permute.xlu0 %267 }
  0xf7   :  { %302 = vst.msk [vmem:[#allocation4 + $0x150] sm:$0xff] %vm287_vm4, %v268_v10  ;;  %981 = vmatpush.msrb.mxu1 %v837_v27  ;;  %v788_v10 = vld [vmem:[#allocation4 + $0x88] sm:$0xff] }
  0xf8   :  { %416 = vst.msk [vmem:[#allocation4 + $0x150] sm:$0xff] %vm401_vm5, %v382_v0  ;;  %v810_v33 = vld [vmem:[#allocation4 + $0x138] sm:$0xff] }
  0xf9   :  { %483 = vst.msk [vmem:[#allocation4 + $0x150] sm:$0xff] %vm468_vm6, %v449_v18  ;;  %958 = vmatmul.f32.gmra.mxu1 %v810_v33  ;;  %685 = vrot.lane.b32.xlu2 %v2943_v34, %s2646_s26  ;;  %v854_v34 = vld [vmem:[%s4887_s1 + $0x118] sm:$0xff] }
  0xfa   :  { %982 = vmatpush.msrb.mxu1 %v836_v45  ;;  %1045 = vmatpush.msra.mxu2 %v854_v34 }
  0xfb   :  { %v670_v58 = vpop.permute.xlu2 %669  ;;  %2598 = vmatpush.msra.mxu3 %v854_v34 }
  0xfc   :  { %426 = vrot.lane.b32.xlu1 %v3123_v36, %s2646_s26  ;;  %615 = vrot.lane.b32.xlu0 %v2929_v28, %s2648_s28  ;;  %v835_v36 = vld [vmem:[%s4887_s1 + $0x80] sm:$0xff] }
  0xfd   :  { %983 = vmatpush.msrb.mxu1 %v835_v36  ;;  %1046 = vmatpush.msra.mxu2 %v853_v39 }
  0xfe   :  { %v384_v29 = vpop.permute.xlu1 %383  ;;  %v270_v59 = vpop.permute.xlu0 %269  ;;  %2599 = vmatpush.msra.mxu3 %v853_v39  ;;  %v797_v39 = vld [vmem:[#allocation4 + $0xd0] sm:$0xff] }
  0xff   :  { %303 = vst.msk [vmem:[#allocation4 + $0x168] sm:$0xff] %vm287_vm4, %v270_v59  ;;  %1047 = vmatpush.msra.mxu2 %v852_v56 }
 0x100   :  { %417 = vst.msk [vmem:[#allocation4 + $0x168] sm:$0xff] %vm401_vm5, %v384_v29  ;;  %v813_v28 = vld [vmem:[#allocation4 + $0x150] sm:$0xff]  ;;  %2600 = vmatpush.msra.mxu3 %v852_v56 }
 0x101   :  { %484 = vst.msk [vmem:[#allocation4 + $0x168] sm:$0xff] %vm468_vm6, %v451_v50  ;;  %961 = vmatmul.f32.gmra.mxu1 %v813_v28  ;;  %359 = vrot.lane.b32.xlu2 %v3121_v35, %s2648_s28  ;;  %v773_v35 = vld [vmem:[#allocation4 + $0x10] sm:$0xff] }
 0x102   :  { %1048 = vmatpush.msra.mxu2 %v851_v52  ;;  %2601 = vmatpush.msra.mxu3 %v851_v52 }
 0x103   :  { %v672_v62 = vpop.permute.xlu2 %671  ;;  %2550 = vmatmul.msk.f32.vlgmr.msra.gmra.mxu2 %vm43_vm0, %v773_v35  ;;  %v141_v35 = vld [vmem:[#allocation2 + $0x138] sm:$0x3] }
 0x104   :  { %551 = vrot.lane.b32.xlu1 %v2960_v43, %s2647_s27  ;;  %247 = vrot.lane.b32.xlu0 %v3232_v9, %s2647_s27  ;;  %v776_v9 = vld [vmem:[#allocation4 + $0x28] sm:$0xff] }
 0x106   :  { %v598_v11 = vpop.permute.xlu1 %597  ;;  %v532_v48 = vpop.permute.xlu0 %531 }
 0x107   :  { %579 = vst.msk [vmem:[#allocation4 + $0x8] sm:$0xff] %vm287_vm4, %v532_v48 }
 0x108   :  { %645 = vst.msk [vmem:[#allocation4 + $0x8] sm:$0xff] %vm401_vm5, %v598_v11  ;;  %v816_v55 = vld [vmem:[#allocation4 + $0x168] sm:$0xff] }
 0x109   :  { %717 = vst.msk [vmem:[#allocation4 + $0x8] sm:$0xff] %vm468_vm6, %v670_v58  ;;  %964 = vmatmul.f32.gmra.mxu1 %v816_v55  ;;  %687 = vrot.lane.b32.xlu2 %v2968_v47, %s2646_s26 }
 0x10b   :  { %v674_v43 = vpop.permute.xlu2 %673  ;;  %2551 = vmatmul.msk.f32.gmra.mxu2 %vm43_vm0, %v776_v9  ;;  %v667_v9 = vrot.slane %v141_v35, 1 }
 0x10c   :  { %428 = vrot.lane.b32.xlu1 %v3133_v40, %s2646_s26  ;;  %617 = vrot.lane.b32.xlu0 %v2937_v32, %s2648_s28  ;;  %v779_v32 = vld [vmem:[#allocation4 + $0x40] sm:$0xff] }
 0x10e   :  { %v600_v18 = vpop.permute.xlu1 %599  ;;  %v534_v13 = vpop.permute.xlu0 %533 }
 0x10f   :  { %580 = vst.msk [vmem:[#allocation4 + $0x20] sm:$0xff] %vm287_vm4, %v534_v13 }
 0x110   :  { %646 = vst.msk [vmem:[#allocation4 + $0x20] sm:$0xff] %vm401_vm5, %v600_v18  ;;  %v772_v41 = vld [vmem:[#allocation4 + $0x8] sm:$0xff] }
 0x111   :  { %718 = vst.msk [vmem:[#allocation4 + $0x20] sm:$0xff] %vm468_vm6, %v672_v62  ;;  %984 = vmatmul.f32.vlgmr.msrb.gmra.mxu1 %v772_v41  ;;  %361 = vrot.lane.b32.xlu2 %v3151_v53, %s2648_s28 }
 0x113   :  { %v676_v47 = vpop.permute.xlu2 %675  ;;  %2552 = vmatmul.msk.f32.gmra.mxu2 %vm43_vm0, %v779_v32 }
 0x114   :  { %553 = vrot.lane.b32.xlu1 %v2976_v51, %s2647_s27  ;;  %249 = vrot.lane.b32.xlu0 %v3273_v19, %s2647_s27  ;;  %v782_v19 = vld [vmem:[#allocation4 + $0x58] sm:$0xff] }
 0x116   :  { %v602_v40 = vpop.permute.xlu1 %601  ;;  %v536_v37 = vpop.permute.xlu0 %535 }
 0x117   :  { %581 = vst.msk [vmem:[#allocation4 + $0x38] sm:$0xff] %vm287_vm4, %v536_v37 }
 0x118   :  { %647 = vst.msk [vmem:[#allocation4 + $0x38] sm:$0xff] %vm401_vm5, %v602_v40  ;;  %v775_v8 = vld [vmem:[#allocation4 + $0x20] sm:$0xff] }
 0x119   :  { %719 = vst.msk [vmem:[#allocation4 + $0x38] sm:$0xff] %vm468_vm6, %v674_v43  ;;  %987 = vmatmul.f32.gmra.mxu1 %v775_v8  ;;  %689 = vrot.lane.b32.xlu2 %v2982_v54, %s2646_s26 }
 0x11b   :  { %v678_v51 = vpop.permute.xlu2 %677  ;;  %2553 = vmatmul.msk.f32.gmra.mxu2 %vm43_vm0, %v782_v19  ;;  %v803_v19 = vld [vmem:[#allocation4 + $0x100] sm:$0xff] }
 0x11c   :  { %430 = vrot.lane.b32.xlu1 %v3180_v7, %s2646_s26  ;;  %619 = vrot.lane.b32.xlu0 %v2947_v38, %s2648_s28  ;;  %v785_v38 = vld [vmem:[#allocation4 + $0x70] sm:$0xff] }
 0x11d   :  { %2560 = vmatmul.msk.f32.vlgmr.msra.gmra.mxu3 %vm43_vm0, %v803_v19 }
 0x11e   :  { %v604_v53 = vpop.permute.xlu1 %603  ;;  %v538_v23 = vpop.permute.xlu0 %537 }
 0x11f   :  { %582 = vst.msk [vmem:[#allocation4 + $0x50] sm:$0xff] %vm287_vm4, %v538_v23 }
 0x120   :  { %648 = vst.msk [vmem:[#allocation4 + $0x50] sm:$0xff] %vm401_vm5, %v604_v53  ;;  %v778_v20 = vld [vmem:[#allocation4 + $0x38] sm:$0xff] }
 0x121   :  { %720 = vst.msk [vmem:[#allocation4 + $0x50] sm:$0xff] %vm468_vm6, %v676_v47  ;;  %990 = vmatmul.f32.gmra.mxu1 %v778_v20  ;;  %363 = vrot.lane.b32.xlu2 %v3191_v21, %s2648_s28 }
 0x123   :  { %v680_v54 = vpop.permute.xlu2 %679  ;;  %2554 = vmatmul.msk.f32.gmra.mxu2 %vm43_vm0, %v785_v38 }
 0x124   :  { %555 = vrot.lane.b32.xlu1 %v2990_v57, %s2647_s27  ;;  %251 = vrot.lane.b32.xlu0 %v3303_v16, %s2647_s27  ;;  %v139_v57 = vld [vmem:[#allocation2 + $0x128] sm:$0x3]  ;;  %v528_v16 = vrot.slane %v3193_v22, 2 }
 0x125   :  { %v529_v0 = vrot.slane %v139_v57, 2  ;;  %v491_v59 = vrot.slane %v139_v57, 1 }
 0x126   :  { %v606_v7 = vpop.permute.xlu1 %605  ;;  %v540_v50 = vpop.permute.xlu0 %539 }
 0x127   :  { %583 = vst.msk [vmem:[#allocation4 + $0x68] sm:$0xff] %vm287_vm4, %v540_v50  ;;  %v530_v25 = vsel %vm304_vm3, %v528_v16, %v529_v0  ;;  %v3602_v57 = vpop.f32.mrf.mxu1 }
 0x128   :  { %649 = vst.msk [vmem:[#allocation4 + $0x68] sm:$0xff] %vm401_vm5, %v606_v7  ;;  %v781_v15 = vld [vmem:[#allocation4 + $0x50] sm:$0xff] }
 0x129   :  { %721 = vst.msk [vmem:[#allocation4 + $0x68] sm:$0xff] %vm468_vm6, %v678_v51  ;;  %993 = vmatmul.f32.gmra.mxu1 %v781_v15  ;;  %691 = vrot.lane.b32.xlu2 %v2998_v60, %s2646_s26 }
 0x12a   :  { %769 = vst.msk [vmem:[#allocation4 + $0x160] sm:$0xff] %vm43_vm0, %v530_v25 }
 0x12b   :  { %v354_v21 = vpop.permute.xlu2 %353  ;;  %2555 = vmatmul.msk.f32.gmra.mxu2 %vm43_vm0, %v788_v10 }
 0x12c   :  { %432 = vrot.lane.b32.xlu1 %v3206_v30, %s2646_s26  ;;  %621 = vrot.lane.b32.xlu0 %v2963_v46, %s2648_s28  ;;  %v791_v30 = vld [vmem:[#allocation4 + $0xa0] sm:$0xff] }
 0x12e   :  { %v608_v33 = vpop.permute.xlu1 %607  ;;  %v542_v27 = vpop.permute.xlu0 %541 }
 0x12f   :  { %584 = vst.msk [vmem:[#allocation4 + $0x80] sm:$0xff] %vm287_vm4, %v542_v27 }
 0x130   :  { %650 = vst.msk [vmem:[#allocation4 + $0x80] sm:$0xff] %vm401_vm5, %v608_v33  ;;  %v784_v60 = vld [vmem:[#allocation4 + $0x68] sm:$0xff] }
 0x131   :  { %722 = vst.msk [vmem:[#allocation4 + $0x80] sm:$0xff] %vm468_vm6, %v680_v54  ;;  %996 = vmatmul.f32.gmra.mxu1 %v784_v60  ;;  %365 = vrot.lane.b32.xlu2 %v3225_v5, %s2648_s28  ;;  %v794_v5 = vld [vmem:[#allocation4 + $0xb8] sm:$0xff] }
 0x133   :  { %v682_v46 = vpop.permute.xlu2 %681  ;;  %2556 = vmatmul.msk.f32.gmra.mxu2 %vm43_vm0, %v791_v30 }
 0x134   :  { %557 = vrot.lane.b32.xlu1 %v3007_v61, %s2647_s27  ;;  %253 = vrot.lane.b32.xlu0 %v3337_v49, %s2647_s27  ;;  %v490_v49 = vrot.slane %v3193_v22, 1 }
 0x136   :  { %v544_v58 = vpop.permute.xlu1 %543  ;;  %v240_v45 = vpop.permute.xlu0 %239 }
 0x137   :  { %585 = vst.msk [vmem:[#allocation4 + $0x98] sm:$0xff] %vm287_vm4, %v544_v58  ;;  %v809_v58 = vld [vmem:[#allocation4 + $0x130] sm:$0xff] }
 0x138   :  { %288 = vst.msk [vmem:[#allocation4] sm:$0xff] %vm287_vm4, %v240_v45  ;;  %v787_v29 = vld [vmem:[#allocation4 + $0x80] sm:$0xff] }
 0x139   :  { %402 = vst.msk [vmem:[#allocation4] sm:$0xff] %vm401_vm5, %v354_v21  ;;  %999 = vmatmul.f32.gmra.mxu1 %v787_v29  ;;  %693 = vrot.lane.b32.xlu2 %v3019_v63, %s2646_s26  ;;  %v806_v21 = vld [vmem:[#allocation4 + $0x118] sm:$0xff] }
 0x13a   :  { %2561 = vmatmul.msk.f32.gmra.mxu3 %vm43_vm0, %v806_v21 }
 0x13b   :  { %v356_v61 = vpop.permute.xlu2 %355  ;;  %2557 = vmatmul.msk.f32.gmra.mxu2 %vm43_vm0, %v794_v5 }
 0x13c   :  { %434 = vrot.lane.b32.xlu1 %v3300_v17, %s2646_s26  ;;  %623 = vrot.lane.b32.xlu0 %v3052_v4, %s2648_s28  ;;  %v492_v17 = vsel %vm190_vm2, %v490_v49, %v491_v59  ;;  %v140_v4 = vld [vmem:[#allocation2 + $0x130] sm:$0xff] }
 0x13d   :  { %524 = vst.msk [vmem:[#allocation4 + $0x170] sm:$0xff] %vm43_vm0, %v492_v17  ;;  %v736_v28 = vrot.slane %v140_v4, 2  ;;  %v666_v43 = vrot.slane %v140_v4, 1 }
 0x13e   :  { %v421_v34 = vpop.permute.xlu1 %420  ;;  %v610_v36 = vpop.permute.xlu0 %609 }
 0x13f   :  { %469 = vst.msk [vmem:[#allocation4] sm:$0xff] %vm468_vm6, %v421_v34  ;;  %v668_v32 = vsel %vm190_vm2, %v666_v43, %v667_v9 }
 0x140   :  { %651 = vst.msk [vmem:[#allocation4 + $0x98] sm:$0xff] %vm401_vm5, %v610_v36 }
 0x141   :  { %723 = vst.msk [vmem:[#allocation4 + $0x98] sm:$0xff] %vm468_vm6, %v682_v46  ;;  %367 = vrot.lane.b32.xlu2 %v3244_v42, %s2648_s28  ;;  %v737_v42 = vrot.slane %v141_v35, 2 }
 0x142   :  { %2562 = vmatmul.msk.f32.gmra.mxu3 %vm43_vm0, %v809_v58 }
 0x143   :  { %v684_v63 = vpop.permute.xlu2 %683  ;;  %2558 = vmatmul.msk.f32.gmra.mxu2 %vm43_vm0, %v797_v39 }
 0x144   :  { %559 = vrot.lane.b32.xlu0 %v3067_v12, %s2647_s27  ;;  %625 = vrot.lane.b32.xlu1 %v3193_v22, %s2648_s28  ;;  %v738_v12 = vsel %vm304_vm3, %v736_v28, %v737_v42  ;;  %v815_v42 = vld [vmem:[#allocation4 + $0x160] sm:$0xff] }
 0x145   :  { %770 = vst.msk [vmem:[#allocation4 + $0x178] sm:$0xff] %vm43_vm0, %v738_v12 }
 0x146   :  { %v546_v56 = vpop.permute.xlu1 %545  ;;  %v771_v62 = vld [vmem:[#allocation4] sm:$0xff]  ;;  %v242_v52 = vpop.permute.xlu0 %241 }
 0x147   :  { %586 = vst.msk [vmem:[#allocation4 + $0xb0] sm:$0xff] %vm287_vm4, %v546_v56  ;;  %919 = vmatmul.f32.vlgmr.msra.gmra.mxu0 %v771_v62 }
 0x148   :  { %289 = vst.msk [vmem:[#allocation4 + $0x18] sm:$0xff] %vm287_vm4, %v242_v52  ;;  %v790_v11 = vld [vmem:[#allocation4 + $0x98] sm:$0xff] }
 0x149   :  { %403 = vst.msk [vmem:[#allocation4 + $0x18] sm:$0xff] %vm401_vm5, %v356_v61  ;;  %1002 = vmatmul.f32.gmra.mxu1 %v790_v11  ;;  %695 = vrot.lane.b32.xlu2 %v3074_v14, %s2646_s26  ;;  %v800_v14 = vld [vmem:[#allocation4 + $0xe8] sm:$0xff] }
 0x14a   :  { %v3609_v27 = vpop.f32.mrf.mxu1 }
 0x14b   :  { %v358_v22 = vpop.permute.xlu2 %357  ;;  %2559 = vmatmul.msk.f32.gmra.mxu2 %vm43_vm0, %v800_v14 }
 0x14c   :  { %561 = vrot.lane.b32.xlu0 %v530_v25, %s2647_s27  ;;  %627 = vrot.lane.b32.xlu1 %v140_v4, %s2648_s28  ;;  %v812_v4 = vld [vmem:[#allocation4 + $0x148] sm:$0xff]  ;;  %v818_v9 = vld [vmem:[#allocation4 + $0x178] sm:$0xff] }
 0x14d   :  { %2563 = vmatmul.msk.f32.gmra.mxu3 %vm43_vm0, %v812_v4 }
 0x14e   :  { %v423_v48 = vpop.permute.xlu1 %422  ;;  %v612_v55 = vpop.permute.xlu0 %611 }
 0x14f   :  { %470 = vst.msk [vmem:[#allocation4 + $0x18] sm:$0xff] %vm468_vm6, %v423_v48 }
 0x150   :  { %652 = vst.msk [vmem:[#allocation4 + $0xb0] sm:$0xff] %vm401_vm5, %v612_v55 }
 0x151   :  { %724 = vst.msk [vmem:[#allocation4 + $0xb0] sm:$0xff] %vm468_vm6, %v684_v63  ;;  %697 = vrot.lane.b32.xlu2 %v492_v17, %s2646_s26 }
 0x153   :  { %v686_v18 = vpop.permute.xlu2 %685 }
 0x155   :  { %2564 = vmatmul.msk.f32.gmra.mxu3 %vm43_vm0, %v815_v42 }
 0x156   :  { %v548_v13 = vpop.permute.xlu1 %547  ;;  %v774_v41 = vld [vmem:[#allocation4 + $0x18] sm:$0xff]  ;;  %v244_v47 = vpop.permute.xlu0 %243 }
 0x157   :  { %587 = vst.msk [vmem:[#allocation4 + $0xc8] sm:$0xff] %vm287_vm4, %v548_v13  ;;  %922 = vmatmul.f32.gmra.mxu0 %v774_v41 }
 0x158   :  { %290 = vst.msk [vmem:[#allocation4 + $0x30] sm:$0xff] %vm287_vm4, %v244_v47  ;;  %v793_v40 = vld [vmem:[#allocation4 + $0xb0] sm:$0xff] }
 0x159   :  { %404 = vst.msk [vmem:[#allocation4 + $0x30] sm:$0xff] %vm401_vm5, %v358_v22  ;;  %1005 = vmatmul.f32.gmra.mxu1 %v793_v40  ;;  %699 = vrot.lane.b32.xlu2 %v668_v32, %s2646_s26 }
 0x15b   :  { %v360_v37 = vpop.permute.xlu2 %359 }
 0x15d   :  { %2565 = vmatmul.msk.f32.gmra.mxu3 %vm43_vm0, %v818_v9 }
 0x15e   :  { %v425_v8 = vpop.permute.xlu1 %424  ;;  %v614_v51 = vpop.permute.xlu0 %613 }
 0x15f   :  { %471 = vst.msk [vmem:[#allocation4 + $0x30] sm:$0xff] %vm468_vm6, %v425_v8  ;;  %v3615_v29 = vpop.f32.mrf.mxu1 }
 0x160   :  { %653 = vst.msk [vmem:[#allocation4 + $0xc8] sm:$0xff] %vm401_vm5, %v614_v51 }
 0x161   :  { %725 = vst.msk [vmem:[#allocation4 + $0xc8] sm:$0xff] %vm468_vm6, %v686_v18 }
 0x163   :  { %v688_v53 = vpop.permute.xlu2 %687 }
 0x166   :  { %v550_v23 = vpop.permute.xlu1 %549  ;;  %v777_v20 = vld [vmem:[#allocation4 + $0x30] sm:$0xff]  ;;  %v246_v54 = vpop.permute.xlu0 %245 }
 0x167   :  { %588 = vst.msk [vmem:[#allocation4 + $0xe0] sm:$0xff] %vm287_vm4, %v550_v23  ;;  %925 = vmatmul.f32.gmra.mxu0 %v777_v20  ;;  %v3620_v63 = vpop.f32.mrf.mxu1 }
 0x168   :  { %291 = vst.msk [vmem:[#allocation4 + $0x48] sm:$0xff] %vm287_vm4, %v246_v54  ;;  %v796_v38 = vld [vmem:[#allocation4 + $0xc8] sm:$0xff] }
 0x169   :  { %405 = vst.msk [vmem:[#allocation4 + $0x48] sm:$0xff] %vm401_vm5, %v360_v37  ;;  %1008 = vmatmul.f32.gmra.mxu1 %v796_v38 }
 0x16b   :  { %v362_v7 = vpop.permute.xlu2 %361 }
 0x16e   :  { %v427_v50 = vpop.permute.xlu1 %426  ;;  %v616_v15 = vpop.permute.xlu0 %615 }
 0x16f   :  { %472 = vst.msk [vmem:[#allocation4 + $0x48] sm:$0xff] %vm468_vm6, %v427_v50  ;;  %v3628_v35 = vpop.f32.mrf.mxu1 }
 0x170   :  { %654 = vst.msk [vmem:[#allocation4 + $0xe0] sm:$0xff] %vm401_vm5, %v616_v15 }
 0x171   :  { %726 = vst.msk [vmem:[#allocation4 + $0xe0] sm:$0xff] %vm468_vm6, %v688_v53 }
 0x173   :  { %v690_v16 = vpop.permute.xlu2 %689 }
 0x176   :  { %v552_v0 = vpop.permute.xlu1 %551  ;;  %v780_v10 = vld [vmem:[#allocation4 + $0x48] sm:$0xff]  ;;  %v248_v25 = vpop.permute.xlu0 %247 }
 0x177   :  { %589 = vst.msk [vmem:[#allocation4 + $0xf8] sm:$0xff] %vm287_vm4, %v552_v0  ;;  %928 = vmatmul.f32.gmra.mxu0 %v780_v10  ;;  %v3635_v48 = vpop.f32.mrf.mxu1 }
 0x178   :  { %292 = vst.msk [vmem:[#allocation4 + $0x60] sm:$0xff] %vm287_vm4, %v248_v25  ;;  %v799_v33 = vld [vmem:[#allocation4 + $0xe0] sm:$0xff] }
 0x179   :  { %406 = vst.msk [vmem:[#allocation4 + $0x60] sm:$0xff] %vm401_vm5, %v362_v7  ;;  %1011 = vmatmul.f32.gmra.mxu1 %v799_v33 }
 0x17b   :  { %v364_v60 = vpop.permute.xlu2 %363 }
 0x17e   :  { %v429_v46 = vpop.permute.xlu1 %428  ;;  %v618_v30 = vpop.permute.xlu0 %617 }
 0x17f   :  { %473 = vst.msk [vmem:[#allocation4 + $0x60] sm:$0xff] %vm468_vm6, %v429_v46  ;;  %v3641_v41 = vpop.f32.mrf.mxu1 }
 0x180   :  { %655 = vst.msk [vmem:[#allocation4 + $0xf8] sm:$0xff] %vm401_vm5, %v618_v30 }
 0x181   :  { %727 = vst.msk [vmem:[#allocation4 + $0xf8] sm:$0xff] %vm468_vm6, %v690_v16 }
 0x183   :  { %v692_v45 = vpop.permute.xlu2 %691 }
 0x186   :  { %v554_v61 = vpop.permute.xlu1 %553  ;;  %v783_v5 = vld [vmem:[#allocation4 + $0x60] sm:$0xff]  ;;  %v250_v49 = vpop.permute.xlu0 %249 }
 0x187   :  { %590 = vst.msk [vmem:[#allocation4 + $0x110] sm:$0xff] %vm287_vm4, %v554_v61  ;;  %931 = vmatmul.f32.gmra.mxu0 %v783_v5  ;;  %v3647_v19 = vpop.f32.mrf.mxu1  ;;  %v1050_v16 = vpop.f32.mrf.mxu2 }
 0x188   :  { %293 = vst.msk [vmem:[#allocation4 + $0x78] sm:$0xff] %vm287_vm4, %v250_v49  ;;  %v802_v59 = vld [vmem:[#allocation4 + $0xf8] sm:$0xff] }
 0x189   :  { %407 = vst.msk [vmem:[#allocation4 + $0x78] sm:$0xff] %vm401_vm5, %v364_v60  ;;  %1014 = vmatmul.f32.gmra.mxu1 %v802_v59 }
 0x18b   :  { %v366_v34 = vpop.permute.xlu2 %365 }
 0x18e   :  { %v431_v36 = vpop.permute.xlu1 %430  ;;  %v620_v17 = vpop.permute.xlu0 %619 }
 0x18f   :  { %474 = vst.msk [vmem:[#allocation4 + $0x78] sm:$0xff] %vm468_vm6, %v431_v36  ;;  %v985_v7 = vpop.f32.mrf.mxu1  ;;  %v1053_v10 = vpop.f32.mrf.mxu2 }
 0x190   :  { %656 = vst.msk [vmem:[#allocation4 + $0x110] sm:$0xff] %vm401_vm5, %v620_v17 }
 0x191   :  { %728 = vst.msk [vmem:[#allocation4 + $0x110] sm:$0xff] %vm468_vm6, %v692_v45 }
 0x193   :  { %v694_v28 = vpop.permute.xlu2 %693 }
 0x196   :  { %v556_v39 = vpop.permute.xlu1 %555  ;;  %v786_v56 = vld [vmem:[#allocation4 + $0x78] sm:$0xff]  ;;  %v252_v62 = vpop.permute.xlu0 %251 }
 0x197   :  { %591 = vst.msk [vmem:[#allocation4 + $0x128] sm:$0xff] %vm287_vm4, %v556_v39  ;;  %934 = vmatmul.f32.gmra.mxu0 %v786_v56  ;;  %v988_v15 = vpop.f32.mrf.mxu1  ;;  %v1056_v33 = vpop.f32.mrf.mxu2 }
 0x198   :  { %294 = vst.msk [vmem:[#allocation4 + $0x90] sm:$0xff] %vm287_vm4, %v252_v62  ;;  %v805_v52 = vld [vmem:[#allocation4 + $0x110] sm:$0xff] }
 0x199   :  { %408 = vst.msk [vmem:[#allocation4 + $0x90] sm:$0xff] %vm401_vm5, %v366_v34  ;;  %1017 = vmatmul.f32.gmra.mxu1 %v805_v52 }
 0x19b   :  { %v368_v22 = vpop.permute.xlu2 %367 }
 0x19e   :  { %v433_v11 = vpop.permute.xlu1 %432  ;;  %v622_v12 = vpop.permute.xlu0 %621 }
 0x19f   :  { %475 = vst.msk [vmem:[#allocation4 + $0x90] sm:$0xff] %vm468_vm6, %v433_v11  ;;  %v991_v21 = vpop.f32.mrf.mxu1  ;;  %v1059_v30 = vpop.f32.mrf.mxu2 }
 0x1a0   :  { %657 = vst.msk [vmem:[#allocation4 + $0x128] sm:$0xff] %vm401_vm5, %v622_v12  ;;  %v3656_v39 = vpop.f32.mrf.mxu3 }
 0x1a1   :  { %729 = vst.msk [vmem:[#allocation4 + $0x128] sm:$0xff] %vm468_vm6, %v694_v28 }
 0x1a3   :  { %v696_v13 = vpop.permute.xlu2 %695 }
 0x1a6   :  { %v558_v55 = vpop.permute.xlu1 %557  ;;  %v789_v14 = vld [vmem:[#allocation4 + $0x90] sm:$0xff]  ;;  %v254_v43 = vpop.permute.xlu0 %253 }
 0x1a7   :  { %592 = vst.msk [vmem:[#allocation4 + $0x140] sm:$0xff] %vm287_vm4, %v558_v55  ;;  %937 = vmatmul.f32.gmra.mxu0 %v789_v14  ;;  %v994_v0 = vpop.f32.mrf.mxu1  ;;  %v1062_v61 = vpop.f32.mrf.mxu2 }
 0x1a8   :  { %295 = vst.msk [vmem:[#allocation4 + $0xa8] sm:$0xff] %vm287_vm4, %v254_v43  ;;  %v808_v18 = vld [vmem:[#allocation4 + $0x128] sm:$0xff] }
 0x1a9   :  { %409 = vst.msk [vmem:[#allocation4 + $0xa8] sm:$0xff] %vm401_vm5, %v368_v22  ;;  %1020 = vmatmul.f32.gmra.mxu1 %v808_v18 }
 0x1ab   :  { %v698_v40 = vpop.permute.xlu2 %697 }
 0x1ae   :  { %v435_v47 = vpop.permute.xlu1 %434  ;;  %v624_v32 = vpop.permute.xlu0 %623 }
 0x1af   :  { %476 = vst.msk [vmem:[#allocation4 + $0xa8] sm:$0xff] %vm468_vm6, %v435_v47  ;;  %v997_v25 = vpop.f32.mrf.mxu1  ;;  %v1065_v59 = vpop.f32.mrf.mxu2 }
 0x1b0   :  { %658 = vst.msk [vmem:[#allocation4 + $0x140] sm:$0xff] %vm401_vm5, %v624_v32 }
 0x1b1   :  { %730 = vst.msk [vmem:[#allocation4 + $0x140] sm:$0xff] %vm468_vm6, %v696_v13 }
 0x1b3   :  { %v700_v23 = vpop.permute.xlu2 %699 }
 0x1b6   :  { %v792_v37 = vld [vmem:[#allocation4 + $0xa8] sm:$0xff]  ;;  %v560_v8 = vpop.permute.xlu0 %559  ;;  %v626_v51 = vpop.permute.xlu1 %625 }
 0x1b7   :  { %940 = vmatmul.f32.gmra.mxu0 %v792_v37  ;;  %593 = vst.msk [vmem:[#allocation4 + $0x158] sm:$0xff] %vm287_vm4, %v560_v8  ;;  %v1000_v60 = vpop.f32.mrf.mxu1  ;;  %v1068_v4 = vpop.f32.mrf.mxu2 }
 0x1b8   :  { %659 = vst.msk [vmem:[#allocation4 + $0x158] sm:$0xff] %vm401_vm5, %v626_v51  ;;  %v811_v53 = vld [vmem:[#allocation4 + $0x140] sm:$0xff] }
 0x1b9   :  { %731 = vst.msk [vmem:[#allocation4 + $0x158] sm:$0xff] %vm468_vm6, %v698_v40  ;;  %1023 = vmatmul.f32.gmra.mxu1 %v811_v53 }
 0x1bd   :  { %v3658_v12 = vpop.f32.mrf.mxu3 }
 0x1be   :  { %v562_v20 = vpop.permute.xlu0 %561  ;;  %v628_v54 = vpop.permute.xlu1 %627 }
 0x1bf   :  { %594 = vst.msk [vmem:[#allocation4 + $0x170] sm:$0xff] %vm287_vm4, %v562_v20  ;;  %v1071_v42 = vpop.f32.mrf.mxu2 }
 0x1c0   :  { %660 = vst.msk [vmem:[#allocation4 + $0x170] sm:$0xff] %vm401_vm5, %v628_v54  ;;  %v814_v38 = vld [vmem:[#allocation4 + $0x158] sm:$0xff] }
 0x1c1   :  { %732 = vst.msk [vmem:[#allocation4 + $0x170] sm:$0xff] %vm468_vm6, %v700_v23  ;;  %1026 = vmatmul.f32.gmra.mxu1 %v814_v38 }
 0x1c4   :  { %v920_v46 = vpop.f32.mrf.mxu0 }
 0x1c5   :  { %v986_v11 = vadd.f32 %v985_v7, %v920_v46  ;;  %v3672_v51 = vpop.f32.mrf.mxu3 }
 0x1c6   :  { %v1003_v58 = vpop.f32.mrf.mxu1 }
 0x1c7   :  { %v3662_v43 = vadd.f32 %v1050_v16, %v986_v11  ;;  %v1074_v20 = vpop.f32.mrf.mxu2 }
 0x1c8   :  { %v817_v50 = vld [vmem:[#allocation4 + $0x170] sm:$0xff] }
 0x1c9   :  { %1029 = vmatmul.f32.gmra.mxu1 %v817_v50  ;;  %v1138_v8 = vmul.f32 %v3662_v43, %v3662_v43  ;;  %v1100_v7 = vsel %vm43_vm0, %v3662_v43, 0.0 }
 0x1d0   :  { %v1089_v11 = vpop.f32.mrf.mxu3 }
 0x1d4   :  { %v923_v45 = vpop.f32.mrf.mxu0 }
 0x1d5   :  { %v989_v52 = vadd.f32 %v988_v15, %v923_v45 }
 0x1d6   :  { %v3654_v5 = vpop.f32.mrf.mxu1 }
 0x1d7   :  { %v3660_v55 = vadd.f32 %v1053_v10, %v989_v52 }
 0x1d9   :  { %v1139_v32 = vmul.f32 %v3660_v55, %v3660_v55  ;;  %v1101_v53 = vsel %vm43_vm0, %v3660_v55, 0.0 }
 0x1da   :  { %v1102_v10 = vadd.f32 %v1101_v53, %v1100_v7 }
 0x1db   :  { %v1155_v50 = vsel %vm43_vm0, %v1139_v32, 0.0 }
 0x1e4   :  { %v926_v49 = vpop.f32.mrf.mxu0 }
 0x1e5   :  { %v992_v22 = vadd.f32 %v991_v21, %v926_v49 }
 0x1e6   :  { %v1009_v34 = vpop.f32.mrf.mxu1 }
 0x1e7   :  { %v3664_v18 = vadd.f32 %v1056_v33, %v992_v22  ;;  %v1077_v22 = vpop.f32.mrf.mxu2 }
 0x1e9   :  { %v1140_v23 = vmul.f32 %v3664_v18, %v3664_v18  ;;  %v1103_v15 = vsel %vm43_vm0, %v3664_v18, 0.0 }
 0x1ea   :  { %v1104_v45 = vadd.f32 %v1103_v15, %v1102_v10 }
 0x1eb   :  { %v1157_v33 = vsel %vm43_vm0, %v1140_v23, 0.0 }
 0x1f4   :  { %v929_v36 = vpop.f32.mrf.mxu0 }
 0x1f5   :  { %v995_v14 = vadd.f32 %v994_v0, %v929_v36  ;;  %v1154_v0 = vsel %vm43_vm0, %v1138_v8, 0.0 }
 0x1f6   :  { %v1012_v17 = vpop.f32.mrf.mxu1 }
 0x1f7   :  { %v3668_v40 = vadd.f32 %v1059_v30, %v995_v14  ;;  %v1013_v52 = vadd.f32 %v1012_v17, %v3609_v27 }
 0x1f9   :  { %v1141_v21 = vmul.f32 %v3668_v40, %v3668_v40  ;;  %v3716_v53 = vadd.f32 %v1077_v22, %v1013_v52 }
 0x1fb   :  { %v1159_v49 = vsel %vm43_vm0, %v1141_v21, 0.0 }
 0x204   :  { %v932_v28 = vpop.f32.mrf.mxu0 }
 0x205   :  { %v998_v13 = vadd.f32 %v997_v25, %v932_v28 }
 0x206   :  { %v1015_v56 = vpop.f32.mrf.mxu1 }
 0x207   :  { %v3678_v54 = vadd.f32 %v1062_v61, %v998_v13  ;;  %v1010_v61 = vadd.f32 %v1009_v34, %v3602_v57 }
 0x209   :  { %v1142_v46 = vmul.f32 %v3678_v54, %v3678_v54  ;;  %v3709_v34 = vadd.f32 %v1074_v20, %v1010_v61 }
 0x214   :  { %v935_v62 = vpop.f32.mrf.mxu0 }
 0x215   :  { %v1001_v37 = vadd.f32 %v1000_v60, %v935_v62  ;;  %v1105_v60 = vsel %vm43_vm0, %v3668_v40, 0.0 }
 0x216   :  { %v1018_v9 = vpop.f32.mrf.mxu1  ;;  %v1106_v62 = vadd.f32 %v1105_v60, %v1104_v45  ;;  %v1115_v60 = vsel %vm43_vm0, %v3709_v34, 0.0  ;;  %v1092_v45 = vpop.f32.mrf.mxu3 }
 0x217   :  { %v3687_v16 = vadd.f32 %v1065_v59, %v1001_v37  ;;  %v1107_v59 = vsel %vm43_vm0, %v3678_v54, 0.0  ;;  %v1016_v37 = vadd.f32 %v1015_v56, %v3615_v29  ;;  %v1019_v20 = vadd.f32 %v1018_v9, %v3620_v63 }
 0x218   :  { %v1146_v29 = vmul.f32 %v3709_v34, %v3709_v34 }
 0x219   :  { %v1143_v36 = vmul.f32 %v3687_v16, %v3687_v16  ;;  %v1109_v14 = vsel %vm43_vm0, %v3687_v16, 0.0 }
 0x21a   :  { %v1169_v61 = vsel %vm43_vm0, %v1146_v29, 0.0 }
 0x21b   :  { %v1163_v8 = vsel %vm43_vm0, %v1143_v36, 0.0 }
 0x224   :  { %v938_v47 = vpop.f32.mrf.mxu0 }
 0x225   :  { %v1004_v38 = vadd.f32 %v1003_v58, %v938_v47  ;;  %v1156_v58 = vadd.f32 %v1155_v50, %v1154_v0  ;;  %v1108_v47 = vadd.f32 %v1107_v59, %v1106_v62  ;;  %v3725_v0 = vadd.f32 %v3656_v39, %v1016_v37 }
 0x226   :  { %v1021_v25 = vpop.f32.mrf.mxu1 }
 0x227   :  { %v3695_v30 = vadd.f32 %v1068_v4, %v1004_v38  ;;  %v1158_v28 = vadd.f32 %v1157_v33, %v1156_v58  ;;  %v1161_v4 = vsel %vm43_vm0, %v1142_v46, 0.0  ;;  %v1110_v38 = vadd.f32 %v1109_v14, %v1108_v47 }
 0x228   :  { %v3737_v46 = vadd.f32 %v3658_v12, %v1019_v20  ;;  %v1148_v59 = vmul.f32 %v3725_v0, %v3725_v0 }
 0x229   :  { %v1144_v57 = vmul.f32 %v3695_v30, %v3695_v30  ;;  %v1160_v13 = vadd.f32 %v1159_v49, %v1158_v28  ;;  %v1111_v27 = vsel %vm43_vm0, %v3695_v30, 0.0  ;;  %v1117_v49 = vsel %vm43_vm0, %v3716_v53, 0.0 }
 0x22a   :  { %v1112_v21 = vadd.f32 %v1111_v27, %v1110_v38  ;;  %v1149_v22 = vmul.f32 %v3737_v46, %v3737_v46  ;;  %v1121_v47 = vsel %vm43_vm0, %v3737_v46, 0.0 }
 0x22b   :  { %v1162_v23 = vadd.f32 %v1161_v4, %v1160_v13  ;;  %v1165_v50 = vsel %vm43_vm0, %v1144_v57, 0.0 }
 0x22c   :  { %v1175_v27 = vsel %vm43_vm0, %v1149_v22, 0.0 }
 0x22d   :  { %v1164_v56 = vadd.f32 %v1163_v8, %v1162_v23 }
 0x22f   :  { %v1166_v9 = vadd.f32 %v1165_v50, %v1164_v56 }
 0x234   :  { %v941_v32 = vpop.f32.mrf.mxu0 }
 0x235   :  { %v1007_v17 = vadd.f32 %v3654_v5, %v941_v32  ;;  %v1022_v5 = vadd.f32 %v1021_v25, %v3628_v35 }
 0x236   :  { %v1024_v7 = vpop.f32.mrf.mxu1 }
 0x237   :  { %v3720_v15 = vadd.f32 %v1071_v42, %v1007_v17  ;;  %v1147_v42 = vmul.f32 %v3716_v53, %v3716_v53  ;;  %v1025_v35 = vadd.f32 %v1024_v7, %v3635_v48  ;;  %v3747_v36 = vadd.f32 %v3672_v51, %v1022_v5 }
 0x238   :  { %v1119_v48 = vsel %vm43_vm0, %v3725_v0, 0.0  ;;  %v1173_v51 = vsel %vm43_vm0, %v1148_v59, 0.0 }
 0x239   :  { %v1113_v10 = vsel %vm43_vm0, %v3720_v15, 0.0  ;;  %v1145_v63 = vmul.f32 %v3720_v15, %v3720_v15  ;;  %v1171_v12 = vsel %vm43_vm0, %v1147_v42, 0.0  ;;  %v3754_v4 = vadd.f32 %v1089_v11, %v1025_v35 }
 0x23a   :  { %v1114_v33 = vadd.f32 %v1113_v10, %v1112_v21  ;;  %v1150_v32 = vmul.f32 %v3747_v36, %v3747_v36  ;;  %v1123_v11 = vsel %vm43_vm0, %v3747_v36, 0.0  ;;  %v1095_v21 = vpop.f32.mrf.mxu3 }
 0x23b   :  { %v1167_v39 = vsel %vm43_vm0, %v1145_v63, 0.0  ;;  %v1125_v20 = vsel %vm43_vm0, %v3754_v4, 0.0 }
 0x23c   :  { %v1116_v25 = vadd.f32 %v1115_v60, %v1114_v33  ;;  %v1168_v58 = vadd.f32 %v1167_v39, %v1166_v9  ;;  %v1177_v7 = vsel %vm43_vm0, %v1150_v32, 0.0 }
 0x23e   :  { %v1118_v28 = vadd.f32 %v1117_v49, %v1116_v25  ;;  %v1170_v62 = vadd.f32 %v1169_v61, %v1168_v58  ;;  %v1027_v52 = vpop.f32.mrf.mxu1  ;;  %v1332_v61 = vld [vmem:[#allocation3] sm:$0xff]  ;;  %v1333_v49 = vld [vmem:[#allocation3 + $0x8] sm:$0x3] }
 0x23f   :  { %v1028_v14 = vadd.f32 %v1027_v52, %v3641_v41  ;;  %v1151_v41 = vmul.f32 %v3754_v4, %v3754_v4  ;;  %v1420_v59 = vrot.slane %v1332_v61, 1  ;;  %1372 = vst.msk [vmem:[#allocation4] sm:$0xff] %vm43_vm0, %v1332_v61  ;;  %v1532_v52 = vrot.slane %v1332_v61, 2 }
 0x240   :  { %v1172_v57 = vadd.f32 %v1171_v12, %v1170_v62  ;;  %v1120_v13 = vadd.f32 %v1119_v48, %v1118_v28  ;;  %v1421_v12 = vrot.slane %v1333_v49, 1  ;;  %v1533_v48 = vrot.slane %v1333_v49, 2 }
 0x241   :  { %v3767_v17 = vadd.f32 %v1092_v45, %v1028_v14  ;;  %v1179_v5 = vsel %vm43_vm0, %v1151_v41, 0.0 }
 0x242   :  { %v1122_v37 = vadd.f32 %v1121_v47, %v1120_v13  ;;  %v1174_v8 = vadd.f32 %v1173_v51, %v1172_v57  ;;  %v1422_v22 = vsel %vm190_vm2, %v1420_v59, %v1421_v12  ;;  %v1534_v13 = vsel %vm304_vm3, %v1532_v52, %v1533_v48  ;;  %v3810_v48 = vld [vmem:[%s4890_s4 + $0x118] sm:$0xff] }
 0x243   :  { %v1152_v10 = vmul.f32 %v3767_v17, %v3767_v17  ;;  %v1127_v9 = vsel %vm43_vm0, %v3767_v17, 0.0  ;;  %1468 = vrot.lane.b32.xlu0 %v1422_v22, %s2647_s27  ;;  %1580 = vrot.lane.b32.xlu1 %v1534_v13, %s2648_s28  ;;  %v3815_v22 = vld [vmem:[%s4890_s4 + $0x110] sm:$0xff] }
 0x244   :  { %v1124_v23 = vadd.f32 %v1123_v11, %v1122_v37  ;;  %v1176_v38 = vadd.f32 %v1175_v27, %v1174_v8  ;;  %2270 = vmatpush.msrb.mxu0 %v3810_v48 }
 0x245   :  { %v1181_v39 = vsel %vm43_vm0, %v1152_v10, 0.0 }
 0x246   :  { %v1126_v50 = vadd.f32 %v1125_v20, %v1124_v23  ;;  %v1178_v29 = vadd.f32 %v1177_v7, %v1176_v38  ;;  %v1030_v56 = vpop.f32.mrf.mxu1  ;;  %v1350_v23 = vld [vmem:[#allocation3 + $0x90] sm:$0xff]  ;;  %2271 = vmatpush.msrb.mxu0 %v3815_v22 }
 0x247   :  { %v1031_v63 = vadd.f32 %v1030_v56, %v3647_v19  ;;  %v1352_v56 = vld [vmem:[#allocation3 + $0xa0] sm:$0xff] }
 0x248   :  { %v1180_v42 = vadd.f32 %v1179_v5, %v1178_v29  ;;  %v1128_v60 = vadd.f32 %v1127_v9, %v1126_v50  ;;  %v1556_v5 = vrot.slane %v1352_v56, 2  ;;  %1380 = vst.msk [vmem:[#allocation4 + $0xc0] sm:$0xff] %vm43_vm0, %v1352_v56 }
 0x249   :  { %v3778_v33 = vadd.f32 %v1095_v21, %v1031_v63  ;;  %v1353_v21 = vld [vmem:[#allocation3 + $0xa8] sm:$0x3]  ;;  %v1444_v63 = vrot.slane %v1352_v56, 1 }
 0x24a   :  { %v1182_v58 = vadd.f32 %v1181_v39, %v1180_v42  ;;  %v1557_v10 = vrot.slane %v1353_v21, 2  ;;  %v1445_v42 = vrot.slane %v1353_v21, 1  ;;  %v1958_v39 = vrot.slane %v1350_v23, 2 }
 0x24b   :  { %v1129_v35 = vsel %vm43_vm0, %v3778_v33, 0.0  ;;  %v1153_v25 = vmul.f32 %v3778_v33, %v3778_v33  ;;  %1836 = vrot.lane.b32.xlu1 %v1350_v23, %s2648_s28 }
 0x24c   :  { %v1130_v45 = vadd.f32 %v1129_v35, %v1128_v60  ;;  %v1888_v60 = vrot.slane %v1350_v23, 1  ;;  %v1351_v35 = vld [vmem:[#allocation3 + $0x98] sm:$0x3] }
 0x24d   :  { %v1183_v19 = vsel %vm43_vm0, %v1153_v25, 0.0  ;;  %v1558_v25 = vsel %vm304_vm3, %v1556_v5, %v1557_v10  ;;  %v1959_v61 = vrot.slane %v1351_v35, 2 }
 0x24e   :  { %v1131_v28 = vrot.slane %v1130_v45, 4  ;;  %v1184_v62 = vadd.f32 %v1183_v19, %v1182_v58  ;;  %v1446_v58 = vsel %vm190_vm2, %v1444_v63, %v1445_v42 }
 0x24f   :  { %1484 = vrot.lane.b32.xlu2 %v1446_v58, %s2647_s27  ;;  %v1960_v59 = vsel %vm304_vm3, %v1958_v39, %v1959_v61 }
 0x250   :  { %v1132_v14 = vadd.f32 %v1131_v28, %v1130_v45  ;;  %v1185_v57 = vrot.slane %v1184_v62, 4  ;;  %v1889_v45 = vrot.slane %v1351_v35, 1  ;;  %1987 = vst.msk [vmem:[#allocation4 + $0xb8] sm:$0xff] %vm43_vm0, %v1960_v59 }
 0x252   :  { %v1133_v51 = vrot.slane %v1132_v14, 2  ;;  %v1186_v47 = vadd.f32 %v1185_v57, %v1184_v62  ;;  %v1890_v19 = vsel %vm190_vm2, %v1888_v60, %v1889_v45  ;;  %v3821_v57 = vld [vmem:[%s4890_s4 + $0x108] sm:$0xff] }
 0x253   :  { %1596 = vrot.lane.b32.xlu1 %v1558_v25, %s2648_s28  ;;  %1908 = vrot.lane.b32.xlu0 %v1890_v19, %s2646_s26 }
 0x254   :  { %v1134_v32 = vadd.f32 %v1133_v51, %v1132_v14  ;;  %v1187_v37 = vrot.slane %v1186_v47, 2  ;;  %2272 = vmatpush.msrb.mxu0 %v3821_v57  ;;  %v3828_v51 = vld [vmem:[%s4890_s4 + $0x100] sm:$0xff] }
 0x256   :  { %v1135_v8 = vrot.slane %v1134_v32, 1  ;;  %v1188_v27 = vadd.f32 %v1187_v37, %v1186_v47  ;;  %v1098_v47 = vld [vmem:[%s4888_s2] sm:$0x1]  ;;  %2273 = vmatpush.msrb.mxu0 %v3828_v51 }
 0x258   :  { %v1136_v11 = vadd.f32 %v1135_v8, %v1134_v32  ;;  %v1189_v41 = vrot.slane %v1188_v27, 1 }
 0x25a   :  { %v3791_v38 = vmul.f32 0.0078125, %v1136_v11  ;;  %v1190_v7 = vadd.f32 %v1189_v41, %v1188_v27  ;;  %v3841_v41 = vld [vmem:[%s4889_s3] ss:$0 sm:$0xff] }
 0x25c   :  { %v1191_v20 = vmul.f32 0.0078125, %v1190_v7  ;;  %v1192_v50 = vmul.f32 %v3791_v38, %v3791_v38  ;;  %v1221_v12 = vsub.f32 %v3767_v17, %v3791_v38  ;;  %v1222_v27 = vsub.f32 %v3778_v33, %v3791_v38 }
 0x25d   :  { %v1208_v23 = vsub.f32 %v3660_v55, %v3791_v38  ;;  %v1207_v7 = vsub.f32 %v3662_v43, %v3791_v38  ;;  %v1211_v33 = vsub.f32 %v3678_v54, %v3791_v38  ;;  %v1213_v56 = vsub.f32 %v3695_v30, %v3791_v38 }
 0x25e   :  { %v1193_v29 = vsub.f32 %v1191_v20, %v1192_v50  ;;  %v1209_v20 = vsub.f32 %v3664_v18, %v3791_v38  ;;  %v1210_v50 = vsub.f32 %v3668_v40, %v3791_v38  ;;  %v1214_v39 = vsub.f32 %v3720_v15, %v3791_v38 }
 0x260   :  { %v1194_v9 = vmax.f32 %v1193_v29, 0.0  ;;  %v1212_v29 = vsub.f32 %v3687_v16, %v3791_v38 }
 0x262   :  { %v1195_v49 = vadd.f32 1e-05, %v1194_v9 }
 0x264   :  { %2615 = vrsqrt.f32 %v1195_v49  ;;  %vm1202_vm8 = vweird.f32 %v1195_v49 }
 0x26a   :  { %v2616_v28 = vpop.eup %2615 }
 0x26b   :  { %v1197_v62 = vmul.f32 %v2616_v28, %v1195_v49  ;;  %vm1203_vm7 = vweird.f32 %v2616_v28 }
 0x26c   :  { %vm1204_vm9 = vmor %vm1202_vm8, %vm1203_vm7 }
 0x26d   :  { %v1198_v52 = vmul.f32 %v2616_v28, %v1197_v62 }
 0x26f   :  { %v1199_v14 = vmul.f32 0.5, %v1198_v52 }
 0x271   :  { %v1200_v13 = vsub.f32 1.5, %v1199_v14 }
 0x273   :  { %v1201_v32 = vmul.f32 %v2616_v28, %v1200_v13 }
 0x275   :  { %v1205_v37 = vsel %vm1204_vm9, %v2616_v28, %v1201_v32 }
 0x276   :  { %v1206_v8 = vmul.f32 %v1205_v37, %v1098_v47 }
 0x278   :  { %v3836_v11 = vperm.slane %v1206_v8, 0 }
 0x27a   :  { %v1239_v55 = vmul.f32 %v3836_v11, %v1222_v27  ;;  %v1225_v21 = vmul.f32 %v3836_v11, %v1208_v23  ;;  %v1224_v43 = vmul.f32 %v3836_v11, %v1207_v7  ;;  %v1226_v18 = vmul.f32 %v3836_v11, %v1209_v20 }
 0x27b   :  { %v1227_v5 = vmul.f32 %v3836_v11, %v1210_v50  ;;  %v1228_v40 = vmul.f32 %v3836_v11, %v1211_v33  ;;  %v1229_v54 = vmul.f32 %v3836_v11, %v1212_v29  ;;  %v1230_v10 = vmul.f32 %v3836_v11, %v1213_v56 }
 0x27c   :  { %v1258_v16 = vadd.f32 %v3841_v41, %v1239_v55  ;;  %v1244_v30 = vadd.f32 %v3841_v41, %v1225_v21  ;;  %v1243_v63 = vadd.f32 %v3841_v41, %v1224_v43  ;;  %v1245_v42 = vadd.f32 %v3841_v41, %v1226_v18 }
 0x27d   :  { %v1246_v9 = vadd.f32 %v3841_v41, %v1227_v5  ;;  %v1247_v60 = vadd.f32 %v3841_v41, %v1228_v40  ;;  %v1248_v45 = vadd.f32 %v3841_v41, %v1229_v54  ;;  %v1249_v49 = vadd.f32 %v3841_v41, %v1230_v10 }
 0x27e   :  { %v1274_v35 = vmax.f32 %v1258_v16, 0.0  ;;  %v1260_v25 = vmax.f32 %v1244_v30, 0.0  ;;  %v1259_v58 = vmax.f32 %v1243_v63, 0.0  ;;  %v1261_v61 = vmax.f32 %v1245_v42, 0.0 }
 0x27f   :  { %v1262_v19 = vmax.f32 %v1246_v9, 0.0  ;;  %v1231_v59 = vmul.f32 %v3836_v11, %v1214_v39  ;;  %v1263_v28 = vmax.f32 %v1247_v60, 0.0  ;;  %v1264_v62 = vmax.f32 %v1248_v45, 0.0 }
 0x280   :  { %1331 = vst.msk [vmem:[#allocation3 + $0x121] sm:$0xff] %vm43_vm0, %v1274_v35  ;;  %v1265_v52 = vmax.f32 %v1249_v49, 0.0  ;;  %v1216_v23 = vsub.f32 %v3716_v53, %v3791_v38  ;;  %v1217_v7 = vsub.f32 %v3725_v0, %v3791_v38  ;;  %v1215_v53 = vsub.f32 %v3709_v34, %v3791_v38 }
 0x281   :  { %1317 = vst.msk [vmem:[#allocation3 + $0x21] sm:$0xff] %vm43_vm0, %v1260_v25  ;;  %v1250_v15 = vadd.f32 %v3841_v41, %v1231_v59  ;;  %v1218_v18 = vsub.f32 %v3737_v46, %v3791_v38  ;;  %v1219_v16 = vsub.f32 %v3747_v36, %v3791_v38 }
 0x282   :  { %1316 = vst.msk [vmem:[#allocation3 + $0x11] sm:$0xff] %vm43_vm0, %v1259_v58  ;;  %v1233_v58 = vmul.f32 %v3836_v11, %v1216_v23 }
 0x283   :  { %1318 = vst.msk [vmem:[#allocation3 + $0x31] sm:$0xff] %vm43_vm0, %v1261_v61  ;;  %v1266_v14 = vmax.f32 %v1250_v15, 0.0 }
 0x284   :  { %1319 = vst.msk [vmem:[#allocation3 + $0x41] sm:$0xff] %vm43_vm0, %v1262_v19 }
 0x285   :  { %1320 = vst.msk [vmem:[#allocation3 + $0x51] sm:$0xff] %vm43_vm0, %v1263_v28  ;;  %v1234_v28 = vmul.f32 %v3836_v11, %v1217_v7 }
 0x286   :  { %1321 = vst.msk [vmem:[#allocation3 + $0x61] sm:$0xff] %vm43_vm0, %v1264_v62 }
 0x287   :  { %1322 = vst.msk [vmem:[#allocation3 + $0x71] sm:$0xff] %vm43_vm0, %v1265_v52 }
 0x288   :  { %v3885_v13 = vld [vmem:[#allocation3 + $0x20] sm:$0xff]  ;;  %v1337_v47 = vld [vmem:[#allocation3 + $0x28] sm:$0x3]  ;;  %1323 = vst.msk [vmem:[#allocation3 + $0x81] sm:$0xff] %vm43_vm0, %v1266_v14 }
 0x289   :  { %v1539_v32 = vrot.slane %v1337_v47, 2  ;;  %1822 = vrot.lane.b32.xlu1 %v3885_v13, %s2648_s28  ;;  %v1538_v37 = vrot.slane %v3885_v13, 2  ;;  %1374 = vst.msk [vmem:[#allocation4 + $0x30] sm:$0xff] %vm43_vm0, %v3885_v13  ;;  %v3893_v8 = vld [vmem:[#allocation3 + $0x10] sm:$0xff]  ;;  %v3895_v27 = vld [vmem:[#allocation3 + $0x18] sm:$0x3] }
 0x28a   :  { %1646 = vrot.lane.b32.xlu2 %v3893_v8, %s2646_s26  ;;  %1373 = vst.msk [vmem:[#allocation4 + $0x18] sm:$0xff] %vm43_vm0, %v3893_v8  ;;  %v1535_v20 = vrot.slane %v3893_v8, 2  ;;  %v1536_v50 = vrot.slane %v3895_v27, 2  ;;  %v3907_v33 = vld [vmem:[#allocation3 + $0x30] sm:$0xff]  ;;  %v1426_v29 = vrot.slane %v3885_v13, 1  ;;  %v1427_v21 = vrot.slane %v1337_v47, 1 }
 0x28b   :  { %v3913_v56 = vsel %vm304_vm3, %v1538_v37, %v1539_v32  ;;  %v1339_v0 = vld [vmem:[#allocation3 + $0x38] sm:$0x3]  ;;  %v1541_v55 = vrot.slane %v3907_v33, 2  ;;  %1375 = vst.msk [vmem:[#allocation4 + $0x48] sm:$0xff] %vm43_vm0, %v3907_v33  ;;  %v3918_v43 = vld [vmem:[#allocation3 + $0x40] sm:$0xff]  ;;  %v1429_v9 = vrot.slane %v3907_v33, 1 }
 0x28c   :  { %1980 = vst.msk [vmem:[#allocation4 + $0x10] sm:$0xff] %vm43_vm0, %v3913_v56  ;;  %v3925_v34 = vsel %vm304_vm3, %v1535_v20, %v1536_v50  ;;  %v1542_v5 = vrot.slane %v1339_v0, 2  ;;  %v1341_v40 = vld [vmem:[#allocation3 + $0x48] sm:$0x3]  ;;  %v1544_v54 = vrot.slane %v3918_v43, 2  ;;  %v3928_v10 = vld [vmem:[#allocation3 + $0x50] sm:$0xff]  ;;  %v3935_v46 = vsel %vm190_vm2, %v1426_v29, %v1427_v21 }
 0x28d   :  { %1756 = vrot.lane.b32.xlu0 %v3925_v34, %s2647_s27  ;;  %v1545_v30 = vrot.slane %v1341_v40, 2  ;;  %1376 = vst.msk [vmem:[#allocation4 + $0x60] sm:$0xff] %vm43_vm0, %v3918_v43  ;;  %v1343_v63 = vld [vmem:[#allocation3 + $0x58] sm:$0x3]  ;;  %v1547_v42 = vrot.slane %v3928_v10, 2  ;;  %v1430_v39 = vrot.slane %v1339_v0, 1  ;;  %v1232_v20 = vmul.f32 %v3836_v11, %v1215_v53 }
 0x28e   :  { %v3942_v60 = vsel %vm304_vm3, %v1541_v55, %v1542_v5  ;;  %1735 = vst.msk [vmem:[#allocation4 + $0x20] sm:$0xff] %vm43_vm0, %v3935_v46  ;;  %v1548_v36 = vrot.slane %v1343_v63, 2  ;;  %v3946_v35 = vld [vmem:[#allocation3 + $0x60] sm:$0xff]  ;;  %v3948_v25 = vld [vmem:[#allocation3 + $0x68] sm:$0x3]  ;;  %v3958_v19 = vld [vmem:[#allocation3 + $0x70] sm:$0xff]  ;;  %v1252_v0 = vadd.f32 %v3841_v41, %v1233_v58  ;;  %v1235_v55 = vmul.f32 %v3836_v11, %v1218_v18 }
 0x28f   :  { %1981 = vst.msk [vmem:[#allocation4 + $0x28] sm:$0xff] %vm43_vm0, %v3942_v60  ;;  %v3954_v45 = vsel %vm304_vm3, %v1544_v54, %v1545_v30  ;;  %v1550_v61 = vrot.slane %v3946_v35, 2  ;;  %v1551_v49 = vrot.slane %v3948_v25, 2  ;;  %v3960_v59 = vld [vmem:[#allocation3 + $0x78] sm:$0x3]  ;;  %v3969_v15 = vsel %vm190_vm2, %v1429_v9, %v1430_v39  ;;  %v3973_v47 = vld [vmem:[#allocation3 + $0x80] sm:$0xff] }
 0x290   :  { %1982 = vst.msk [vmem:[#allocation4 + $0x40] sm:$0xff] %vm43_vm0, %v3954_v45  ;;  %v3966_v62 = vsel %vm304_vm3, %v1547_v42, %v1548_v36  ;;  %v1553_v52 = vrot.slane %v3958_v19, 2  ;;  %v1554_v14 = vrot.slane %v3960_v59, 2  ;;  %v3975_v32 = vld [vmem:[#allocation3 + $0x88] sm:$0x3]  ;;  %v1432_v23 = vrot.slane %v3918_v43, 1 }
 0x291   :  { %1824 = vrot.lane.b32.xlu1 %v3907_v33, %s2648_s28  ;;  %1983 = vst.msk [vmem:[#allocation4 + $0x58] sm:$0xff] %vm43_vm0, %v3966_v62  ;;  %v3982_v37 = vsel %vm304_vm3, %v1550_v61, %v1551_v49  ;;  %v1433_v7 = vrot.slane %v1341_v40, 1  ;;  %v1750_v50 = vrot.slane %v3973_v47, 2  ;;  %v1751_v29 = vrot.slane %v3975_v32, 2 }
 0x292   :  { %1648 = vrot.lane.b32.xlu2 %v3885_v13, %s2646_s26  ;;  %1377 = vst.msk [vmem:[#allocation4 + $0x78] sm:$0xff] %vm43_vm0, %v3928_v10  ;;  %v3997_v53 = vsel %vm304_vm3, %v1553_v52, %v1554_v14  ;;  %v1236_v13 = vmul.f32 %v3836_v11, %v1219_v16  ;;  %v1220_v5 = vsub.f32 %v3754_v4, %v3791_v38  ;;  %v1435_v40 = vrot.slane %v3928_v10, 1 }
 0x293   :  { %v1998_v21 = vld [vmem:[#allocation4 + $0x10] sm:$0xff]  ;;  %1736 = vst.msk [vmem:[#allocation4 + $0x38] sm:$0xff] %vm43_vm0, %v3969_v15  ;;  %v1436_v18 = vrot.slane %v1343_v63, 1  ;;  %v1253_v54 = vadd.f32 %v3841_v41, %v1234_v28  ;;  %v4012_v16 = vsel %vm190_vm2, %v1432_v23, %v1433_v7  ;;  %v1251_v4 = vadd.f32 %v3841_v41, %v1232_v20 }
 0x294   :  { %2566 = vmatmul.msk.f32.vlgmr.msrb.gmra.mxu0 %vm43_vm0, %v1998_v21  ;;  %1984 = vst.msk [vmem:[#allocation4 + $0x70] sm:$0xff] %vm43_vm0, %v3982_v37  ;;  %v1237_v30 = vmul.f32 %v3836_v11, %v1220_v5  ;;  %v4019_v63 = vsel %vm304_vm3, %v1750_v50, %v1751_v29  ;;  %v1268_v42 = vmax.f32 %v1252_v0, 0.0  ;;  %v1254_v9 = vadd.f32 %v3841_v41, %v1235_v55 }
 0x295   :  { %1894 = vrot.lane.b32.xlu0 %v3935_v46, %s2646_s26  ;;  %1378 = vst.msk [vmem:[#allocation4 + $0x90] sm:$0xff] %vm43_vm0, %v3946_v35  ;;  %v1255_v36 = vadd.f32 %v3841_v41, %v1236_v13  ;;  %v4028_v39 = vsel %vm190_vm2, %v1435_v40, %v1436_v18  ;;  %v1269_v58 = vmax.f32 %v1253_v54, 0.0  ;;  %v1438_v61 = vrot.slane %v3946_v35, 1 }
 0x296   :  { %1985 = vst.msk [vmem:[#allocation4 + $0x88] sm:$0xff] %vm43_vm0, %v3997_v53  ;;  %v1439_v49 = vrot.slane %v3948_v25, 1  ;;  %v1267_v28 = vmax.f32 %v1251_v4, 0.0  ;;  %v1256_v52 = vadd.f32 %v3841_v41, %v1237_v30  ;;  %v1270_v14 = vmax.f32 %v1254_v9, 0.0  ;;  %v2001_v23 = vld [vmem:[#allocation4 + $0x28] sm:$0xff]  ;;  %v4104_v9 = vld [vmem:[#allocation3 + $0x120] sm:$0xff] }
 0x297   :  { %1379 = vst.msk [vmem:[#allocation4 + $0xa8] sm:$0xff] %vm43_vm0, %v3958_v19  ;;  %v1271_v7 = vmax.f32 %v1255_v36, 0.0  ;;  %v1441_v20 = vrot.slane %v3958_v19, 1  ;;  %v1442_v50 = vrot.slane %v3960_v59, 1  ;;  %v1238_v55 = vmul.f32 %v3836_v11, %v1221_v12  ;;  %v2004_v5 = vld [vmem:[#allocation4 + $0x40] sm:$0xff] }
 0x298   :  { %1737 = vst.msk [vmem:[#allocation4 + $0x50] sm:$0xff] %vm43_vm0, %v4012_v16  ;;  %v4045_v25 = vsel %vm190_vm2, %v1438_v61, %v1439_v49  ;;  %v4113_v49 = vld [vmem:[#allocation3 + $0x128] sm:$0x3] }
 0x299   :  { %1826 = vrot.lane.b32.xlu1 %v3918_v43, %s2648_s28  ;;  %1986 = vst.msk [vmem:[#allocation4 + $0xa0] sm:$0xff] %vm43_vm0, %v4019_v63  ;;  %v4057_v29 = vsel %vm190_vm2, %v1441_v20, %v1442_v50 }
 0x29a   :  { %1650 = vrot.lane.b32.xlu2 %v3907_v33, %s2646_s26  ;;  %1325 = vst.msk [vmem:[#allocation3 + $0xc1] sm:$0xff] %vm43_vm0, %v1268_v42  ;;  %v1272_v33 = vmax.f32 %v1256_v52, 0.0  ;;  %v1257_v42 = vadd.f32 %v3841_v41, %v1238_v55 }
 0x29b   :  { %1738 = vst.msk [vmem:[#allocation4 + $0x68] sm:$0xff] %vm43_vm0, %v4028_v39 }
 0x29c   :  { %2567 = vmatmul.msk.f32.gmra.mxu0 %vm43_vm0, %v2001_v23  ;;  %1326 = vst.msk [vmem:[#allocation3 + $0xd1] sm:$0xff] %vm43_vm0, %v1269_v58  ;;  %v1713_v23 = vrot.slane %v3975_v32, 1 }
 0x29d   :  { %1758 = vrot.lane.b32.xlu0 %v3913_v56, %s2647_s27  ;;  %1324 = vst.msk [vmem:[#allocation3 + $0xb1] sm:$0xff] %vm43_vm0, %v1267_v28 }
 0x29e   :  { %1327 = vst.msk [vmem:[#allocation3 + $0xe1] sm:$0xff] %vm43_vm0, %v1270_v14  ;;  %v1712_v14 = vrot.slane %v3973_v47, 1 }
 0x29f   :  { %1739 = vst.msk [vmem:[#allocation4 + $0x80] sm:$0xff] %vm43_vm0, %v4045_v25 }
 0x2a0   :  { %1328 = vst.msk [vmem:[#allocation3 + $0xf1] sm:$0xff] %vm43_vm0, %v1271_v7 }
 0x2a1   :  { %1828 = vrot.lane.b32.xlu1 %v3928_v10, %s2648_s28  ;;  %v4061_v59 = vld [vmem:[#allocation3 + $0xc0] sm:$0xff]  ;;  %v4063_v0 = vld [vmem:[#allocation3 + $0xc8] sm:$0x3]  ;;  %1329 = vst.msk [vmem:[#allocation3 + $0x101] sm:$0xff] %vm43_vm0, %v1272_v33 }
 0x2a2   :  { %1652 = vrot.lane.b32.xlu2 %v3918_v43, %s2646_s26  ;;  %v1562_v21 = vrot.slane %v4061_v59, 2  ;;  %v1563_v13 = vrot.slane %v4063_v0, 2  ;;  %1382 = vst.msk [vmem:[#allocation4 + $0xf0] sm:$0xff] %vm43_vm0, %v4061_v59 }
 0x2a3   :  { %v4076_v40 = vld [vmem:[#allocation3 + $0xd0] sm:$0xff]  ;;  %v4078_v18 = vld [vmem:[#allocation3 + $0xd8] sm:$0x3]  ;;  %1740 = vst.msk [vmem:[#allocation4 + $0x98] sm:$0xff] %vm43_vm0, %v4057_v29 }
 0x2a4   :  { %2568 = vmatmul.msk.f32.gmra.mxu0 %vm43_vm0, %v2004_v5  ;;  %v4084_v17 = vsel %vm304_vm3, %v1562_v21, %v1563_v13  ;;  %v1565_v38 = vrot.slane %v4076_v40, 2  ;;  %v1566_v12 = vrot.slane %v4078_v18, 2  ;;  %1383 = vst.msk [vmem:[#allocation4 + $0x108] sm:$0xff] %vm43_vm0, %v4076_v40  ;;  %v4090_v11 = vld [vmem:[#allocation3 + $0xb0] sm:$0xff]  ;;  %v4092_v43 = vld [vmem:[#allocation3 + $0xb8] sm:$0x3] }
 0x2a5   :  { %1896 = vrot.lane.b32.xlu0 %v3969_v15, %s2646_s26  ;;  %1988 = vst.msk [vmem:[#allocation4 + $0xd0] sm:$0xff] %vm43_vm0, %v4084_v17  ;;  %v1559_v54 = vrot.slane %v4090_v11, 2  ;;  %v4099_v4 = vld [vmem:[#allocation3 + $0xe0] sm:$0xff]  ;;  %v4101_v30 = vld [vmem:[#allocation3 + $0xe8] sm:$0x3]  ;;  %v1560_v28 = vrot.slane %v4092_v43, 2 }
 0x2a6   :  { %v4107_v36 = vsel %vm304_vm3, %v1565_v38, %v1566_v12  ;;  %1381 = vst.msk [vmem:[#allocation4 + $0xd8] sm:$0xff] %vm43_vm0, %v4090_v11  ;;  %v1568_v58 = vrot.slane %v4099_v4, 2  ;;  %v1569_v61 = vrot.slane %v4101_v30, 2  ;;  %v1423_v13 = vrot.slane %v3893_v8, 1 }
 0x2a7   :  { %1989 = vst.msk [vmem:[#allocation4 + $0xe8] sm:$0xff] %vm43_vm0, %v4107_v36  ;;  %v4118_v41 = vld [vmem:[#allocation3 + $0xf0] sm:$0xff]  ;;  %v4120_v52 = vld [vmem:[#allocation3 + $0xf8] sm:$0x3]  ;;  %v4136_v21 = vsel %vm304_vm3, %v1559_v54, %v1560_v28  ;;  %v1424_v38 = vrot.slane %v3895_v27, 1  ;;  %v1273_v8 = vmax.f32 %v1257_v42, 0.0  ;;  %v4166_v42 = vsel %vm190_vm2, %v1712_v14, %v1713_v23 }
 0x2a8   :  { %v4125_v7 = vsel %vm304_vm3, %v1568_v58, %v1569_v61  ;;  %1384 = vst.msk [vmem:[#allocation4 + $0x120] sm:$0xff] %vm43_vm0, %v4099_v4  ;;  %v1571_v20 = vrot.slane %v4118_v41, 2  ;;  %v1572_v50 = vrot.slane %v4120_v52, 2  ;;  %v4131_v33 = vld [vmem:[#allocation3 + $0x100] sm:$0xff]  ;;  %v4133_v55 = vld [vmem:[#allocation3 + $0x108] sm:$0x3] }
 0x2a9   :  { %1830 = vrot.lane.b32.xlu1 %v3946_v35, %s2648_s28  ;;  %1990 = vst.msk [vmem:[#allocation4 + $0x100] sm:$0xff] %vm43_vm0, %v4125_v7  ;;  %v1574_v32 = vrot.slane %v4131_v33, 2  ;;  %v1575_v5 = vrot.slane %v4133_v55, 2  ;;  %v1753_v54 = vrot.slane %v4104_v9, 2  ;;  %v1754_v58 = vrot.slane %v4113_v49, 2  ;;  %v2007_v61 = vld [vmem:[#allocation4 + $0x58] sm:$0xff] }
 0x2aa   :  { %1654 = vrot.lane.b32.xlu2 %v3928_v10, %s2646_s26  ;;  %v4149_v12 = vsel %vm304_vm3, %v1571_v20, %v1572_v50  ;;  %1385 = vst.msk [vmem:[#allocation4 + $0x138] sm:$0xff] %vm43_vm0, %v4118_v41  ;;  %v1450_v10 = vrot.slane %v4061_v59, 1  ;;  %v1451_v28 = vrot.slane %v4063_v0, 1  ;;  %v1453_v20 = vrot.slane %v4076_v40, 1  ;;  %v2058_v0 = vld [vmem:[%s4890_s4 + $0x70] sm:$0xff] }
 0x2ab   :  { %1991 = vst.msk [vmem:[#allocation4 + $0x118] sm:$0xff] %vm43_vm0, %v4149_v12  ;;  %v4158_v27 = vsel %vm304_vm3, %v1574_v32, %v1575_v5  ;;  %v1454_v50 = vrot.slane %v4078_v18, 1  ;;  %v2059_v32 = vld [vmem:[%s4890_s4 + $0x78] sm:$0xff]  ;;  %v4181_v14 = vsel %vm190_vm2, %v1423_v13, %v1424_v38  ;;  %v1456_v23 = vrot.slane %v4099_v4, 1  ;;  %v2057_v13 = vld [vmem:[%s4890_s4 + $0x68] sm:$0xff] }
 0x2ac   :  { %2569 = vmatmul.msk.f32.gmra.mxu0 %vm43_vm0, %v2007_v61  ;;  %1992 = vst.msk [vmem:[#allocation4 + $0x130] sm:$0xff] %vm43_vm0, %v4158_v27  ;;  %v1457_v18 = vrot.slane %v4101_v30, 1  ;;  %2128 = vmatpush.msrb.mxu3 %v2059_v32  ;;  %v4187_v5 = vsel %vm304_vm3, %v1753_v54, %v1754_v58  ;;  %v1459_v61 = vrot.slane %v4118_v41, 1  ;;  %v1460_v6 = vrot.slane %v4120_v52, 1  ;;  %v2056_v58 = vld [vmem:[%s4890_s4 + $0x60] sm:$0xff] }
 0x2ad   :  { %1760 = vrot.lane.b32.xlu0 %v3942_v60, %s2647_s27  ;;  %1386 = vst.msk [vmem:[#allocation4 + $0x150] sm:$0xff] %vm43_vm0, %v4131_v33  ;;  %v1447_v44 = vrot.slane %v4090_v11, 1  ;;  %v4198_v30 = vsel %vm190_vm2, %v1450_v10, %v1451_v28  ;;  %v1448_v38 = vrot.slane %v4092_v43, 1  ;;  %v4204_v52 = vsel %vm190_vm2, %v1453_v20, %v1454_v50  ;;  %v2010_v50 = vld [vmem:[#allocation4 + $0x70] sm:$0xff] }
 0x2ae   :  { %1330 = vst.msk [vmem:[#allocation3 + $0x111] sm:$0xff] %vm43_vm0, %v1273_v8  ;;  %2129 = vmatpush.msrb.mxu3 %v2058_v0  ;;  %v4211_v8 = vsel %vm190_vm2, %v1456_v23, %v1457_v18  ;;  %v1462_v54 = vrot.slane %v4131_v33, 1  ;;  %v1463_v43 = vrot.slane %v4133_v55, 1  ;;  %v4223_v10 = vsel %vm190_vm2, %v1459_v61, %v1460_v6  ;;  %v2055_v6 = vld [vmem:[%s4890_s4 + $0x58] sm:$0xff]  ;;  %v2053_v23 = vld [vmem:[%s4890_s4 + $0x48] sm:$0xff] }
 0x2af   :  { %1741 = vst.msk [vmem:[#allocation4 + $0xb0] sm:$0xff] %vm43_vm0, %v4166_v42  ;;  %v1715_v28 = vrot.slane %v4104_v9, 1  ;;  %v1716_v20 = vrot.slane %v4113_v49, 1  ;;  %v2054_v49 = vld [vmem:[%s4890_s4 + $0x50] sm:$0xff] }
 0x2b0   :  { %1734 = vst.msk [vmem:[#allocation4 + $0x8] sm:$0xff] %vm43_vm0, %v4181_v14  ;;  %2130 = vmatpush.msrb.mxu3 %v2057_v13 }
 0x2b1   :  { %1832 = vrot.lane.b32.xlu1 %v3958_v19, %s2648_s28  ;;  %1994 = vst.msk [vmem:[#allocation4 + $0x160] sm:$0xff] %vm43_vm0, %v4187_v5  ;;  %v4253_v0 = vsel %vm190_vm2, %v1715_v28, %v1716_v20  ;;  %v2013_v28 = vld [vmem:[#allocation4 + $0x88] sm:$0xff]  ;;  %v1485_v20 = vpop.permute.xlu2 %1484 }
 0x2b2   :  { %1656 = vrot.lane.b32.xlu2 %v3946_v35, %s2646_s26  ;;  %1743 = vst.msk [vmem:[#allocation4 + $0xe0] sm:$0xff] %vm43_vm0, %v4198_v30  ;;  %v4230_v35 = vsel %vm190_vm2, %v1447_v44, %v1448_v38  ;;  %2131 = vmatpush.msrb.mxu3 %v2056_v58  ;;  %v4246_v44 = vsel %vm190_vm2, %v1462_v54, %v1463_v43  ;;  %v2052_v58 = vld [vmem:[%s4890_s4 + $0x40] sm:$0xff] }
 0x2b3   :  { %1744 = vst.msk [vmem:[#allocation4 + $0xf8] sm:$0xff] %vm43_vm0, %v4204_v52 }
 0x2b4   :  { %2570 = vmatmul.msk.f32.gmra.mxu0 %vm43_vm0, %v2010_v50  ;;  %1745 = vst.msk [vmem:[#allocation4 + $0x110] sm:$0xff] %vm43_vm0, %v4211_v8  ;;  %2132 = vmatpush.msrb.mxu3 %v2055_v6  ;;  %v2050_v50 = vld [vmem:[%s4890_s4 + $0x30] sm:$0xff]  ;;  %v2049_v6 = vld [vmem:[%s4890_s4 + $0x28] sm:$0xff] }
 0x2b5   :  { %1898 = vrot.lane.b32.xlu0 %v4012_v16, %s2646_s26  ;;  %1746 = vst.msk [vmem:[#allocation4 + $0x128] sm:$0xff] %vm43_vm0, %v4223_v10  ;;  %v4248_v55 = vld [vmem:[#allocation3 + $0x110] sm:$0xff]  ;;  %v1367_v32 = vld [vmem:[#allocation3 + $0x118] sm:$0x3] }
 0x2b6   :  { %1742 = vst.msk [vmem:[#allocation4 + $0xc8] sm:$0xff] %vm43_vm0, %v4230_v35  ;;  %v1577_v18 = vrot.slane %v4248_v55, 2  ;;  %v1578_v61 = vrot.slane %v1367_v32, 2  ;;  %v1465_v13 = vrot.slane %v4248_v55, 1  ;;  %v1466_v38 = vrot.slane %v1367_v32, 1  ;;  %2133 = vmatpush.msrb.mxu3 %v2054_v49  ;;  %v1469_v49 = vpop.permute.xlu0 %1468  ;;  %v2048_v32 = vld [vmem:[%s4890_s4 + $0x20] sm:$0xff] }
 0x2b7   :  { %1387 = vst.msk [vmem:[#allocation4 + $0x168] sm:$0xff] %vm43_vm0, %v4248_v55 }
 0x2b8   :  { %1747 = vst.msk [vmem:[#allocation4 + $0x140] sm:$0xff] %vm43_vm0, %v4246_v44  ;;  %v4267_v54 = vsel %vm304_vm3, %v1577_v18, %v1578_v61  ;;  %v4270_v43 = vsel %vm190_vm2, %v1465_v13, %v1466_v38  ;;  %2134 = vmatpush.msrb.mxu3 %v2053_v23  ;;  %v2016_v23 = vld [vmem:[#allocation4 + $0xa0] sm:$0xff]  ;;  %v1581_v18 = vpop.permute.xlu1 %1580  ;;  %v2046_v61 = vld [vmem:[%s4890_s4 + $0x10] sm:$0xff]  ;;  %v2045_v13 = vld [vmem:[%s4890_s4 + $0x8] sm:$0xff] }
 0x2b9   :  { %1834 = vrot.lane.b32.xlu1 %v3973_v47, %s2648_s28  ;;  %1749 = vst.msk [vmem:[#allocation4 + $0x170] sm:$0xff] %vm43_vm0, %v4253_v0  ;;  %v2019_v38 = vld [vmem:[#allocation4 + $0xb8] sm:$0xff] }
 0x2ba   :  { %1658 = vrot.lane.b32.xlu2 %v3958_v19, %s2646_s26  ;;  %1993 = vst.msk [vmem:[#allocation4 + $0x148] sm:$0xff] %vm43_vm0, %v4267_v54  ;;  %2135 = vmatpush.msrb.mxu3 %v2052_v58  ;;  %v2051_v19 = vld [vmem:[%s4890_s4 + $0x38] sm:$0xff]  ;;  %v2044_v58 = vld [vmem:[%s4890_s4] sm:$0xff] }
 0x2bb   :  { %1748 = vst.msk [vmem:[#allocation4 + $0x158] sm:$0xff] %vm43_vm0, %v4270_v43 }
 0x2bc   :  { %2571 = vmatmul.msk.f32.gmra.mxu0 %vm43_vm0, %v2013_v28  ;;  %1524 = vst.msk [vmem:[#allocation4 + $0xc0] sm:$0xff] %vm287_vm4, %v1485_v20  ;;  %2136 = vmatpush.msrb.mxu3 %v2051_v19  ;;  %v2075_v20 = vld [vmem:[%s4890_s4 + $0xf8] sm:$0xff]  ;;  %v2022_v19 = vld [vmem:[#allocation4 + $0xd0] sm:$0xff] }
 0x2bd   :  { %1762 = vrot.lane.b32.xlu0 %v3954_v45, %s2647_s27  ;;  %1516 = vst.msk [vmem:[#allocation4] sm:$0xff] %vm287_vm4, %v1469_v49  ;;  %2193 = vmatpush.msrb.mxu2 %v2075_v20  ;;  %v2067_v49 = vld [vmem:[%s4890_s4 + $0xb8] sm:$0xff] }
 0x2be   :  { %2137 = vmatpush.msrb.mxu3 %v2050_v50  ;;  %1628 = vst.msk [vmem:[#allocation4] sm:$0xff] %vm401_vm5, %v1581_v18  ;;  %v2025_v50 = vld [vmem:[#allocation4 + $0xe8] sm:$0xff] }
 0x2c0   :  { %2138 = vmatpush.msrb.mxu3 %v2049_v6  ;;  %v4325_v28 = vpop.permute.xlu1 %1836  ;;  %v2069_v6 = vld [vmem:[%s4890_s4 + $0xc8] sm:$0xff] }
 0x2c1   :  { %1838 = vrot.lane.b32.xlu1 %v4061_v59, %s2648_s28 }
 0x2c2   :  { %1660 = vrot.lane.b32.xlu2 %v3973_v47, %s2646_s26  ;;  %2139 = vmatpush.msrb.mxu3 %v2048_v32  ;;  %v2047_v47 = vld [vmem:[%s4890_s4 + $0x18] sm:$0xff]  ;;  %v2066_v32 = vld [vmem:[%s4890_s4 + $0xb0] sm:$0xff] }
 0x2c4   :  { %2572 = vmatmul.msk.f32.gmra.mxu0 %vm43_vm0, %v2016_v23  ;;  %2140 = vmatpush.msrb.mxu3 %v2047_v47  ;;  %v2028_v23 = vld [vmem:[#allocation4 + $0x100] sm:$0xff]  ;;  %v2065_v47 = vld [vmem:[%s4890_s4 + $0xa8] sm:$0xff] }
 0x2c5   :  { %1900 = vrot.lane.b32.xlu0 %v4028_v39, %s2646_s26 }
 0x2c6   :  { %2141 = vmatpush.msrb.mxu3 %v2046_v61  ;;  %v2063_v61 = vld [vmem:[%s4890_s4 + $0x98] sm:$0xff] }
 0x2c8   :  { %2142 = vmatpush.msrb.mxu3 %v2045_v13  ;;  %v2062_v13 = vld [vmem:[%s4890_s4 + $0x90] sm:$0xff] }
 0x2c9   :  { %1840 = vrot.lane.b32.xlu1 %v4076_v40, %s2648_s28 }
 0x2ca   :  { %1662 = vrot.lane.b32.xlu2 %v4090_v11, %s2646_s26  ;;  %2143 = vmatpush.msrb.mxu3 %v2044_v58  ;;  %v2074_v11 = vld [vmem:[%s4890_s4 + $0xf0] sm:$0xff] }
 0x2cb   :  { %2194 = vmatpush.msrb.mxu2 %v2074_v11  ;;  %v2061_v11 = vld [vmem:[%s4890_s4 + $0x88] sm:$0xff] }
 0x2cc   :  { %2573 = vmatmul.msk.f32.gmra.mxu0 %vm43_vm0, %v2019_v38  ;;  %2602 = vmatpush.msra.mxu3 %v3810_v48  ;;  %v1597_v48 = vpop.permute.xlu1 %1596  ;;  %v2031_v38 = vld [vmem:[#allocation4 + $0x118] sm:$0xff] }
 0x2cd   :  { %1764 = vrot.lane.b32.xlu0 %v3966_v62, %s2647_s27  ;;  %1636 = vst.msk [vmem:[#allocation4 + $0xc0] sm:$0xff] %vm401_vm5, %v1597_v48 }
 0x2ce   :  { %2603 = vmatpush.msra.mxu3 %v3815_v22  ;;  %v2073_v22 = vld [vmem:[%s4890_s4 + $0xe8] sm:$0xff] }
 0x2cf   :  { %2195 = vmatpush.msrb.mxu2 %v2073_v22  ;;  %v4422_v22 = vpop.permute.xlu0 %1908 }
 0x2d0   :  { %2604 = vmatpush.msra.mxu3 %v3821_v57  ;;  %v2072_v57 = vld [vmem:[%s4890_s4 + $0xe0] sm:$0xff] }
 0x2d1   :  { %1842 = vrot.lane.b32.xlu1 %v4099_v4, %s2648_s28  ;;  %2196 = vmatpush.msrb.mxu2 %v2072_v57  ;;  %v2037_v57 = vld [vmem:[#allocation4 + $0x148] sm:$0xff] }
 0x2d2   :  { %1664 = vrot.lane.b32.xlu2 %v4061_v59, %s2646_s26  ;;  %2605 = vmatpush.msra.mxu3 %v3828_v51  ;;  %v2071_v51 = vld [vmem:[%s4890_s4 + $0xd8] sm:$0xff]  ;;  %v2070_v59 = vld [vmem:[%s4890_s4 + $0xd0] sm:$0xff] }
 0x2d3   :  { %2197 = vmatpush.msrb.mxu2 %v2071_v51 }
 0x2d4   :  { %2574 = vmatmul.msk.f32.gmra.mxu0 %vm43_vm0, %v2022_v19  ;;  %v2034_v19 = vld [vmem:[#allocation4 + $0x130] sm:$0xff] }
 0x2d5   :  { %1902 = vrot.lane.b32.xlu0 %v4045_v25, %s2646_s26  ;;  %2198 = vmatpush.msrb.mxu2 %v2070_v59 }
 0x2d7   :  { %2199 = vmatpush.msrb.mxu2 %v2069_v6 }
 0x2d9   :  { %1844 = vrot.lane.b32.xlu1 %v4118_v41, %s2648_s28 }
 0x2da   :  { %1666 = vrot.lane.b32.xlu2 %v4076_v40, %s2646_s26  ;;  %v2068_v40 = vld [vmem:[%s4890_s4 + $0xc0] sm:$0xff] }
 0x2db   :  { %2200 = vmatpush.msrb.mxu2 %v2068_v40 }
 0x2dc   :  { %2575 = vmatmul.msk.f32.gmra.mxu0 %vm43_vm0, %v2025_v50 }
 0x2dd   :  { %1766 = vrot.lane.b32.xlu0 %v3982_v37, %s2647_s27  ;;  %2201 = vmatpush.msrb.mxu2 %v2067_v49 }
 0x2df   :  { %2202 = vmatpush.msrb.mxu2 %v2066_v32 }
 0x2e1   :  { %1846 = vrot.lane.b32.xlu1 %v4131_v33, %s2648_s28  ;;  %2203 = vmatpush.msrb.mxu2 %v2065_v47 }
 0x2e2   :  { %1668 = vrot.lane.b32.xlu2 %v4099_v4, %s2646_s26  ;;  %v2064_v4 = vld [vmem:[%s4890_s4 + $0xa0] sm:$0xff] }
 0x2e3   :  { %2204 = vmatpush.msrb.mxu2 %v2064_v4 }
 0x2e4   :  { %v1647_v18 = vpop.permute.xlu2 %1646  ;;  %2576 = vmatmul.msk.f32.gmra.mxu0 %vm43_vm0, %v2028_v23 }
 0x2e5   :  { %1694 = vst.msk [vmem:[#allocation4] sm:$0xff] %vm468_vm6, %v1647_v18  ;;  %1904 = vrot.lane.b32.xlu0 %v4057_v29, %s2646_s26  ;;  %2205 = vmatpush.msrb.mxu2 %v2063_v61 }
 0x2e7   :  { %2206 = vmatpush.msrb.mxu2 %v2062_v13 }
 0x2e9   :  { %1848 = vrot.lane.b32.xlu1 %v4248_v55, %s2648_s28  ;;  %2207 = vmatpush.msrb.mxu2 %v2061_v11 }
 0x2ea   :  { %1670 = vrot.lane.b32.xlu2 %v4118_v41, %s2646_s26  ;;  %v2060_v41 = vld [vmem:[%s4890_s4 + $0x80] sm:$0xff] }
 0x2eb   :  { %2208 = vmatpush.msrb.mxu2 %v2060_v41  ;;  %v1370_v41 = vld [vmem:[#allocation3 + $0x130] sm:$0xff] }
 0x2ec   :  { %v4402_v58 = vpop.permute.xlu2 %1648  ;;  %v1996_v20 = vld [vmem:[#allocation4] sm:$0xff]  ;;  %2577 = vmatmul.msk.f32.gmra.mxu0 %vm43_vm0, %v2031_v38 }
 0x2ed   :  { %2144 = vmatmul.f32.vlgmr.msrb.gmra.mxu3 %v1996_v20  ;;  %1768 = vrot.lane.b32.xlu0 %v3997_v53, %s2647_s27 }
 0x2f1   :  { %1582 = vrot.lane.b32.xlu1 %v3925_v34, %s2648_s28 }
 0x2f2   :  { %1672 = vrot.lane.b32.xlu2 %v4131_v33, %s2646_s26 }
 0x2f4   :  { %v4417_v48 = vpop.permute.xlu2 %1650  ;;  %2578 = vmatmul.msk.f32.gmra.mxu0 %vm43_vm0, %v2034_v19  ;;  %v1371_v19 = vld [vmem:[#allocation3 + $0x138] sm:$0x3] }
 0x2f5   :  { %1906 = vrot.lane.b32.xlu0 %v4166_v42, %s2646_s26  ;;  %v2040_v42 = vld [vmem:[#allocation4 + $0x160] sm:$0xff] }
 0x2f9   :  { %1584 = vrot.lane.b32.xlu1 %v3913_v56, %s2648_s28 }
 0x2fa   :  { %1674 = vrot.lane.b32.xlu2 %v4248_v55, %s2646_s26 }
 0x2fb   :  { %v1823_v34 = vpop.permute.xlu1 %1822 }
 0x2fc   :  { %v4428_v51 = vpop.permute.xlu2 %1652  ;;  %2579 = vmatmul.msk.f32.gmra.mxu0 %vm43_vm0, %v2037_v57  ;;  %v1961_v57 = vrot.slane %v1370_v41, 2 }
 0x2fd   :  { %1770 = vrot.lane.b32.xlu0 %v4019_v63, %s2647_s27 }
 0x2ff   :  { %v1757_v33 = vpop.permute.xlu0 %1756 }
 0x300   :  { %1804 = vst.msk [vmem:[#allocation4 + $0x8] sm:$0xff] %vm287_vm4, %v1757_v33  ;;  %v1962_v33 = vrot.slane %v1371_v19, 2 }
 0x301   :  { %1870 = vst.msk [vmem:[#allocation4 + $0x8] sm:$0xff] %vm401_vm5, %v1823_v34  ;;  %1586 = vrot.lane.b32.xlu1 %v3942_v60, %s2648_s28 }
 0x302   :  { %1470 = vrot.lane.b32.xlu2 %v4181_v14, %s2647_s27 }
 0x303   :  { %v1825_v56 = vpop.permute.xlu1 %1824 }
 0x304   :  { %v4439_v55 = vpop.permute.xlu2 %1654  ;;  %2580 = vmatmul.msk.f32.gmra.mxu0 %vm43_vm0, %v2040_v42 }
 0x305   :  { %1772 = vrot.lane.b32.xlu0 %v4136_v21, %s2647_s27 }
 0x307   :  { %v1895_v63 = vpop.permute.xlu0 %1894 }
 0x308   :  { %1942 = vst.msk [vmem:[#allocation4 + $0x8] sm:$0xff] %vm468_vm6, %v1895_v63 }
 0x309   :  { %1588 = vrot.lane.b32.xlu1 %v3954_v45, %s2648_s28 }
 0x30a   :  { %1472 = vrot.lane.b32.xlu2 %v3935_v46, %s2647_s27 }
 0x30b   :  { %v1827_v60 = vpop.permute.xlu1 %1826 }
 0x30c   :  { %v4449_v14 = vpop.permute.xlu2 %1656 }
 0x30d   :  { %1910 = vrot.lane.b32.xlu0 %v4198_v30, %s2646_s26 }
 0x30f   :  { %v1759_v59 = vpop.permute.xlu0 %1758  ;;  %v1997_v50 = vld [vmem:[#allocation4 + $0x8] sm:$0xff] }
 0x310   :  { %1805 = vst.msk [vmem:[#allocation4 + $0x20] sm:$0xff] %vm287_vm4, %v1759_v59  ;;  %2209 = vmatmul.f32.vlgmr.msrb.gmra.mxu2 %v1997_v50 }
 0x311   :  { %1871 = vst.msk [vmem:[#allocation4 + $0x20] sm:$0xff] %vm401_vm5, %v1825_v56  ;;  %1590 = vrot.lane.b32.xlu1 %v3966_v62, %s2648_s28 }
 0x312   :  { %1474 = vrot.lane.b32.xlu2 %v3969_v15, %s2647_s27 }
 0x313   :  { %v1829_v46 = vpop.permute.xlu1 %1828 }
 0x314   :  { %v4459_v45 = vpop.permute.xlu2 %1658 }
 0x315   :  { %1774 = vrot.lane.b32.xlu0 %v4084_v17, %s2647_s27 }
 0x317   :  { %v1897_v6 = vpop.permute.xlu0 %1896 }
 0x318   :  { %1943 = vst.msk [vmem:[#allocation4 + $0x20] sm:$0xff] %vm468_vm6, %v1897_v6 }
 0x319   :  { %1592 = vrot.lane.b32.xlu1 %v3982_v37, %s2648_s28 }
 0x31a   :  { %1476 = vrot.lane.b32.xlu2 %v4012_v16, %s2647_s27 }
 0x31b   :  { %v1831_v40 = vpop.permute.xlu1 %1830 }
 0x31c   :  { %v4468_v62 = vpop.permute.xlu2 %1660 }
 0x31d   :  { %1912 = vrot.lane.b32.xlu0 %v4204_v52, %s2646_s26 }
 0x31f   :  { %v1761_v15 = vpop.permute.xlu0 %1760  ;;  %v2000_v49 = vld [vmem:[#allocation4 + $0x20] sm:$0xff] }
 0x320   :  { %1806 = vst.msk [vmem:[#allocation4 + $0x38] sm:$0xff] %vm287_vm4, %v1761_v15  ;;  %2212 = vmatmul.f32.gmra.mxu2 %v2000_v49 }
 0x321   :  { %1872 = vst.msk [vmem:[#allocation4 + $0x38] sm:$0xff] %vm401_vm5, %v1827_v60  ;;  %1594 = vrot.lane.b32.xlu1 %v3997_v53, %s2648_s28 }
 0x322   :  { %1478 = vrot.lane.b32.xlu2 %v4028_v39, %s2647_s27 }
 0x323   :  { %v1833_v37 = vpop.permute.xlu1 %1832 }
 0x324   :  { %v1663_v16 = vpop.permute.xlu2 %1662 }
 0x325   :  { %1702 = vst.msk [vmem:[#allocation4 + $0xc0] sm:$0xff] %vm468_vm6, %v1663_v16  ;;  %1776 = vrot.lane.b32.xlu0 %v4107_v36, %s2647_s27 }
 0x327   :  { %v1899_v32 = vpop.permute.xlu0 %1898 }
 0x328   :  { %1944 = vst.msk [vmem:[#allocation4 + $0x38] sm:$0xff] %vm468_vm6, %v1899_v32 }
 0x329   :  { %1850 = vrot.lane.b32.xlu1 %v4104_v9, %s2648_s28 }
 0x32a   :  { %1480 = vrot.lane.b32.xlu2 %v4045_v25, %s2647_s27 }
 0x32b   :  { %v4486_v53 = vpop.permute.xlu1 %1834 }
 0x32c   :  { %v4488_v23 = vpop.permute.xlu2 %1664 }
 0x32d   :  { %1914 = vrot.lane.b32.xlu0 %v4211_v8, %s2646_s26 }
 0x32f   :  { %v1763_v39 = vpop.permute.xlu0 %1762  ;;  %v2003_v18 = vld [vmem:[#allocation4 + $0x38] sm:$0xff] }
 0x330   :  { %1807 = vst.msk [vmem:[#allocation4 + $0x50] sm:$0xff] %vm287_vm4, %v1763_v39  ;;  %2215 = vmatmul.f32.gmra.mxu2 %v2003_v18 }
 0x331   :  { %1873 = vst.msk [vmem:[#allocation4 + $0x50] sm:$0xff] %vm401_vm5, %v1829_v46  ;;  %1598 = vrot.lane.b32.xlu1 %v4136_v21, %s2648_s28 }
 0x332   :  { %1482 = vrot.lane.b32.xlu2 %v4057_v29, %s2647_s27 }
 0x333   :  { %v4498_v25 = vpop.permute.xlu1 %1838 }
 0x334   :  { %v4500_v47 = vpop.permute.xlu2 %1666 }
 0x335   :  { %1778 = vrot.lane.b32.xlu0 %v4125_v7, %s2647_s27 }
 0x337   :  { %v1901_v4 = vpop.permute.xlu0 %1900 }
 0x338   :  { %1945 = vst.msk [vmem:[#allocation4 + $0x50] sm:$0xff] %vm468_vm6, %v1901_v4 }
 0x339   :  { %1600 = vrot.lane.b32.xlu1 %v4084_v17, %s2648_s28 }
 0x33a   :  { %1676 = vrot.lane.b32.xlu2 %v4104_v9, %s2646_s26 }
 0x33b   :  { %v4509_v21 = vpop.permute.xlu1 %1840 }
 0x33c   :  { %v4511_v61 = vpop.permute.xlu2 %1668 }
 0x33d   :  { %1916 = vrot.lane.b32.xlu0 %v4223_v10, %s2646_s26 }
 0x33f   :  { %v1765_v29 = vpop.permute.xlu0 %1764  ;;  %v2006_v13 = vld [vmem:[#allocation4 + $0x50] sm:$0xff] }
 0x340   :  { %1808 = vst.msk [vmem:[#allocation4 + $0x68] sm:$0xff] %vm287_vm4, %v1765_v29  ;;  %2218 = vmatmul.f32.gmra.mxu2 %v2006_v13 }
 0x341   :  { %1874 = vst.msk [vmem:[#allocation4 + $0x68] sm:$0xff] %vm401_vm5, %v1831_v40  ;;  %1602 = vrot.lane.b32.xlu1 %v4107_v36, %s2648_s28 }
 0x342   :  { %1486 = vrot.lane.b32.xlu2 %v4230_v35, %s2647_s27 }
 0x343   :  { %v4521_v17 = vpop.permute.xlu1 %1842 }
 0x344   :  { %v4523_v9 = vpop.permute.xlu2 %1670 }
 0x345   :  { %1780 = vrot.lane.b32.xlu0 %v4149_v12, %s2647_s27 }
 0x347   :  { %v1903_v38 = vpop.permute.xlu0 %1902 }
 0x348   :  { %1946 = vst.msk [vmem:[#allocation4 + $0x68] sm:$0xff] %vm468_vm6, %v1903_v38 }
 0x349   :  { %1604 = vrot.lane.b32.xlu1 %v4125_v7, %s2648_s28 }
 0x34a   :  { %1488 = vrot.lane.b32.xlu2 %v4198_v30, %s2647_s27 }
 0x34b   :  { %v4532_v36 = vpop.permute.xlu1 %1844 }
 0x34c   :  { %v4534_v20 = vpop.permute.xlu2 %1672 }
 0x34d   :  { %1918 = vrot.lane.b32.xlu0 %v4246_v44, %s2646_s26 }
 0x34f   :  { %v1767_v35 = vpop.permute.xlu0 %1766  ;;  %v2009_v11 = vld [vmem:[#allocation4 + $0x68] sm:$0xff] }
 0x350   :  { %1809 = vst.msk [vmem:[#allocation4 + $0x80] sm:$0xff] %vm287_vm4, %v1767_v35  ;;  %2221 = vmatmul.f32.gmra.mxu2 %v2009_v11 }
 0x351   :  { %1875 = vst.msk [vmem:[#allocation4 + $0x80] sm:$0xff] %vm401_vm5, %v1833_v37  ;;  %1606 = vrot.lane.b32.xlu1 %v4149_v12, %s2648_s28  ;;  %v1963_v12 = vsel %vm304_vm3, %v1961_v57, %v1962_v33 }
 0x352   :  { %1490 = vrot.lane.b32.xlu2 %v4204_v52, %s2647_s27  ;;  %1995 = vst.msk [vmem:[#allocation4 + $0x178] sm:$0xff] %vm43_vm0, %v1963_v12 }
 0x353   :  { %v4544_v7 = vpop.permute.xlu1 %1846 }
 0x354   :  { %v4546_v30 = vpop.permute.xlu2 %1674 }
 0x355   :  { %1782 = vrot.lane.b32.xlu0 %v4158_v27, %s2647_s27 }
 0x357   :  { %v1905_v34 = vpop.permute.xlu0 %1904 }
 0x358   :  { %1947 = vst.msk [vmem:[#allocation4 + $0x80] sm:$0xff] %vm468_vm6, %v1905_v34 }
 0x359   :  { %1608 = vrot.lane.b32.xlu1 %v4158_v27, %s2648_s28 }
 0x35a   :  { %1492 = vrot.lane.b32.xlu2 %v4211_v8, %s2647_s27 }
 0x35b   :  { %v4557_v52 = vpop.permute.xlu1 %1848 }
 0x35c   :  { %v1471_v56 = vpop.permute.xlu2 %1470 }
 0x35d   :  { %1517 = vst.msk [vmem:[#allocation4 + $0x18] sm:$0xff] %vm287_vm4, %v1471_v56  ;;  %1920 = vrot.lane.b32.xlu0 %v4270_v43, %s2646_s26 }
 0x35f   :  { %v1769_v42 = vpop.permute.xlu0 %1768  ;;  %v2012_v63 = vld [vmem:[#allocation4 + $0x80] sm:$0xff] }
 0x360   :  { %1810 = vst.msk [vmem:[#allocation4 + $0x98] sm:$0xff] %vm287_vm4, %v1769_v42  ;;  %2224 = vmatmul.f32.gmra.mxu2 %v2012_v63 }
 0x361   :  { %1876 = vst.msk [vmem:[#allocation4 + $0x98] sm:$0xff] %vm401_vm5, %v4486_v53  ;;  %1610 = vrot.lane.b32.xlu1 %v4267_v54, %s2648_s28 }
 0x362   :  { %1494 = vrot.lane.b32.xlu2 %v4223_v10, %s2647_s27 }
 0x363   :  { %v1583_v27 = vpop.permute.xlu1 %1582 }
 0x364   :  { %1629 = vst.msk [vmem:[#allocation4 + $0x18] sm:$0xff] %vm401_vm5, %v1583_v27  ;;  %v1473_v8 = vpop.permute.xlu2 %1472 }
 0x365   :  { %1695 = vst.msk [vmem:[#allocation4 + $0x18] sm:$0xff] %vm468_vm6, %v4402_v58  ;;  %1784 = vrot.lane.b32.xlu0 %v4267_v54, %s2647_s27 }
 0x366   :  { %1518 = vst.msk [vmem:[#allocation4 + $0x30] sm:$0xff] %vm287_vm4, %v1473_v8 }
 0x367   :  { %v1907_v60 = vpop.permute.xlu0 %1906 }
 0x368   :  { %1948 = vst.msk [vmem:[#allocation4 + $0x98] sm:$0xff] %vm468_vm6, %v1907_v60 }
 0x369   :  { %1852 = vrot.lane.b32.xlu1 %v1370_v41, %s2648_s28 }
 0x36a   :  { %1496 = vrot.lane.b32.xlu2 %v4246_v44, %s2647_s27 }
 0x36b   :  { %v1585_v10 = vpop.permute.xlu1 %1584 }
 0x36c   :  { %1630 = vst.msk [vmem:[#allocation4 + $0x30] sm:$0xff] %vm401_vm5, %v1585_v10  ;;  %v1475_v59 = vpop.permute.xlu2 %1474  ;;  %v1999_v50 = vld [vmem:[#allocation4 + $0x18] sm:$0xff] }
 0x36d   :  { %1696 = vst.msk [vmem:[#allocation4 + $0x30] sm:$0xff] %vm468_vm6, %v4417_v48  ;;  %1922 = vrot.lane.b32.xlu0 %v4253_v0, %s2646_s26  ;;  %2147 = vmatmul.f32.gmra.mxu3 %v1999_v50  ;;  %v1891_v48 = vrot.slane %v1370_v41, 1  ;;  %v1892_v0 = vrot.slane %v1371_v19, 1  ;;  %v2020_v19 = vld [vmem:[#allocation4 + $0xc0] sm:$0xff] }
 0x36e   :  { %1519 = vst.msk [vmem:[#allocation4 + $0x48] sm:$0xff] %vm287_vm4, %v1475_v59 }
 0x36f   :  { %v1771_v54 = vpop.permute.xlu0 %1770  ;;  %v2015_v58 = vld [vmem:[#allocation4 + $0x98] sm:$0xff] }
 0x370   :  { %1811 = vst.msk [vmem:[#allocation4 + $0xb0] sm:$0xff] %vm287_vm4, %v1771_v54  ;;  %2227 = vmatmul.f32.gmra.mxu2 %v2015_v58 }
 0x371   :  { %1877 = vst.msk [vmem:[#allocation4 + $0xb0] sm:$0xff] %vm401_vm5, %v4325_v28 }
 0x372   :  { %1949 = vst.msk [vmem:[#allocation4 + $0xb0] sm:$0xff] %vm468_vm6, %v4422_v22  ;;  %1498 = vrot.lane.b32.xlu2 %v4270_v43, %s2647_s27  ;;  %v1893_v22 = vsel %vm190_vm2, %v1891_v48, %v1892_v0 }
 0x373   :  { %v1587_v44 = vpop.permute.xlu1 %1586 }
 0x374   :  { %1631 = vst.msk [vmem:[#allocation4 + $0x48] sm:$0xff] %vm401_vm5, %v1587_v44  ;;  %v1477_v46 = vpop.permute.xlu2 %1476  ;;  %v2002_v6 = vld [vmem:[#allocation4 + $0x30] sm:$0xff] }
 0x375   :  { %1697 = vst.msk [vmem:[#allocation4 + $0x48] sm:$0xff] %vm468_vm6, %v4428_v51  ;;  %1786 = vrot.lane.b32.xlu0 %v4187_v5, %s2647_s27  ;;  %2150 = vmatmul.f32.gmra.mxu3 %v2002_v6 }
 0x376   :  { %1520 = vst.msk [vmem:[#allocation4 + $0x60] sm:$0xff] %vm287_vm4, %v1477_v46 }
 0x377   :  { %v1773_v28 = vpop.permute.xlu0 %1772 }
 0x378   :  { %1812 = vst.msk [vmem:[#allocation4 + $0xc8] sm:$0xff] %vm287_vm4, %v1773_v28  ;;  %v2043_v28 = vld [vmem:[#allocation4 + $0x178] sm:$0xff] }
 0x379   :  { %1878 = vst.msk [vmem:[#allocation4 + $0xc8] sm:$0xff] %vm401_vm5, %v4498_v25  ;;  %v2018_v43 = vld [vmem:[#allocation4 + $0xb0] sm:$0xff] }
 0x37a   :  { %2230 = vmatmul.f32.gmra.mxu2 %v2018_v43  ;;  %1924 = vrot.lane.b32.xlu2 %v1893_v22, %s2646_s26  ;;  %v2275_v22 = vpop.f32.mrf.mxu0 }
 0x37b   :  { %v1589_v40 = vpop.permute.xlu1 %1588 }
 0x37c   :  { %1632 = vst.msk [vmem:[#allocation4 + $0x60] sm:$0xff] %vm401_vm5, %v1589_v40  ;;  %v1479_v51 = vpop.permute.xlu2 %1478  ;;  %v2005_v5 = vld [vmem:[#allocation4 + $0x48] sm:$0xff] }
 0x37d   :  { %1698 = vst.msk [vmem:[#allocation4 + $0x60] sm:$0xff] %vm468_vm6, %v4439_v55  ;;  %2153 = vmatmul.f32.gmra.mxu3 %v2005_v5 }
 0x37e   :  { %1521 = vst.msk [vmem:[#allocation4 + $0x78] sm:$0xff] %vm287_vm4, %v1479_v51 }
 0x37f   :  { %v1911_v15 = vpop.permute.xlu0 %1910 }
 0x380   :  { %1950 = vst.msk [vmem:[#allocation4 + $0xc8] sm:$0xff] %vm468_vm6, %v1911_v15  ;;  %v2145_v15 = vpop.f32.mrf.mxu3 }
 0x383   :  { %v1591_v49 = vpop.permute.xlu1 %1590 }
 0x384   :  { %1633 = vst.msk [vmem:[#allocation4 + $0x78] sm:$0xff] %vm401_vm5, %v1591_v49  ;;  %v1481_v37 = vpop.permute.xlu2 %1480  ;;  %v2008_v16 = vld [vmem:[#allocation4 + $0x60] sm:$0xff] }
 0x385   :  { %1699 = vst.msk [vmem:[#allocation4 + $0x78] sm:$0xff] %vm468_vm6, %v4449_v14  ;;  %2156 = vmatmul.f32.gmra.mxu3 %v2008_v16 }
 0x386   :  { %1522 = vst.msk [vmem:[#allocation4 + $0x90] sm:$0xff] %vm287_vm4, %v1481_v37  ;;  %v2278_v37 = vpop.f32.mrf.mxu0 }
 0x387   :  { %v1775_v32 = vpop.permute.xlu0 %1774  ;;  %v2021_v53 = vld [vmem:[#allocation4 + $0xc8] sm:$0xff] }
 0x388   :  { %1813 = vst.msk [vmem:[#allocation4 + $0xe0] sm:$0xff] %vm287_vm4, %v1775_v32  ;;  %2233 = vmatmul.f32.gmra.mxu2 %v2021_v53 }
 0x389   :  { %1879 = vst.msk [vmem:[#allocation4 + $0xe0] sm:$0xff] %vm401_vm5, %v4509_v21 }
 0x38b   :  { %v1593_v55 = vpop.permute.xlu1 %1592 }
 0x38c   :  { %1634 = vst.msk [vmem:[#allocation4 + $0x90] sm:$0xff] %vm401_vm5, %v1593_v55  ;;  %v1483_v39 = vpop.permute.xlu2 %1482  ;;  %v2011_v18 = vld [vmem:[#allocation4 + $0x78] sm:$0xff] }
 0x38d   :  { %1700 = vst.msk [vmem:[#allocation4 + $0x90] sm:$0xff] %vm468_vm6, %v4459_v45  ;;  %2159 = vmatmul.f32.gmra.mxu3 %v2011_v18 }
 0x38e   :  { %1523 = vst.msk [vmem:[#allocation4 + $0xa8] sm:$0xff] %vm287_vm4, %v1483_v39  ;;  %v2281_v39 = vpop.f32.mrf.mxu0 }
 0x38f   :  { %v1913_v14 = vpop.permute.xlu0 %1912 }
 0x390   :  { %1951 = vst.msk [vmem:[#allocation4 + $0xe0] sm:$0xff] %vm468_vm6, %v1913_v14 }
 0x393   :  { %v1595_v25 = vpop.permute.xlu1 %1594  ;;  %v2210_v49 = vpop.f32.mrf.mxu2 }
 0x394   :  { %1635 = vst.msk [vmem:[#allocation4 + $0xa8] sm:$0xff] %vm401_vm5, %v1595_v25  ;;  %v4621_v4 = vpop.permute.xlu2 %1676  ;;  %v2014_v21 = vld [vmem:[#allocation4 + $0x90] sm:$0xff] }
 0x395   :  { %1701 = vst.msk [vmem:[#allocation4 + $0xa8] sm:$0xff] %vm468_vm6, %v4468_v62  ;;  %2162 = vmatmul.f32.gmra.mxu3 %v2014_v21 }
 0x397   :  { %v1777_v29 = vpop.permute.xlu0 %1776  ;;  %v2024_v13 = vld [vmem:[#allocation4 + $0xe0] sm:$0xff] }
 0x398   :  { %1814 = vst.msk [vmem:[#allocation4 + $0xf8] sm:$0xff] %vm287_vm4, %v1777_v29  ;;  %2236 = vmatmul.f32.gmra.mxu2 %v2024_v13  ;;  %v2284_v29 = vpop.f32.mrf.mxu0 }
 0x399   :  { %1880 = vst.msk [vmem:[#allocation4 + $0xf8] sm:$0xff] %vm401_vm5, %v4521_v17 }
 0x39b   :  { %v4628_v45 = vpop.permute.xlu1 %1850 }
 0x39c   :  { %v1487_v38 = vpop.permute.xlu2 %1486  ;;  %v2017_v35 = vld [vmem:[#allocation4 + $0xa8] sm:$0xff] }
 0x39d   :  { %1525 = vst.msk [vmem:[#allocation4 + $0xd8] sm:$0xff] %vm287_vm4, %v1487_v38  ;;  %2165 = vmatmul.f32.gmra.mxu3 %v2017_v35 }
 0x39f   :  { %v1915_v11 = vpop.permute.xlu0 %1914 }
 0x3a0   :  { %1952 = vst.msk [vmem:[#allocation4 + $0xf8] sm:$0xff] %vm468_vm6, %v1915_v11 }
 0x3a3   :  { %v1599_v62 = vpop.permute.xlu1 %1598  ;;  %v2213_v16 = vpop.f32.mrf.mxu2 }
 0x3a4   :  { %1637 = vst.msk [vmem:[#allocation4 + $0xd8] sm:$0xff] %vm401_vm5, %v1599_v62  ;;  %v1489_v41 = vpop.permute.xlu2 %1488  ;;  %v2287_v62 = vpop.f32.mrf.mxu0 }
 0x3a5   :  { %1703 = vst.msk [vmem:[#allocation4 + $0xd8] sm:$0xff] %vm468_vm6, %v4488_v23  ;;  %2168 = vmatmul.f32.gmra.mxu3 %v2020_v19 }
 0x3a6   :  { %1526 = vst.msk [vmem:[#allocation4 + $0xf0] sm:$0xff] %vm287_vm4, %v1489_v41 }
 0x3a7   :  { %v1779_v17 = vpop.permute.xlu0 %1778  ;;  %v2027_v34 = vld [vmem:[#allocation4 + $0xf8] sm:$0xff] }
 0x3a8   :  { %1815 = vst.msk [vmem:[#allocation4 + $0x110] sm:$0xff] %vm287_vm4, %v1779_v17  ;;  %2239 = vmatmul.f32.gmra.mxu2 %v2027_v34 }
 0x3a9   :  { %1881 = vst.msk [vmem:[#allocation4 + $0x110] sm:$0xff] %vm401_vm5, %v4532_v36 }
 0x3ab   :  { %v1601_v57 = vpop.permute.xlu1 %1600 }
 0x3ac   :  { %1638 = vst.msk [vmem:[#allocation4 + $0xf0] sm:$0xff] %vm401_vm5, %v1601_v57  ;;  %v1491_v33 = vpop.permute.xlu2 %1490  ;;  %v2023_v12 = vld [vmem:[#allocation4 + $0xd8] sm:$0xff]  ;;  %v2290_v19 = vpop.f32.mrf.mxu0 }
 0x3ad   :  { %1704 = vst.msk [vmem:[#allocation4 + $0xf0] sm:$0xff] %vm468_vm6, %v4500_v47  ;;  %2171 = vmatmul.f32.gmra.mxu3 %v2023_v12 }
 0x3ae   :  { %1527 = vst.msk [vmem:[#allocation4 + $0x108] sm:$0xff] %vm287_vm4, %v1491_v33 }
 0x3af   :  { %v1917_v23 = vpop.permute.xlu0 %1916 }
 0x3b0   :  { %1953 = vst.msk [vmem:[#allocation4 + $0x110] sm:$0xff] %vm468_vm6, %v1917_v23 }
 0x3b3   :  { %v1603_v56 = vpop.permute.xlu1 %1602  ;;  %v2216_v18 = vpop.f32.mrf.mxu2 }
 0x3b4   :  { %1639 = vst.msk [vmem:[#allocation4 + $0x108] sm:$0xff] %vm401_vm5, %v1603_v56  ;;  %v1493_v42 = vpop.permute.xlu2 %1492  ;;  %v2026_v63 = vld [vmem:[#allocation4 + $0xf0] sm:$0xff]  ;;  %v2293_v34 = vpop.f32.mrf.mxu0 }
 0x3b5   :  { %1705 = vst.msk [vmem:[#allocation4 + $0x108] sm:$0xff] %vm468_vm6, %v4511_v61  ;;  %2174 = vmatmul.f32.gmra.mxu3 %v2026_v63 }
 0x3b6   :  { %1528 = vst.msk [vmem:[#allocation4 + $0x120] sm:$0xff] %vm287_vm4, %v1493_v42 }
 0x3b7   :  { %v1781_v36 = vpop.permute.xlu0 %1780  ;;  %v2030_v27 = vld [vmem:[#allocation4 + $0x110] sm:$0xff] }
 0x3b8   :  { %1816 = vst.msk [vmem:[#allocation4 + $0x128] sm:$0xff] %vm287_vm4, %v1781_v36  ;;  %2242 = vmatmul.f32.gmra.mxu2 %v2030_v27 }
 0x3b9   :  { %1882 = vst.msk [vmem:[#allocation4 + $0x128] sm:$0xff] %vm401_vm5, %v4544_v7 }
 0x3bb   :  { %v1605_v47 = vpop.permute.xlu1 %1604 }
 0x3bc   :  { %1640 = vst.msk [vmem:[#allocation4 + $0x120] sm:$0xff] %vm401_vm5, %v1605_v47  ;;  %v1495_v8 = vpop.permute.xlu2 %1494  ;;  %v2029_v60 = vld [vmem:[#allocation4 + $0x108] sm:$0xff]  ;;  %v2296_v23 = vpop.f32.mrf.mxu0 }
 0x3bd   :  { %1706 = vst.msk [vmem:[#allocation4 + $0x120] sm:$0xff] %vm468_vm6, %v4523_v9  ;;  %2177 = vmatmul.f32.gmra.mxu3 %v2029_v60 }
 0x3be   :  { %1529 = vst.msk [vmem:[#allocation4 + $0x138] sm:$0xff] %vm287_vm4, %v1495_v8 }
 0x3bf   :  { %v1919_v61 = vpop.permute.xlu0 %1918 }
 0x3c0   :  { %1954 = vst.msk [vmem:[#allocation4 + $0x128] sm:$0xff] %vm468_vm6, %v1919_v61 }
 0x3c3   :  { %v1607_v10 = vpop.permute.xlu1 %1606 }
 0x3c4   :  { %1641 = vst.msk [vmem:[#allocation4 + $0x138] sm:$0xff] %vm401_vm5, %v1607_v10  ;;  %v1497_v59 = vpop.permute.xlu2 %1496  ;;  %v2032_v50 = vld [vmem:[#allocation4 + $0x120] sm:$0xff]  ;;  %v2299_v63 = vpop.f32.mrf.mxu0 }
 0x3c5   :  { %1707 = vst.msk [vmem:[#allocation4 + $0x138] sm:$0xff] %vm468_vm6, %v4534_v20  ;;  %2180 = vmatmul.f32.gmra.mxu3 %v2032_v50 }
 0x3c6   :  { %1530 = vst.msk [vmem:[#allocation4 + $0x150] sm:$0xff] %vm287_vm4, %v1497_v59 }
 0x3c7   :  { %v1783_v7 = vpop.permute.xlu0 %1782  ;;  %v2033_v54 = vld [vmem:[#allocation4 + $0x128] sm:$0xff] }
 0x3c8   :  { %1817 = vst.msk [vmem:[#allocation4 + $0x140] sm:$0xff] %vm287_vm4, %v1783_v7  ;;  %2245 = vmatmul.f32.gmra.mxu2 %v2033_v54  ;;  %v2211_v54 = vadd.f32 %v2210_v49, %v2145_v15 }
 0x3c9   :  { %1883 = vst.msk [vmem:[#allocation4 + $0x140] sm:$0xff] %vm401_vm5, %v4557_v52 }
 0x3cb   :  { %v1609_v9 = vpop.permute.xlu1 %1608 }
 0x3cc   :  { %1642 = vst.msk [vmem:[#allocation4 + $0x150] sm:$0xff] %vm401_vm5, %v1609_v9  ;;  %v1499_v58 = vpop.permute.xlu2 %1498  ;;  %v2035_v44 = vld [vmem:[#allocation4 + $0x138] sm:$0xff]  ;;  %v2302_v8 = vpop.f32.mrf.mxu0 }
 0x3cd   :  { %1708 = vst.msk [vmem:[#allocation4 + $0x150] sm:$0xff] %vm468_vm6, %v4546_v30  ;;  %2183 = vmatmul.f32.gmra.mxu3 %v2035_v44  ;;  %v4685_v44 = vadd.f32 %v2275_v22, %v2211_v54 }
 0x3ce   :  { %1531 = vst.msk [vmem:[#allocation4 + $0x168] sm:$0xff] %vm287_vm4, %v1499_v58 }
 0x3cf   :  { %v1921_v20 = vpop.permute.xlu0 %1920 }
 0x3d0   :  { %1955 = vst.msk [vmem:[#allocation4 + $0x140] sm:$0xff] %vm468_vm6, %v1921_v20 }
 0x3d3   :  { %v1611_v48 = vpop.permute.xlu1 %1610 }
 0x3d4   :  { %1643 = vst.msk [vmem:[#allocation4 + $0x168] sm:$0xff] %vm401_vm5, %v1611_v48  ;;  %v2038_v0 = vld [vmem:[#allocation4 + $0x150] sm:$0xff]  ;;  %v1925_v5 = vpop.permute.xlu2 %1924  ;;  %v2305_v10 = vpop.f32.mrf.mxu0 }
 0x3d5   :  { %1709 = vst.msk [vmem:[#allocation4 + $0x168] sm:$0xff] %vm468_vm6, %v4621_v4  ;;  %2186 = vmatmul.f32.gmra.mxu3 %v2038_v0  ;;  %v2219_v4 = vpop.f32.mrf.mxu2 }
 0x3d7   :  { %v1785_v52 = vpop.permute.xlu0 %1784  ;;  %v2036_v46 = vld [vmem:[#allocation4 + $0x140] sm:$0xff] }
 0x3d8   :  { %1818 = vst.msk [vmem:[#allocation4 + $0x158] sm:$0xff] %vm287_vm4, %v1785_v52  ;;  %2248 = vmatmul.f32.gmra.mxu2 %v2036_v46 }
 0x3d9   :  { %1884 = vst.msk [vmem:[#allocation4 + $0x158] sm:$0xff] %vm401_vm5, %v4628_v45 }
 0x3db   :  { %v1853_v43 = vpop.permute.xlu1 %1852 }
 0x3dc   :  { %v2041_v30 = vld [vmem:[#allocation4 + $0x168] sm:$0xff]  ;;  %v4681_v7 = vpop.f32.mrf.mxu0 }
 0x3dd   :  { %2189 = vmatmul.f32.gmra.mxu3 %v2041_v30  ;;  %v2222_v38 = vpop.f32.mrf.mxu2  ;;  %v2363_v30 = vmul.f32 %v4685_v44, %v4685_v44 }
 0x3df   :  { %v1923_v6 = vpop.permute.xlu0 %1922 }
 0x3e0   :  { %1956 = vst.msk [vmem:[#allocation4 + $0x158] sm:$0xff] %vm468_vm6, %v1923_v6 }
 0x3e4   :  { %v4691_v46 = vpop.f32.mrf.mxu0 }
 0x3e5   :  { %2581 = vmatmul.msk.f32.vlgmr.msra.gmra.mxu3 %vm43_vm0, %v2043_v28  ;;  %v2225_v33 = vpop.f32.mrf.mxu2 }
 0x3e7   :  { %v1787_v40 = vpop.permute.xlu0 %1786  ;;  %v2039_v51 = vld [vmem:[#allocation4 + $0x158] sm:$0xff] }
 0x3e8   :  { %1819 = vst.msk [vmem:[#allocation4 + $0x170] sm:$0xff] %vm287_vm4, %v1787_v40  ;;  %2251 = vmatmul.f32.gmra.mxu2 %v2039_v51  ;;  %v2325_v51 = vsel %vm43_vm0, %v4685_v44, 0.0 }
 0x3e9   :  { %1885 = vst.msk [vmem:[#allocation4 + $0x170] sm:$0xff] %vm401_vm5, %v1853_v43 }
 0x3ea   :  { %1957 = vst.msk [vmem:[#allocation4 + $0x170] sm:$0xff] %vm468_vm6, %v1925_v5 }
 0x3f0   :  { %v2148_v32 = vpop.f32.mrf.mxu3 }
 0x3f1   :  { %v2214_v53 = vadd.f32 %v2213_v16, %v2148_v32  ;;  %v2042_v55 = vld [vmem:[#allocation4 + $0x170] sm:$0xff]  ;;  %v2379_v32 = vsel %vm43_vm0, %v2363_v30, 0.0 }
 0x3f2   :  { %2254 = vmatmul.f32.gmra.mxu2 %v2042_v55 }
 0x3f3   :  { %v2228_v56 = vpop.f32.mrf.mxu2  ;;  %v4683_v58 = vadd.f32 %v2278_v37, %v2214_v53 }
 0x3f5   :  { %v2364_v0 = vmul.f32 %v4683_v58, %v4683_v58  ;;  %v2326_v28 = vsel %vm43_vm0, %v4683_v58, 0.0 }
 0x3f6   :  { %v2327_v53 = vadd.f32 %v2326_v28, %v2325_v51 }
 0x3f7   :  { %v2380_v15 = vsel %vm43_vm0, %v2364_v0, 0.0 }
 0x3f8   :  { %v2151_v14 = vpop.f32.mrf.mxu3 }
 0x3f9   :  { %v2217_v25 = vadd.f32 %v2216_v18, %v2151_v14 }
 0x3fb   :  { %v4687_v20 = vadd.f32 %v2281_v39, %v2217_v25 }
 0x3fd   :  { %v2231_v36 = vpop.f32.mrf.mxu2  ;;  %v2365_v22 = vmul.f32 %v4687_v20, %v4687_v20  ;;  %v2328_v49 = vsel %vm43_vm0, %v4687_v20, 0.0 }
 0x3ff   :  { %v2382_v39 = vsel %vm43_vm0, %v2365_v22, 0.0 }
 0x400   :  { %v2154_v21 = vpop.f32.mrf.mxu3 }
 0x401   :  { %v2220_v13 = vadd.f32 %v2219_v4, %v2154_v21  ;;  %v2381_v4 = vadd.f32 %v2380_v15, %v2379_v32  ;;  %v2329_v21 = vadd.f32 %v2328_v49, %v2327_v53 }
 0x403   :  { %v4679_v45 = vadd.f32 %v2284_v29, %v2220_v13 }
 0x405   :  { %v2366_v37 = vmul.f32 %v4679_v45, %v4679_v45  ;;  %v2330_v18 = vsel %vm43_vm0, %v4679_v45, 0.0 }
 0x407   :  { %v2384_v13 = vsel %vm43_vm0, %v2366_v37, 0.0 }
 0x408   :  { %v2157_v35 = vpop.f32.mrf.mxu3 }
 0x409   :  { %v2223_v11 = vadd.f32 %v2222_v38, %v2157_v35 }
 0x40b   :  { %v2234_v27 = vpop.f32.mrf.mxu2  ;;  %v4699_v43 = vadd.f32 %v2287_v62, %v2223_v11  ;;  %v2383_v62 = vadd.f32 %v2382_v39, %v2381_v4 }
 0x40d   :  { %v2367_v14 = vmul.f32 %v4699_v43, %v4699_v43  ;;  %v2332_v38 = vsel %vm43_vm0, %v4699_v43, 0.0 }
 0x410   :  { %v2160_v41 = vpop.f32.mrf.mxu3 }
 0x411   :  { %v2226_v52 = vadd.f32 %v2225_v33, %v2160_v41  ;;  %v2331_v41 = vadd.f32 %v2330_v18, %v2329_v21 }
 0x413   :  { %v4708_v16 = vadd.f32 %v2290_v19, %v2226_v52 }
 0x415   :  { %v2368_v35 = vmul.f32 %v4708_v16, %v4708_v16  ;;  %v2334_v33 = vsel %vm43_vm0, %v4708_v16, 0.0 }
 0x418   :  { %v2163_v17 = vpop.f32.mrf.mxu3 }
 0x419   :  { %v2229_v40 = vadd.f32 %v2228_v56, %v2163_v17  ;;  %v2314_v56 = vpop.f32.mrf.mxu0 }
 0x41b   :  { %v2237_v60 = vpop.f32.mrf.mxu2  ;;  %v4716_v25 = vadd.f32 %v2293_v34, %v2229_v40 }
 0x420   :  { %v2166_v57 = vpop.f32.mrf.mxu3 }
 0x421   :  { %v2232_v5 = vadd.f32 %v2231_v36, %v2166_v57  ;;  %v2386_v57 = vsel %vm43_vm0, %v2367_v14, 0.0  ;;  %v2385_v36 = vadd.f32 %v2384_v13, %v2383_v62 }
 0x423   :  { %v4718_v29 = vadd.f32 %v2296_v23, %v2232_v5  ;;  %v2387_v52 = vadd.f32 %v2386_v57, %v2385_v36 }
 0x428   :  { %v2169_v12 = vpop.f32.mrf.mxu3 }
 0x429   :  { %v2235_v55 = vadd.f32 %v2234_v27, %v2169_v12  ;;  %v2369_v12 = vmul.f32 %v4716_v25, %v4716_v25  ;;  %v2333_v27 = vadd.f32 %v2332_v38, %v2331_v41  ;;  %v2317_v38 = vpop.f32.mrf.mxu0 }
 0x42b   :  { %v2240_v59 = vpop.f32.mrf.mxu2  ;;  %v4725_v19 = vadd.f32 %v2299_v63, %v2235_v55  ;;  %v2388_v63 = vsel %vm43_vm0, %v2368_v35, 0.0  ;;  %v2335_v30 = vadd.f32 %v2334_v33, %v2333_v27 }
 0x42c   :  { %v2389_v51 = vadd.f32 %v2388_v63, %v2387_v52 }
 0x42d   :  { %v2371_v28 = vmul.f32 %v4725_v19, %v4725_v19 }
 0x430   :  { %v2172_v42 = vpop.f32.mrf.mxu3 }
 0x431   :  { %v2238_v11 = vadd.f32 %v2237_v60, %v2172_v42  ;;  %v2370_v42 = vmul.f32 %v4718_v29, %v4718_v29  ;;  %v2336_v60 = vsel %vm43_vm0, %v4716_v25, 0.0 }
 0x432   :  { %v2337_v5 = vadd.f32 %v2336_v60, %v2335_v30 }
 0x433   :  { %v4737_v54 = vadd.f32 %v2302_v8, %v2238_v11  ;;  %v2392_v15 = vsel %vm43_vm0, %v2370_v42, 0.0  ;;  %v2340_v8 = vsel %vm43_vm0, %v4725_v19, 0.0 }
 0x438   :  { %v2175_v47 = vpop.f32.mrf.mxu3 }
 0x439   :  { %v2241_v23 = vadd.f32 %v2240_v59, %v2175_v47  ;;  %v2390_v47 = vsel %vm43_vm0, %v2369_v12, 0.0  ;;  %v2338_v59 = vsel %vm43_vm0, %v4718_v29, 0.0 }
 0x43a   :  { %v2391_v37 = vadd.f32 %v2390_v47, %v2389_v51  ;;  %v2339_v32 = vadd.f32 %v2338_v59, %v2337_v5 }
 0x43b   :  { %v2243_v9 = vpop.f32.mrf.mxu2  ;;  %v4744_v22 = vadd.f32 %v2305_v10, %v2241_v23  ;;  %v2394_v10 = vsel %vm43_vm0, %v2371_v28, 0.0 }
 0x43c   :  { %v2393_v18 = vadd.f32 %v2392_v15, %v2391_v37  ;;  %v2341_v14 = vadd.f32 %v2340_v8, %v2339_v32 }
 0x43d   :  { %v2344_v4 = vsel %vm43_vm0, %v4744_v22, 0.0 }
 0x43e   :  { %v2395_v35 = vadd.f32 %v2394_v10, %v2393_v18 }
 0x440   :  { %v2178_v61 = vpop.f32.mrf.mxu3 }
 0x441   :  { %v2244_v0 = vadd.f32 %v2243_v9, %v2178_v61  ;;  %v2372_v61 = vmul.f32 %v4737_v54, %v4737_v54 }
 0x443   :  { %v4752_v9 = vadd.f32 %v4681_v7, %v2244_v0 }
 0x445   :  { %v2374_v21 = vmul.f32 %v4752_v9, %v4752_v9  ;;  %v2346_v62 = vsel %vm43_vm0, %v4752_v9, 0.0 }
 0x447   :  { %v2400_v33 = vsel %vm43_vm0, %v2374_v21, 0.0 }
 0x448   :  { %v2181_v50 = vpop.f32.mrf.mxu3 }
 0x44b   :  { %v2246_v6 = vpop.f32.mrf.mxu2 }
 0x44c   :  { %v2247_v40 = vadd.f32 %v2246_v6, %v2181_v50  ;;  %v2342_v50 = vsel %vm43_vm0, %v4737_v54, 0.0  ;;  %v2373_v6 = vmul.f32 %v4744_v22, %v4744_v22 }
 0x44d   :  { %v2343_v11 = vadd.f32 %v2342_v50, %v2341_v14 }
 0x44e   :  { %v4760_v55 = vadd.f32 %v4691_v46, %v2247_v40  ;;  %v2398_v46 = vsel %vm43_vm0, %v2373_v6, 0.0 }
 0x44f   :  { %v2345_v57 = vadd.f32 %v2344_v4, %v2343_v11 }
 0x450   :  { %v2184_v48 = vpop.f32.mrf.mxu3  ;;  %v2375_v41 = vmul.f32 %v4760_v55, %v4760_v55  ;;  %v2348_v12 = vsel %vm43_vm0, %v4760_v55, 0.0 }
 0x451   :  { %v2347_v36 = vadd.f32 %v2346_v62, %v2345_v57 }
 0x452   :  { %v2402_v27 = vsel %vm43_vm0, %v2375_v41, 0.0 }
 0x453   :  { %v2349_v0 = vadd.f32 %v2348_v12, %v2347_v36 }
 0x458   :  { %v2187_v17 = vpop.f32.mrf.mxu3 }
 0x45b   :  { %v2249_v34 = vpop.f32.mrf.mxu2 }
 0x45c   :  { %v2250_v49 = vadd.f32 %v2249_v34, %v2184_v48  ;;  %v2396_v48 = vsel %vm43_vm0, %v2372_v61, 0.0 }
 0x45d   :  { %v2397_v34 = vadd.f32 %v2396_v48, %v2395_v35 }
 0x45e   :  { %v4767_v13 = vadd.f32 %v2314_v56, %v2250_v49 }
 0x45f   :  { %v2399_v56 = vadd.f32 %v2398_v46, %v2397_v34 }
 0x460   :  { %v2190_v7 = vpop.f32.mrf.mxu3  ;;  %v2376_v23 = vmul.f32 %v4767_v13, %v4767_v13  ;;  %v2350_v42 = vsel %vm43_vm0, %v4767_v13, 0.0 }
 0x461   :  { %v2401_v60 = vadd.f32 %v2400_v33, %v2399_v56  ;;  %v2351_v51 = vadd.f32 %v2350_v42, %v2349_v0 }
 0x462   :  { %v2404_v28 = vsel %vm43_vm0, %v2376_v23, 0.0 }
 0x463   :  { %v2403_v40 = vadd.f32 %v2402_v27, %v2401_v60 }
 0x465   :  { %v2405_v8 = vadd.f32 %v2404_v28, %v2403_v40 }
 0x468   :  { %v2320_v30 = vpop.f32.mrf.mxu3 }
 0x46b   :  { %v2252_v53 = vpop.f32.mrf.mxu2 }
 0x46c   :  { %v2253_v39 = vadd.f32 %v2252_v53, %v2187_v17 }
 0x46e   :  { %v4774_v17 = vadd.f32 %v2317_v38, %v2253_v39 }
 0x470   :  { %v2377_v63 = vmul.f32 %v4774_v17, %v4774_v17  ;;  %v2352_v47 = vsel %vm43_vm0, %v4774_v17, 0.0 }
 0x471   :  { %v2353_v61 = vadd.f32 %v2352_v47, %v2351_v51  ;;  %v4803_v47 = vld [vmem:[%s4892_s6] ss:$0 sm:$0xff] }
 0x472   :  { %v2406_v5 = vsel %vm43_vm0, %v2377_v63, 0.0  ;;  %v2323_v63 = vld [vmem:[%s4891_s5] sm:$0x1]  ;;  %s2649_s5 = smov [#allocation5]  }
 0x473   :  { %v2407_v10 = vadd.f32 %v2406_v5, %v2405_v8  ;;  %s2536_s6 = sshll.u32 %s2649_s5, 4  ;;  %s2537_s6 = int_to_ptr.vmem [resolvable:$true] %s2536_s6 }
 0x475   :  { %v2255_v52 = vpop.f32.mrf.mxu2 }
 0x476   :  { %v2256_v59 = vadd.f32 %v2255_v52, %v2190_v7 }
 0x478   :  { %v2321_v15 = vadd.f32 %v2320_v30, %v2256_v59 }
 0x47a   :  { %v2354_v49 = vsel %vm43_vm0, %v2321_v15, 0.0  ;;  %v2378_v37 = vmul.f32 %v2321_v15, %v2321_v15 }
 0x47b   :  { %v2355_v32 = vadd.f32 %v2354_v49, %v2353_v61 }
 0x47c   :  { %v2408_v53 = vsel %vm43_vm0, %v2378_v37, 0.0 }
 0x47d   :  { %v2356_v50 = vrot.slane %v2355_v32, 4  ;;  %v2409_v6 = vadd.f32 %v2408_v53, %v2407_v10 }
 0x47f   :  { %v2357_v39 = vadd.f32 %v2356_v50, %v2355_v32  ;;  %v2410_v18 = vrot.slane %v2409_v6, 4 }
 0x481   :  { %v2358_v14 = vrot.slane %v2357_v39, 2  ;;  %v2411_v7 = vadd.f32 %v2410_v18, %v2409_v6 }
 0x483   :  { %v2359_v48 = vadd.f32 %v2358_v14, %v2357_v39  ;;  %v2412_v4 = vrot.slane %v2411_v7, 2 }
 0x485   :  { %v2360_v21 = vrot.slane %v2359_v48, 1  ;;  %v2413_v38 = vadd.f32 %v2412_v4, %v2411_v7 }
 0x487   :  { %v2361_v35 = vadd.f32 %v2360_v21, %v2359_v48  ;;  %v2414_v11 = vrot.slane %v2413_v38, 1 }
 0x489   :  { %v4792_v46 = vmul.f32 0.0078125, %v2361_v35  ;;  %v2415_v62 = vadd.f32 %v2414_v11, %v2413_v38 }
 0x48b   :  { %v2416_v41 = vmul.f32 0.0078125, %v2415_v62  ;;  %v2417_v34 = vmul.f32 %v4792_v46, %v4792_v46  ;;  %v2447_v30 = vsub.f32 %v2321_v15, %v4792_v46  ;;  %v2432_v59 = vsub.f32 %v4685_v44, %v4792_v46 }
 0x48c   :  { %v2433_v40 = vsub.f32 %v4683_v58, %v4792_v46  ;;  %v2434_v51 = vsub.f32 %v4687_v20, %v4792_v46  ;;  %v2435_v5 = vsub.f32 %v4679_v45, %v4792_v46  ;;  %v2436_v15 = vsub.f32 %v4699_v43, %v4792_v46 }
 0x48d   :  { %v2418_v57 = vsub.f32 %v2416_v41, %v2417_v34  ;;  %v2437_v37 = vsub.f32 %v4708_v16, %v4792_v46  ;;  %v2438_v58 = vsub.f32 %v4716_v25, %v4792_v46  ;;  %v2439_v20 = vsub.f32 %v4718_v29, %v4792_v46 }
 0x48e   :  { %v2440_v53 = vsub.f32 %v4725_v19, %v4792_v46  ;;  %v2441_v43 = vsub.f32 %v4737_v54, %v4792_v46  ;;  %v2442_v16 = vsub.f32 %v4744_v22, %v4792_v46  ;;  %v2443_v29 = vsub.f32 %v4752_v9, %v4792_v46 }
 0x48f   :  { %v2419_v33 = vmax.f32 %v2418_v57, 0.0  ;;  %v2444_v22 = vsub.f32 %v4760_v55, %v4792_v46  ;;  %v2445_v4 = vsub.f32 %v4767_v13, %v4792_v46  ;;  %v2446_v9 = vsub.f32 %v4774_v17, %v4792_v46 }
 0x491   :  { %v2420_v12 = vadd.f32 1e-05, %v2419_v33 }
 0x493   :  { %2617 = vrsqrt.f32 %v2420_v12  ;;  %vm2427_vm11 = vweird.f32 %v2420_v12 }
 0x499   :  { %v2618_v23 = vpop.eup %2617 }
 0x49a   :  { %v2422_v56 = vmul.f32 %v2618_v23, %v2420_v12  ;;  %vm2428_vm10 = vweird.f32 %v2618_v23 }
 0x49b   :  { %vm2429_vm12 = vmor %vm2427_vm11, %vm2428_vm10 }
 0x49c   :  { %v2423_v36 = vmul.f32 %v2618_v23, %v2422_v56 }
 0x49e   :  { %v2424_v27 = vmul.f32 0.5, %v2423_v36  ;;  %v4914_v36 = vld [vmem:[#allocation15_spill] sm:$0xff] }
 0x4a0   :  { %v2425_v42 = vsub.f32 1.5, %v2424_v27  ;;  %v4915_v27 = vld [vmem:[#allocation16_spill] sm:$0xff] }
 0x4a2   :  { %v2426_v60 = vmul.f32 %v2618_v23, %v2425_v42 }
 0x4a4   :  { %v2430_v0 = vsel %vm2429_vm12, %v2618_v23, %v2426_v60 }
 0x4a5   :  { %v2431_v52 = vmul.f32 %v2430_v0, %v2323_v63  ;;  %v4916_v0 = vld [vmem:[#allocation17_spill] sm:$0xff] }
 0x4a7   :  { %v2448_v28 = vperm.slane %v2431_v52, 0 }
 0x4a9   :  { %v2464_v8 = vmul.f32 %v2448_v28, %v2447_v30  ;;  %v2449_v61 = vmul.f32 %v2448_v28, %v2432_v59  ;;  %v2450_v49 = vmul.f32 %v2448_v28, %v2433_v40  ;;  %v2451_v32 = vmul.f32 %v2448_v28, %v2434_v51 }
 0x4aa   :  { %v2452_v44 = vmul.f32 %v2448_v28, %v2435_v5  ;;  %v2453_v45 = vmul.f32 %v2448_v28, %v2436_v15  ;;  %v2454_v50 = vmul.f32 %v2448_v28, %v2437_v37  ;;  %v2455_v39 = vmul.f32 %v2448_v28, %v2438_v58  ;;  %v4918_v5 = vld [vmem:[#allocation9_spill] sm:$0xff] }
 0x4ab   :  { %v2483_v10 = vadd.f32 %v4803_v47, %v2464_v8  ;;  %v2468_v18 = vadd.f32 %v4803_v47, %v2449_v61  ;;  %v2469_v25 = vadd.f32 %v4803_v47, %v2450_v49  ;;  %v2456_v14 = vmul.f32 %v2448_v28, %v2439_v20  ;;  %v4919_v49 = vld [vmem:[#allocation10_spill] sm:$0xff]  ;;  %v4921_v20 = vld [vmem:[#allocation12_spill] sm:$0xff] }
 0x4ac   :  { %v2470_v19 = vadd.f32 %v4803_v47, %v2451_v32  ;;  %v2471_v7 = vadd.f32 %v4803_v47, %v2452_v44  ;;  %v2457_v48 = vmul.f32 %v2448_v28, %v2440_v53  ;;  %v2458_v21 = vmul.f32 %v2448_v28, %v2441_v43  ;;  %v4920_v44 = vld [vmem:[#allocation11_spill] sm:$0xff]  ;;  %v4922_v43 = vld [vmem:[#allocation13_spill] sm:$0xff] }
 0x4ad   :  { %v2499_v6 = vadd.f32 %v2483_v10, %v3100_v26  ;;  %v2472_v26 = vadd.f32 %v4803_v47, %v2453_v45  ;;  %v2459_v38 = vmul.f32 %v2448_v28, %v2442_v16  ;;  %v2473_v35 = vadd.f32 %v4803_v47, %v2454_v50 }
 0x4ae   :  { %v2474_v11 = vadd.f32 %v4803_v47, %v2455_v39  ;;  %v2484_v62 = vadd.f32 %v2468_v18, %v3031_v2  ;;  %v2485_v55 = vadd.f32 %v2469_v25, %v3024_v1  ;;  %v2460_v41 = vmul.f32 %v2448_v28, %v2443_v29 }
 0x4af   :  { %v2515_v54 = vmax.f32 %v2499_v6, 0.0  ;;  %v2475_v34 = vadd.f32 %v4803_v47, %v2456_v14  ;;  %v2486_v13 = vadd.f32 %v2470_v19, %v3044_v3  ;;  %v2487_v57 = vadd.f32 %v2471_v7, %v3088_v24 }
 0x4b0   :  { %v2461_v33 = vmul.f32 %v2448_v28, %v2444_v22  ;;  %v2462_v12 = vmul.f32 %v2448_v28, %v2445_v4  ;;  %v2476_v23 = vadd.f32 %v4803_v47, %v2457_v48  ;;  %v2488_v56 = vadd.f32 %v2472_v26, %v3112_v31  ;;  %v4917_v31 = vld [vmem:[#allocation8_spill] sm:$0xff] }
 0x4b1   :  { %2531 = vst.msk [vmem:[#allocation5 + $0x78] sm:$0xff] %vm43_vm0, %v2515_v54  ;;  %v2463_v17 = vmul.f32 %v2448_v28, %v2446_v9  ;;  %v2477_v46 = vadd.f32 %v4803_v47, %v2458_v21  ;;  %v2478_v2 = vadd.f32 %v4803_v47, %v2459_v38  ;;  %v2489_v1 = vadd.f32 %v2473_v35, %v4914_v36 }
 0x4b2   :  { %v2490_v42 = vadd.f32 %v2474_v11, %v4915_v27  ;;  %v2500_v63 = vmax.f32 %v2484_v62, 0.0  ;;  %v2501_v60 = vmax.f32 %v2485_v55, 0.0  ;;  %v2502_v3 = vmax.f32 %v2486_v13, 0.0 }
 0x4b3   :  { %v2479_v24 = vadd.f32 %v4803_v47, %v2460_v41  ;;  %v2491_v52 = vadd.f32 %v2475_v34, %v4916_v0  ;;  %v2503_v30 = vmax.f32 %v2487_v57, 0.0  ;;  %v2480_v59 = vadd.f32 %v4803_v47, %v2461_v33 }
 0x4b4   :  { %v2492_v28 = vadd.f32 %v2476_v23, %v4917_v31  ;;  %v2504_v40 = vmax.f32 %v2488_v56, 0.0  ;;  %2516 = vst.msk [vmem:[#allocation5] sm:$0xff] %vm43_vm0, %v2500_v63  ;;  %v2481_v51 = vadd.f32 %v4803_v47, %v2462_v12  ;;  %v2493_v8 = vadd.f32 %v2477_v46, %v4918_v5 }
 0x4b5   :  { %v2505_v15 = vmax.f32 %v2489_v1, 0.0  ;;  %2517 = vst.msk [vmem:[#allocation5 + $0x8] sm:$0xff] %vm43_vm0, %v2501_v60  ;;  %v2482_v61 = vadd.f32 %v4803_v47, %v2463_v17  ;;  %v2494_v37 = vadd.f32 %v2478_v2, %v4919_v49  ;;  %v2506_v32 = vmax.f32 %v2490_v42, 0.0  ;;  %v4923_v47 = vld [vmem:[#allocation14_spill] sm:$0xff] }
 0x4b6   :  { %2518 = vst.msk [vmem:[#allocation5 + $0x10] sm:$0xff] %vm43_vm0, %v2502_v3  ;;  %v2495_v10 = vadd.f32 %v2479_v24, %v4920_v44  ;;  %v2507_v58 = vmax.f32 %v2491_v52, 0.0  ;;  %v2496_v45 = vadd.f32 %v2480_v59, %v4921_v20  ;;  %v2508_v53 = vmax.f32 %v2492_v28, 0.0 }
 0x4b7   :  { %2519 = vst.msk [vmem:[#allocation5 + $0x18] sm:$0xff] %vm43_vm0, %v2503_v30  ;;  %v2497_v16 = vadd.f32 %v2481_v51, %v4922_v43  ;;  %v2509_v50 = vmax.f32 %v2493_v8, 0.0  ;;  %v2498_v6 = vadd.f32 %v2482_v61, %v4923_v47  ;;  %v2510_v39 = vmax.f32 %v2494_v37, 0.0 }
 0x4b8   :  { %2520 = vst.msk [vmem:[#allocation5 + $0x20] sm:$0xff] %vm43_vm0, %v2504_v40  ;;  %v2511_v18 = vmax.f32 %v2495_v10, 0.0  ;;  %v2512_v25 = vmax.f32 %v2496_v45, 0.0 }
 0x4b9   :  { %2521 = vst.msk [vmem:[#allocation5 + $0x28] sm:$0xff] %vm43_vm0, %v2505_v15  ;;  %v2513_v29 = vmax.f32 %v2497_v16, 0.0  ;;  %v2514_v14 = vmax.f32 %v2498_v6, 0.0 }
 0x4ba   :  { %2522 = vst.msk [vmem:[#allocation5 + $0x30] sm:$0xff] %vm43_vm0, %v2506_v32 }
 0x4bb   :  { %2523 = vst.msk [vmem:[#allocation5 + $0x38] sm:$0xff] %vm43_vm0, %v2507_v58 }
 0x4bc   :  { %2524 = vst.msk [vmem:[#allocation5 + $0x40] sm:$0xff] %vm43_vm0, %v2508_v53 }
 0x4bd   :  { %2525 = vst.msk [vmem:[#allocation5 + $0x48] sm:$0xff] %vm43_vm0, %v2509_v50 }
 0x4be   :  { %2526 = vst.msk [vmem:[#allocation5 + $0x50] sm:$0xff] %vm43_vm0, %v2510_v39 }
 0x4bf   :  { %2527 = vst.msk [vmem:[#allocation5 + $0x58] sm:$0xff] %vm43_vm0, %v2511_v18 }
 0x4c0   :  { %2528 = vst.msk [vmem:[#allocation5 + $0x60] sm:$0xff] %vm43_vm0, %v2512_v25 }
 0x4c1   :  { %2529 = vst.msk [vmem:[#allocation5 + $0x68] sm:$0xff] %vm43_vm0, %v2513_v29 }
 0x4c2   :  { %2530 = vst.msk [vmem:[#allocation5 + $0x70] sm:$0xff] %vm43_vm0, %v2514_v14 }
 0x4c3   :  { %2544 = dma.vmem_to_hbm [thread:$0]  %s2537_s6, 2048, %s2539_s10, [#allocation6], %s2650_s11, %s2650_s11, %s2651_s12  }
 0x4c4   :  { %2643 = dma.done.wait [#allocation6], 2048  }
 0x4c5   :  { %2644 = vsyncadd [#allocation6], 4294965248 }
 0x4c6   :  { %2549 = vsyncpa [#allocation6], 1 }

</bundles_post_ra>
